<compile_context>
chip_gen: v6e
topology: v6e:2x2x1
jax: 0.10.0
libtpu: 0.0.40
codegen_flags: <defaults>
</compile_context>

<pallas_src>
import jax
import jax.numpy as jnp
import numpy as np
from jax.experimental import pallas as pl
from jax.experimental.pallas import tpu as pltpu


def _round_up(v, m):
    return ((v + m - 1) // m) * m


def luna_block(x, w1, b1, w2, b2):
    """Fused LunaBlock forward.

    x : (N, Cin, D, H, W) float32           (PyTorch NCDHW)
    w1: (Cout, Cin, 3, 3, 3), b1: (Cout,)   (PyTorch Conv3d weight layout)
    w2: (Cout, Cout, 3, 3, 3), b2: (Cout,)
    returns (N, Cout, D//2, H//2, W//2)
    """
    N, Cin, D, H, W = x.shape
    Cout = w1.shape[0]
    assert D % 2 == 0 and H % 2 == 0 and W % 2 == 0

    Cp = max(8, _round_up(max(Cin, Cout), 8))      # channels padded to a sublane multiple
    Dp, Hp, Wp = D + 2, H + 2, W + 2               # zero-padded frame dims
    SH = Wp                                        # in-plane row stride (lanes)
    SD = _round_up(Hp * Wp, 128)                   # plane stride (lanes), vreg aligned
    Pl = Dp * SD                                   # flattened frame length (lane dim)
    A = _round_up(SD + SH + 1, 128)                # apron >= max |tap shift|, lane aligned
    D2, H2, W2 = D // 2, H // 2, W // 2
    M2 = D2 * H2 * W2                              # pooled cells per channel
    Mout = _round_up(max(M2, 128), 128)            # lane-dense output width
    assert M2 <= Mout

    # ------------------------- trace-time constants ------------------------- #
    # Interior mask: 1 at real-voxel frame positions, 0 at halo / plane-pad lanes.
    mask_np = np.zeros((Dp, SD), np.float32)
    interior = np.zeros((Dp, Hp, Wp), np.float32)
    interior[1:1 + D, 1:1 + H, 1:1 + W] = 1.0
    mask_np[:, :Hp * Wp] = interior.reshape(Dp, Hp * Wp)
    mask_np = mask_np.reshape(1, Pl)

    # For each pooled cell m: lane of its 2x2x2-window corner inside the d-compacted
    # (Cp, D2*SD) array; -1 marks unused output lanes (never matches the iota).
    cidx_np = np.full((1, Mout), -1, np.int32)
    for dd in range(D2):
        for hh in range(H2):
            for ww in range(W2):
                m = (dd * H2 + hh) * W2 + ww
                cidx_np[0, m] = dd * SD + (2 * hh + 1) * SH + (2 * ww + 1)

    def pack_w(w, b):
        co, ci = w.shape[0], w.shape[1]
        wp = jnp.zeros((Cp, Cp, 3, 3, 3), jnp.float32).at[:co, :ci].set(w.astype(jnp.float32))
        # column index = (kd*9 + kh*3 + kw)*Cp + cin -- must match the kernel's slab order.
        wr = jnp.transpose(wp, (0, 2, 3, 4, 1)).reshape(Cp, 27 * Cp)
        br = jnp.zeros((Cp, 1), jnp.float32).at[:co, 0].set(b.astype(jnp.float32))
        return wr, br

    w1r, b1r = pack_w(w1, b1)
    w2r, b2r = pack_w(w2, b2)

    # Frame the input once: channel pad + spatial zero pad + per-plane pad to SD lanes.
    xp = jnp.pad(x.astype(jnp.float32),
                 ((0, 0), (0, Cp - Cin), (1, 1), (1, 1), (1, 1)))        # (N,Cp,Dp,Hp,Wp)
    xp = xp.reshape(N, Cp, Dp, Hp * Wp)
    xp = jnp.pad(xp, ((0, 0), (0, 0), (0, 0), (0, SD - Hp * Wp)))
    xf = xp.reshape(N, Cp, Pl)

    def kernel(x_ref, w1_ref, b1_ref, w2_ref, b2_ref, mask_ref, cidx_ref,
               o_ref, act_ref, slab_ref):
        mask = mask_ref[...]                                   # (1, Pl) 0/1, loaded once
        zero_apron = jnp.zeros((Cp, A), jnp.float32)
        zero_plane = jnp.zeros((Cp, SD), jnp.float32)

        # Zero the aprons once; the activation region [A, A+Pl) is always fully overwritten, so
        # shifted reads only ever see real data or zeros (finite -> mask *multiply* is safe).
        act_ref[:, 0:A] = zero_apron
        act_ref[:, A + Pl:A + Pl + A] = zero_apron

        def conv_relu(src, w_ref, b_ref):
            # src: (Cp, Pl) activation with zeros at halo / plane-pad lanes.
            act_ref[:, A:A + Pl] = src
            # Build the 27-tap im2col slab: 9 unaligned in-plane shifted loads; the +/-SD
            # depth shifts are vreg-aligned value slices with zero fill (lands in masked halo).
            for kh in range(3):
                for kw in range(3):
                    din = (kh - 1) * SH + (kw - 1)
                    r = act_ref[:, A + din:A + din + Pl]                         # kd = 1
                    up = jnp.concatenate([r[:, SD:], zero_plane], axis=1)        # kd = 2
                    dn = jnp.concatenate([zero_plane, r[:, :Pl - SD]], axis=1)   # kd = 0
                    for kd, tap in ((0, dn), (1, r), (2, up)):
                        t = kd * 9 + kh * 3 + kw
                        slab_ref[t * Cp:(t + 1) * Cp, :] = tap
            acc = jnp.dot(w_ref[...], slab_ref[...],
                          preferred_element_type=jnp.float32)   # single K=27*Cp matmul
            acc = jnp.maximum(acc + b_ref[...], 0.0)            # bias + ReLU
            return acc * mask                                   # re-zero halo/pad lanes

        y = conv_relu(x_ref[0], w1_ref, b1_ref)                 # conv1 + relu1
        y = conv_relu(y, w2_ref, b2_ref)                        # conv2 + relu2

        # Separable MaxPool3d(2,2): after 3 shift+max stages the low corner of every 2x2x2
        # window holds its max.
        act_ref[:, A:A + Pl] = y
        y = jnp.maximum(y, act_ref[:, A + 1:A + 1 + Pl])                          # w
        act_ref[:, A:A + Pl] = y
        y = jnp.maximum(y, act_ref[:, A + SH:A + SH + Pl])                        # h
        y = jnp.maximum(y, jnp.concatenate([y[:, SD:], zero_plane], axis=1))      # d (aligned)

        # Compact pooled corners into dense lanes:
        #  (1) odd-d plane chunks are vreg-aligned slices -> free concat;
        #  (2) in-plane corner gather via a 0/1 matrix built in-kernel (iota == corner lane),
        #      replacing the old O(P*M2) HBM "sel" matrix.
        z = jnp.concatenate(
            [y[:, (2 * dd + 1) * SD:(2 * dd + 2) * SD] for dd in range(D2)], axis=1)
        q = jax.lax.broadcasted_iota(jnp.int32, (D2 * SD, Mout), 0)
        g = (q == cidx_ref[...]).astype(jnp.float32)
        o_ref[...] = jnp.dot(z, g, preferred_element_type=jnp.float32)[None]

    out = pl.pallas_call(
        kernel,
        out_shape=jax.ShapeDtypeStruct((N, Cp, Mout), jnp.float32),
        grid=(N,),
        in_specs=[
            pl.BlockSpec((1, Cp, Pl), lambda n: (n, 0, 0)),      # framed input
            pl.BlockSpec((Cp, 27 * Cp), lambda n: (0, 0)),       # w1 (packed)
            pl.BlockSpec((Cp, 1), lambda n: (0, 0)),             # b1
            pl.BlockSpec((Cp, 27 * Cp), lambda n: (0, 0)),       # w2 (packed)
            pl.BlockSpec((Cp, 1), lambda n: (0, 0)),             # b2
            pl.BlockSpec((1, Pl), lambda n: (0, 0)),             # interior mask
            pl.BlockSpec((1, Mout), lambda n: (0, 0)),           # pooled-corner lane indices
        ],
        out_specs=pl.BlockSpec((1, Cp, Mout), lambda n: (n, 0, 0)),
        scratch_shapes=[
            pltpu.VMEM((Cp, A + Pl + A), jnp.float32),           # apron-framed activation
            pltpu.VMEM((27 * Cp, Pl), jnp.float32),              # 27-tap im2col slab
        ],
        # grid=(N,) "parallel": >=2 independent work items so both v7x TensorCores get work.
        compiler_params=pltpu.CompilerParams(dimension_semantics=("parallel",)),
    )(xf, w1r, b1r, w2r, b2r, jnp.asarray(mask_np), jnp.asarray(cidx_np))

    # TODO(synk): for production-size volumes add a depth-slab grid axis (1-plane halo) and set
    #   vmem_limit_bytes so blocks + the im2col slab fit v7x's 64 MiB VMEM; unnecessary here.
    # TODO(synk): on single-TC v5e/v6e, fold small batches into the lane dim (NB*Pl-wide RHS,
    #   grid=cdiv(N,NB)) to amortize per-grid-step overhead and reuse pushed weights.
    # TODO(synk): bf16 weight/slab operands would raise MXU rate 2-4x but break the 1e-4
    #   tolerance at K=216; kept f32.
    return out[:, :Cout, :M2].reshape(N, Cout, D2, H2, W2)


# ------------------------------ pure-JAX reference ------------------------------ #
def luna_block_reference(x, w1, b1, w2, b2):
    dn = ("NCDHW", "OIDHW", "NCDHW")
    y = jax.lax.conv_general_dilated(x.astype(jnp.float32), w1, (1, 1, 1), "SAME",
                                     dimension_numbers=dn)
    y = jnp.maximum(y + b1.reshape(1, -1, 1, 1, 1), 0.0)
    y = jax.lax.conv_general_dilated(y, w2, (1, 1, 1), "SAME", dimension_numbers=dn)
    y = jnp.maximum(y + b2.reshape(1, -1, 1, 1, 1), 0.0)
    y = jax.lax.reduce_window(y, -jnp.inf, jax.lax.max,
                              (1, 1, 2, 2, 2), (1, 1, 2, 2, 2), "VALID")
    return y


if __name__ == "__main__":
    # Small shapes consistent with the module: N=2, in_channels=4, conv_channels=8, D=H=W=8.
    N, Cin, Cout, D, H, W = 2, 4, 8, 8, 8, 8

    key = jax.random.PRNGKey(0)
    kx, kw1, kb1, kw2, kb2 = jax.random.split(key, 5)

    x = jax.random.normal(kx, (N, Cin, D, H, W), jnp.float32)            # PyTorch NCDHW input
    w1 = jax.random.normal(kw1, (Cout, Cin, 3, 3, 3), jnp.float32) * 0.1
    b1 = jax.random.normal(kb1, (Cout,), jnp.float32) * 0.1
    w2 = jax.random.normal(kw2, (Cout, Cout, 3, 3, 3), jnp.float32) * 0.1
    b2 = jax.random.normal(kb2, (Cout,), jnp.float32) * 0.1

    out = jax.block_until_ready(jax.jit(luna_block)(x, w1, b1, w2, b2))
    ref = jax.block_until_ready(luna_block_reference(x, w1, b1, w2, b2))

    assert out.shape == (N, Cout, D // 2, H // 2, W // 2), out.shape
    max_err = float(jnp.max(jnp.abs(out - ref)))
    assert jnp.allclose(out, ref, atol=1e-4, rtol=1e-4), max_err

    print("KERNEL_OK")
</pallas_src>

<mosaic_0001>
module attributes {stable_mosaic.version = 11 : i64} {
  func.func @kernel(%arg0: i32, %arg1: memref<1x8x1280xf32, #tpu.memory_space<vmem>>, %arg2: memref<8x216xf32, #tpu.memory_space<vmem>>, %arg3: memref<8x1xf32, #tpu.memory_space<vmem>>, %arg4: memref<8x216xf32, #tpu.memory_space<vmem>>, %arg5: memref<8x1xf32, #tpu.memory_space<vmem>>, %arg6: memref<1x1280xf32, #tpu.memory_space<vmem>>, %arg7: memref<1x128xi32, #tpu.memory_space<vmem>>, %arg8: memref<1x8x128xf32, #tpu.memory_space<vmem>>, %arg9: memref<8x1792xf32, #tpu.memory_space<vmem>>, %arg10: memref<216x1280xf32, #tpu.memory_space<vmem>>) attributes {dimension_semantics = [#tpu.dimension_semantics<parallel>], iteration_bounds = array<i64: 2>, scalar_prefetch = 0 : i64, scratch_operands = 2 : i64, tpu.core_type = #tpu.core_type<tc>, window_params = [{transform_indices = @transform_0, window_bounds = array<i64: 1, 8, 1280>}, {pipeline_mode = #tpu.pipeline_mode<synchronous>, transform_indices = @transform_1, window_bounds = array<i64: 8, 216>}, {pipeline_mode = #tpu.pipeline_mode<synchronous>, transform_indices = @transform_2, window_bounds = array<i64: 8, 1>}, {pipeline_mode = #tpu.pipeline_mode<synchronous>, transform_indices = @transform_3, window_bounds = array<i64: 8, 216>}, {pipeline_mode = #tpu.pipeline_mode<synchronous>, transform_indices = @transform_4, window_bounds = array<i64: 8, 1>}, {pipeline_mode = #tpu.pipeline_mode<synchronous>, transform_indices = @transform_5, window_bounds = array<i64: 1, 1280>}, {pipeline_mode = #tpu.pipeline_mode<synchronous>, transform_indices = @transform_6, window_bounds = array<i64: 1, 128>}, {transform_indices = @transform_7, window_bounds = array<i64: 1, 8, 128>}]} {
    %c0 = arith.constant 0 : index
    %c0_0 = arith.constant 0 : index
    %0 = vector.load %arg6[%c0, %c0_0] : memref<1x1280xf32, #tpu.memory_space<vmem>>, vector<1x1280xf32>
    %cst = arith.constant 0.000000e+00 : f32
    %1 = vector.broadcast %cst : f32 to vector<8x256xf32>
    %cst_1 = arith.constant 0.000000e+00 : f32
    %2 = vector.broadcast %cst_1 : f32 to vector<8x128xf32>
    %c0_2 = arith.constant 0 : index
    %c0_3 = arith.constant 0 : index
    %3 = vector.load %arg9[%c0_2, %c0_3] : memref<8x1792xf32, #tpu.memory_space<vmem>>, vector<8x256xf32>
    tpu.vector_store %arg9[%c0_2, %c0_3], %1 {strides = array<i32>} : memref<8x1792xf32, #tpu.memory_space<vmem>>, vector<8x256xf32>,
    %c0_4 = arith.constant 0 : index
    %c1536 = arith.constant 1536 : index
    %4 = vector.load %arg9[%c0_4, %c1536] : memref<8x1792xf32, #tpu.memory_space<vmem>>, vector<8x256xf32>
    tpu.vector_store %arg9[%c0_4, %c1536], %1 {strides = array<i32>} : memref<8x1792xf32, #tpu.memory_space<vmem>>, vector<8x256xf32>,
    %c0_5 = arith.constant 0 : index
    %c0_6 = arith.constant 0 : index
    %c0_7 = arith.constant 0 : index
    %5 = vector.load %arg1[%c0_5, %c0_6, %c0_7] : memref<1x8x1280xf32, #tpu.memory_space<vmem>>, vector<1x8x1280xf32>
    %6 = vector.shape_cast %5 : vector<1x8x1280xf32> to vector<8x1280xf32>
    %c0_8 = arith.constant 0 : index
    %c256 = arith.constant 256 : index
    %7 = vector.load %arg9[%c0_8, %c256] : memref<8x1792xf32, #tpu.memory_space<vmem>>, vector<8x1280xf32>
    tpu.vector_store %arg9[%c0_8, %c256], %6 {strides = array<i32>} : memref<8x1792xf32, #tpu.memory_space<vmem>>, vector<8x1280xf32>,
    %c0_9 = arith.constant 0 : index
    %c245 = arith.constant 245 : index
    %8 = vector.load %arg9[%c0_9, %c245] : memref<8x1792xf32, #tpu.memory_space<vmem>>, vector<8x1280xf32>
    %9 = vector.extract_strided_slice %8 {offsets = [0, 128], sizes = [8, 1152], strides = [1, 1]} : vector<8x1280xf32> to vector<8x1152xf32>
    %10 = tpu.concatenate %9, %2 in 1 : vector<8x1152xf32>, vector<8x128xf32> -> vector<8x1280xf32>
    %11 = vector.extract_strided_slice %8 {offsets = [0, 0], sizes = [8, 1152], strides = [1, 1]} : vector<8x1280xf32> to vector<8x1152xf32>
    %12 = tpu.concatenate %2, %11 in 1 : vector<8x128xf32>, vector<8x1152xf32> -> vector<8x1280xf32>
    %c0_10 = arith.constant 0 : index
    %c0_11 = arith.constant 0 : index
    %13 = vector.load %arg10[%c0_10, %c0_11] : memref<216x1280xf32, #tpu.memory_space<vmem>>, vector<8x1280xf32>
    tpu.vector_store %arg10[%c0_10, %c0_11], %12 {strides = array<i32>} : memref<216x1280xf32, #tpu.memory_space<vmem>>, vector<8x1280xf32>,
    %c72 = arith.constant 72 : index
    %c0_12 = arith.constant 0 : index
    %14 = vector.load %arg10[%c72, %c0_12] : memref<216x1280xf32, #tpu.memory_space<vmem>>, vector<8x1280xf32>
    tpu.vector_store %arg10[%c72, %c0_12], %8 {strides = array<i32>} : memref<216x1280xf32, #tpu.memory_space<vmem>>, vector<8x1280xf32>,
    %c144 = arith.constant 144 : index
    %c0_13 = arith.constant 0 : index
    %15 = vector.load %arg10[%c144, %c0_13] : memref<216x1280xf32, #tpu.memory_space<vmem>>, vector<8x1280xf32>
    tpu.vector_store %arg10[%c144, %c0_13], %10 {strides = array<i32>} : memref<216x1280xf32, #tpu.memory_space<vmem>>, vector<8x1280xf32>,
    %c0_14 = arith.constant 0 : index
    %c246 = arith.constant 246 : index
    %16 = vector.load %arg9[%c0_14, %c246] : memref<8x1792xf32, #tpu.memory_space<vmem>>, vector<8x1280xf32>
    %17 = vector.extract_strided_slice %16 {offsets = [0, 128], sizes = [8, 1152], strides = [1, 1]} : vector<8x1280xf32> to vector<8x1152xf32>
    %18 = tpu.concatenate %17, %2 in 1 : vector<8x1152xf32>, vector<8x128xf32> -> vector<8x1280xf32>
    %19 = vector.extract_strided_slice %16 {offsets = [0, 0], sizes = [8, 1152], strides = [1, 1]} : vector<8x1280xf32> to vector<8x1152xf32>
    %20 = tpu.concatenate %2, %19 in 1 : vector<8x128xf32>, vector<8x1152xf32> -> vector<8x1280xf32>
    %c8 = arith.constant 8 : index
    %c0_15 = arith.constant 0 : index
    %21 = vector.load %arg10[%c8, %c0_15] : memref<216x1280xf32, #tpu.memory_space<vmem>>, vector<8x1280xf32>
    tpu.vector_store %arg10[%c8, %c0_15], %20 {strides = array<i32>} : memref<216x1280xf32, #tpu.memory_space<vmem>>, vector<8x1280xf32>,
    %c80 = arith.constant 80 : index
    %c0_16 = arith.constant 0 : index
    %22 = vector.load %arg10[%c80, %c0_16] : memref<216x1280xf32, #tpu.memory_space<vmem>>, vector<8x1280xf32>
    tpu.vector_store %arg10[%c80, %c0_16], %16 {strides = array<i32>} : memref<216x1280xf32, #tpu.memory_space<vmem>>, vector<8x1280xf32>,
    %c152 = arith.constant 152 : index
    %c0_17 = arith.constant 0 : index
    %23 = vector.load %arg10[%c152, %c0_17] : memref<216x1280xf32, #tpu.memory_space<vmem>>, vector<8x1280xf32>
    tpu.vector_store %arg10[%c152, %c0_17], %18 {strides = array<i32>} : memref<216x1280xf32, #tpu.memory_space<vmem>>, vector<8x1280xf32>,
    %c0_18 = arith.constant 0 : index
    %c247 = arith.constant 247 : index
    %24 = vector.load %arg9[%c0_18, %c247] : memref<8x1792xf32, #tpu.memory_space<vmem>>, vector<8x1280xf32>
    %25 = vector.extract_strided_slice %24 {offsets = [0, 128], sizes = [8, 1152], strides = [1, 1]} : vector<8x1280xf32> to vector<8x1152xf32>
    %26 = tpu.concatenate %25, %2 in 1 : vector<8x1152xf32>, vector<8x128xf32> -> vector<8x1280xf32>
    %27 = vector.extract_strided_slice %24 {offsets = [0, 0], sizes = [8, 1152], strides = [1, 1]} : vector<8x1280xf32> to vector<8x1152xf32>
    %28 = tpu.concatenate %2, %27 in 1 : vector<8x128xf32>, vector<8x1152xf32> -> vector<8x1280xf32>
    %c16 = arith.constant 16 : index
    %c0_19 = arith.constant 0 : index
    %29 = vector.load %arg10[%c16, %c0_19] : memref<216x1280xf32, #tpu.memory_space<vmem>>, vector<8x1280xf32>
    tpu.vector_store %arg10[%c16, %c0_19], %28 {strides = array<i32>} : memref<216x1280xf32, #tpu.memory_space<vmem>>, vector<8x1280xf32>,
    %c88 = arith.constant 88 : index
    %c0_20 = arith.constant 0 : index
    %30 = vector.load %arg10[%c88, %c0_20] : memref<216x1280xf32, #tpu.memory_space<vmem>>, vector<8x1280xf32>
    tpu.vector_store %arg10[%c88, %c0_20], %24 {strides = array<i32>} : memref<216x1280xf32, #tpu.memory_space<vmem>>, vector<8x1280xf32>,
    %c160 = arith.constant 160 : index
    %c0_21 = arith.constant 0 : index
    %31 = vector.load %arg10[%c160, %c0_21] : memref<216x1280xf32, #tpu.memory_space<vmem>>, vector<8x1280xf32>
    tpu.vector_store %arg10[%c160, %c0_21], %26 {strides = array<i32>} : memref<216x1280xf32, #tpu.memory_space<vmem>>, vector<8x1280xf32>,
    %c0_22 = arith.constant 0 : index
    %c255 = arith.constant 255 : index
    %32 = vector.load %arg9[%c0_22, %c255] : memref<8x1792xf32, #tpu.memory_space<vmem>>, vector<8x1280xf32>
    %33 = vector.extract_strided_slice %32 {offsets = [0, 128], sizes = [8, 1152], strides = [1, 1]} : vector<8x1280xf32> to vector<8x1152xf32>
    %34 = tpu.concatenate %33, %2 in 1 : vector<8x1152xf32>, vector<8x128xf32> -> vector<8x1280xf32>
    %35 = vector.extract_strided_slice %32 {offsets = [0, 0], sizes = [8, 1152], strides = [1, 1]} : vector<8x1280xf32> to vector<8x1152xf32>
    %36 = tpu.concatenate %2, %35 in 1 : vector<8x128xf32>, vector<8x1152xf32> -> vector<8x1280xf32>
    %c24 = arith.constant 24 : index
    %c0_23 = arith.constant 0 : index
    %37 = vector.load %arg10[%c24, %c0_23] : memref<216x1280xf32, #tpu.memory_space<vmem>>, vector<8x1280xf32>
    tpu.vector_store %arg10[%c24, %c0_23], %36 {strides = array<i32>} : memref<216x1280xf32, #tpu.memory_space<vmem>>, vector<8x1280xf32>,
    %c96 = arith.constant 96 : index
    %c0_24 = arith.constant 0 : index
    %38 = vector.load %arg10[%c96, %c0_24] : memref<216x1280xf32, #tpu.memory_space<vmem>>, vector<8x1280xf32>
    tpu.vector_store %arg10[%c96, %c0_24], %32 {strides = array<i32>} : memref<216x1280xf32, #tpu.memory_space<vmem>>, vector<8x1280xf32>,
    %c168 = arith.constant 168 : index
    %c0_25 = arith.constant 0 : index
    %39 = vector.load %arg10[%c168, %c0_25] : memref<216x1280xf32, #tpu.memory_space<vmem>>, vector<8x1280xf32>
    tpu.vector_store %arg10[%c168, %c0_25], %34 {strides = array<i32>} : memref<216x1280xf32, #tpu.memory_space<vmem>>, vector<8x1280xf32>,
    %c0_26 = arith.constant 0 : index
    %c256_27 = arith.constant 256 : index
    %40 = vector.load %arg9[%c0_26, %c256_27] : memref<8x1792xf32, #tpu.memory_space<vmem>>, vector<8x1280xf32>
    %41 = vector.extract_strided_slice %40 {offsets = [0, 128], sizes = [8, 1152], strides = [1, 1]} : vector<8x1280xf32> to vector<8x1152xf32>
    %42 = tpu.concatenate %41, %2 in 1 : vector<8x1152xf32>, vector<8x128xf32> -> vector<8x1280xf32>
    %43 = vector.extract_strided_slice %40 {offsets = [0, 0], sizes = [8, 1152], strides = [1, 1]} : vector<8x1280xf32> to vector<8x1152xf32>
    %44 = tpu.concatenate %2, %43 in 1 : vector<8x128xf32>, vector<8x1152xf32> -> vector<8x1280xf32>
    %c32 = arith.constant 32 : index
    %c0_28 = arith.constant 0 : index
    %45 = vector.load %arg10[%c32, %c0_28] : memref<216x1280xf32, #tpu.memory_space<vmem>>, vector<8x1280xf32>
    tpu.vector_store %arg10[%c32, %c0_28], %44 {strides = array<i32>} : memref<216x1280xf32, #tpu.memory_space<vmem>>, vector<8x1280xf32>,
    %c104 = arith.constant 104 : index
    %c0_29 = arith.constant 0 : index
    %46 = vector.load %arg10[%c104, %c0_29] : memref<216x1280xf32, #tpu.memory_space<vmem>>, vector<8x1280xf32>
    tpu.vector_store %arg10[%c104, %c0_29], %40 {strides = array<i32>} : memref<216x1280xf32, #tpu.memory_space<vmem>>, vector<8x1280xf32>,
    %c176 = arith.constant 176 : index
    %c0_30 = arith.constant 0 : index
    %47 = vector.load %arg10[%c176, %c0_30] : memref<216x1280xf32, #tpu.memory_space<vmem>>, vector<8x1280xf32>
    tpu.vector_store %arg10[%c176, %c0_30], %42 {strides = array<i32>} : memref<216x1280xf32, #tpu.memory_space<vmem>>, vector<8x1280xf32>,
    %c0_31 = arith.constant 0 : index
    %c257 = arith.constant 257 : index
    %48 = vector.load %arg9[%c0_31, %c257] : memref<8x1792xf32, #tpu.memory_space<vmem>>, vector<8x1280xf32>
    %49 = vector.extract_strided_slice %48 {offsets = [0, 128], sizes = [8, 1152], strides = [1, 1]} : vector<8x1280xf32> to vector<8x1152xf32>
    %50 = tpu.concatenate %49, %2 in 1 : vector<8x1152xf32>, vector<8x128xf32> -> vector<8x1280xf32>
    %51 = vector.extract_strided_slice %48 {offsets = [0, 0], sizes = [8, 1152], strides = [1, 1]} : vector<8x1280xf32> to vector<8x1152xf32>
    %52 = tpu.concatenate %2, %51 in 1 : vector<8x128xf32>, vector<8x1152xf32> -> vector<8x1280xf32>
    %c40 = arith.constant 40 : index
    %c0_32 = arith.constant 0 : index
    %53 = vector.load %arg10[%c40, %c0_32] : memref<216x1280xf32, #tpu.memory_space<vmem>>, vector<8x1280xf32>
    tpu.vector_store %arg10[%c40, %c0_32], %52 {strides = array<i32>} : memref<216x1280xf32, #tpu.memory_space<vmem>>, vector<8x1280xf32>,
    %c112 = arith.constant 112 : index
    %c0_33 = arith.constant 0 : index
    %54 = vector.load %arg10[%c112, %c0_33] : memref<216x1280xf32, #tpu.memory_space<vmem>>, vector<8x1280xf32>
    tpu.vector_store %arg10[%c112, %c0_33], %48 {strides = array<i32>} : memref<216x1280xf32, #tpu.memory_space<vmem>>, vector<8x1280xf32>,
    %c184 = arith.constant 184 : index
    %c0_34 = arith.constant 0 : index
    %55 = vector.load %arg10[%c184, %c0_34] : memref<216x1280xf32, #tpu.memory_space<vmem>>, vector<8x1280xf32>
    tpu.vector_store %arg10[%c184, %c0_34], %50 {strides = array<i32>} : memref<216x1280xf32, #tpu.memory_space<vmem>>, vector<8x1280xf32>,
    %c0_35 = arith.constant 0 : index
    %c265 = arith.constant 265 : index
    %56 = vector.load %arg9[%c0_35, %c265] : memref<8x1792xf32, #tpu.memory_space<vmem>>, vector<8x1280xf32>
    %57 = vector.extract_strided_slice %56 {offsets = [0, 128], sizes = [8, 1152], strides = [1, 1]} : vector<8x1280xf32> to vector<8x1152xf32>
    %58 = tpu.concatenate %57, %2 in 1 : vector<8x1152xf32>, vector<8x128xf32> -> vector<8x1280xf32>
    %59 = vector.extract_strided_slice %56 {offsets = [0, 0], sizes = [8, 1152], strides = [1, 1]} : vector<8x1280xf32> to vector<8x1152xf32>
    %60 = tpu.concatenate %2, %59 in 1 : vector<8x128xf32>, vector<8x1152xf32> -> vector<8x1280xf32>
    %c48 = arith.constant 48 : index
    %c0_36 = arith.constant 0 : index
    %61 = vector.load %arg10[%c48, %c0_36] : memref<216x1280xf32, #tpu.memory_space<vmem>>, vector<8x1280xf32>
    tpu.vector_store %arg10[%c48, %c0_36], %60 {strides = array<i32>} : memref<216x1280xf32, #tpu.memory_space<vmem>>, vector<8x1280xf32>,
    %c120 = arith.constant 120 : index
    %c0_37 = arith.constant 0 : index
    %62 = vector.load %arg10[%c120, %c0_37] : memref<216x1280xf32, #tpu.memory_space<vmem>>, vector<8x1280xf32>
    tpu.vector_store %arg10[%c120, %c0_37], %56 {strides = array<i32>} : memref<216x1280xf32, #tpu.memory_space<vmem>>, vector<8x1280xf32>,
    %c192 = arith.constant 192 : index
    %c0_38 = arith.constant 0 : index
    %63 = vector.load %arg10[%c192, %c0_38] : memref<216x1280xf32, #tpu.memory_space<vmem>>, vector<8x1280xf32>
    tpu.vector_store %arg10[%c192, %c0_38], %58 {strides = array<i32>} : memref<216x1280xf32, #tpu.memory_space<vmem>>, vector<8x1280xf32>,
    %c0_39 = arith.constant 0 : index
    %c266 = arith.constant 266 : index
    %64 = vector.load %arg9[%c0_39, %c266] : memref<8x1792xf32, #tpu.memory_space<vmem>>, vector<8x1280xf32>
    %65 = vector.extract_strided_slice %64 {offsets = [0, 128], sizes = [8, 1152], strides = [1, 1]} : vector<8x1280xf32> to vector<8x1152xf32>
    %66 = tpu.concatenate %65, %2 in 1 : vector<8x1152xf32>, vector<8x128xf32> -> vector<8x1280xf32>
    %67 = vector.extract_strided_slice %64 {offsets = [0, 0], sizes = [8, 1152], strides = [1, 1]} : vector<8x1280xf32> to vector<8x1152xf32>
    %68 = tpu.concatenate %2, %67 in 1 : vector<8x128xf32>, vector<8x1152xf32> -> vector<8x1280xf32>
    %c56 = arith.constant 56 : index
    %c0_40 = arith.constant 0 : index
    %69 = vector.load %arg10[%c56, %c0_40] : memref<216x1280xf32, #tpu.memory_space<vmem>>, vector<8x1280xf32>
    tpu.vector_store %arg10[%c56, %c0_40], %68 {strides = array<i32>} : memref<216x1280xf32, #tpu.memory_space<vmem>>, vector<8x1280xf32>,
    %c128 = arith.constant 128 : index
    %c0_41 = arith.constant 0 : index
    %70 = vector.load %arg10[%c128, %c0_41] : memref<216x1280xf32, #tpu.memory_space<vmem>>, vector<8x1280xf32>
    tpu.vector_store %arg10[%c128, %c0_41], %64 {strides = array<i32>} : memref<216x1280xf32, #tpu.memory_space<vmem>>, vector<8x1280xf32>,
    %c200 = arith.constant 200 : index
    %c0_42 = arith.constant 0 : index
    %71 = vector.load %arg10[%c200, %c0_42] : memref<216x1280xf32, #tpu.memory_space<vmem>>, vector<8x1280xf32>
    tpu.vector_store %arg10[%c200, %c0_42], %66 {strides = array<i32>} : memref<216x1280xf32, #tpu.memory_space<vmem>>, vector<8x1280xf32>,
    %c0_43 = arith.constant 0 : index
    %c267 = arith.constant 267 : index
    %72 = vector.load %arg9[%c0_43, %c267] : memref<8x1792xf32, #tpu.memory_space<vmem>>, vector<8x1280xf32>
    %73 = vector.extract_strided_slice %72 {offsets = [0, 128], sizes = [8, 1152], strides = [1, 1]} : vector<8x1280xf32> to vector<8x1152xf32>
    %74 = tpu.concatenate %73, %2 in 1 : vector<8x1152xf32>, vector<8x128xf32> -> vector<8x1280xf32>
    %75 = vector.extract_strided_slice %72 {offsets = [0, 0], sizes = [8, 1152], strides = [1, 1]} : vector<8x1280xf32> to vector<8x1152xf32>
    %76 = tpu.concatenate %2, %75 in 1 : vector<8x128xf32>, vector<8x1152xf32> -> vector<8x1280xf32>
    %c64 = arith.constant 64 : index
    %c0_44 = arith.constant 0 : index
    %77 = vector.load %arg10[%c64, %c0_44] : memref<216x1280xf32, #tpu.memory_space<vmem>>, vector<8x1280xf32>
    tpu.vector_store %arg10[%c64, %c0_44], %76 {strides = array<i32>} : memref<216x1280xf32, #tpu.memory_space<vmem>>, vector<8x1280xf32>,
    %c136 = arith.constant 136 : index
    %c0_45 = arith.constant 0 : index
    %78 = vector.load %arg10[%c136, %c0_45] : memref<216x1280xf32, #tpu.memory_space<vmem>>, vector<8x1280xf32>
    tpu.vector_store %arg10[%c136, %c0_45], %72 {strides = array<i32>} : memref<216x1280xf32, #tpu.memory_space<vmem>>, vector<8x1280xf32>,
    %c208 = arith.constant 208 : index
    %c0_46 = arith.constant 0 : index
    %79 = vector.load %arg10[%c208, %c0_46] : memref<216x1280xf32, #tpu.memory_space<vmem>>, vector<8x1280xf32>
    tpu.vector_store %arg10[%c208, %c0_46], %74 {strides = array<i32>} : memref<216x1280xf32, #tpu.memory_space<vmem>>, vector<8x1280xf32>,
    %c0_47 = arith.constant 0 : index
    %c0_48 = arith.constant 0 : index
    %80 = vector.load %arg2[%c0_47, %c0_48] : memref<8x216xf32, #tpu.memory_space<vmem>>, vector<8x216xf32>
    %c0_49 = arith.constant 0 : index
    %c0_50 = arith.constant 0 : index
    %81 = vector.load %arg10[%c0_49, %c0_50] : memref<216x1280xf32, #tpu.memory_space<vmem>>, vector<216x1280xf32>
    %cst_51 = arith.constant dense<0.000000e+00> : vector<8x1280xf32>
    %82 = tpu.matmul %80, %81, %cst_51 {dimension_numbers = #tpu.dot_dimension_numbers<[1], [0], [0], [1], [0, 0, 1, 1], [], []>} : vector<8x216xf32>, vector<216x1280xf32>, vector<8x1280xf32> -> vector<8x1280xf32>
    %c0_52 = arith.constant 0 : index
    %c0_53 = arith.constant 0 : index
    %83 = vector.load %arg3[%c0_52, %c0_53] : memref<8x1xf32, #tpu.memory_space<vmem>>, vector<8x1xf32>
    %84 = vector.broadcast %83 : vector<8x1xf32> to vector<8x1280xf32>
    %85 = arith.addf %82, %84 : vector<8x1280xf32>
    %cst_54 = arith.constant 0.000000e+00 : f32
    %86 = vector.broadcast %cst_54 : f32 to vector<8x1280xf32>
    %87 = arith.maximumf %85, %86 : vector<8x1280xf32>
    %88 = vector.broadcast %0 : vector<1x1280xf32> to vector<8x1280xf32>
    %89 = arith.mulf %87, %88 : vector<8x1280xf32>
    %c0_55 = arith.constant 0 : index
    %c256_56 = arith.constant 256 : index
    %90 = vector.load %arg9[%c0_55, %c256_56] : memref<8x1792xf32, #tpu.memory_space<vmem>>, vector<8x1280xf32>
    tpu.vector_store %arg9[%c0_55, %c256_56], %89 {strides = array<i32>} : memref<8x1792xf32, #tpu.memory_space<vmem>>, vector<8x1280xf32>,
    %c0_57 = arith.constant 0 : index
    %c245_58 = arith.constant 245 : index
    %91 = vector.load %arg9[%c0_57, %c245_58] : memref<8x1792xf32, #tpu.memory_space<vmem>>, vector<8x1280xf32>
    %92 = vector.extract_strided_slice %91 {offsets = [0, 128], sizes = [8, 1152], strides = [1, 1]} : vector<8x1280xf32> to vector<8x1152xf32>
    %93 = tpu.concatenate %92, %2 in 1 : vector<8x1152xf32>, vector<8x128xf32> -> vector<8x1280xf32>
    %94 = vector.extract_strided_slice %91 {offsets = [0, 0], sizes = [8, 1152], strides = [1, 1]} : vector<8x1280xf32> to vector<8x1152xf32>
    %95 = tpu.concatenate %2, %94 in 1 : vector<8x128xf32>, vector<8x1152xf32> -> vector<8x1280xf32>
    %c0_59 = arith.constant 0 : index
    %c0_60 = arith.constant 0 : index
    %96 = vector.load %arg10[%c0_59, %c0_60] : memref<216x1280xf32, #tpu.memory_space<vmem>>, vector<8x1280xf32>
    tpu.vector_store %arg10[%c0_59, %c0_60], %95 {strides = array<i32>} : memref<216x1280xf32, #tpu.memory_space<vmem>>, vector<8x1280xf32>,
    %c72_61 = arith.constant 72 : index
    %c0_62 = arith.constant 0 : index
    %97 = vector.load %arg10[%c72_61, %c0_62] : memref<216x1280xf32, #tpu.memory_space<vmem>>, vector<8x1280xf32>
    tpu.vector_store %arg10[%c72_61, %c0_62], %91 {strides = array<i32>} : memref<216x1280xf32, #tpu.memory_space<vmem>>, vector<8x1280xf32>,
    %c144_63 = arith.constant 144 : index
    %c0_64 = arith.constant 0 : index
    %98 = vector.load %arg10[%c144_63, %c0_64] : memref<216x1280xf32, #tpu.memory_space<vmem>>, vector<8x1280xf32>
    tpu.vector_store %arg10[%c144_63, %c0_64], %93 {strides = array<i32>} : memref<216x1280xf32, #tpu.memory_space<vmem>>, vector<8x1280xf32>,
    %c0_65 = arith.constant 0 : index
    %c246_66 = arith.constant 246 : index
    %99 = vector.load %arg9[%c0_65, %c246_66] : memref<8x1792xf32, #tpu.memory_space<vmem>>, vector<8x1280xf32>
    %100 = vector.extract_strided_slice %99 {offsets = [0, 128], sizes = [8, 1152], strides = [1, 1]} : vector<8x1280xf32> to vector<8x1152xf32>
    %101 = tpu.concatenate %100, %2 in 1 : vector<8x1152xf32>, vector<8x128xf32> -> vector<8x1280xf32>
    %102 = vector.extract_strided_slice %99 {offsets = [0, 0], sizes = [8, 1152], strides = [1, 1]} : vector<8x1280xf32> to vector<8x1152xf32>
    %103 = tpu.concatenate %2, %102 in 1 : vector<8x128xf32>, vector<8x1152xf32> -> vector<8x1280xf32>
    %c8_67 = arith.constant 8 : index
    %c0_68 = arith.constant 0 : index
    %104 = vector.load %arg10[%c8_67, %c0_68] : memref<216x1280xf32, #tpu.memory_space<vmem>>, vector<8x1280xf32>
    tpu.vector_store %arg10[%c8_67, %c0_68], %103 {strides = array<i32>} : memref<216x1280xf32, #tpu.memory_space<vmem>>, vector<8x1280xf32>,
    %c80_69 = arith.constant 80 : index
    %c0_70 = arith.constant 0 : index
    %105 = vector.load %arg10[%c80_69, %c0_70] : memref<216x1280xf32, #tpu.memory_space<vmem>>, vector<8x1280xf32>
    tpu.vector_store %arg10[%c80_69, %c0_70], %99 {strides = array<i32>} : memref<216x1280xf32, #tpu.memory_space<vmem>>, vector<8x1280xf32>,
    %c152_71 = arith.constant 152 : index
    %c0_72 = arith.constant 0 : index
    %106 = vector.load %arg10[%c152_71, %c0_72] : memref<216x1280xf32, #tpu.memory_space<vmem>>, vector<8x1280xf32>
    tpu.vector_store %arg10[%c152_71, %c0_72], %101 {strides = array<i32>} : memref<216x1280xf32, #tpu.memory_space<vmem>>, vector<8x1280xf32>,
    %c0_73 = arith.constant 0 : index
    %c247_74 = arith.constant 247 : index
    %107 = vector.load %arg9[%c0_73, %c247_74] : memref<8x1792xf32, #tpu.memory_space<vmem>>, vector<8x1280xf32>
    %108 = vector.extract_strided_slice %107 {offsets = [0, 128], sizes = [8, 1152], strides = [1, 1]} : vector<8x1280xf32> to vector<8x1152xf32>
    %109 = tpu.concatenate %108, %2 in 1 : vector<8x1152xf32>, vector<8x128xf32> -> vector<8x1280xf32>
    %110 = vector.extract_strided_slice %107 {offsets = [0, 0], sizes = [8, 1152], strides = [1, 1]} : vector<8x1280xf32> to vector<8x1152xf32>
    %111 = tpu.concatenate %2, %110 in 1 : vector<8x128xf32>, vector<8x1152xf32> -> vector<8x1280xf32>
    %c16_75 = arith.constant 16 : index
    %c0_76 = arith.constant 0 : index
    %112 = vector.load %arg10[%c16_75, %c0_76] : memref<216x1280xf32, #tpu.memory_space<vmem>>, vector<8x1280xf32>
    tpu.vector_store %arg10[%c16_75, %c0_76], %111 {strides = array<i32>} : memref<216x1280xf32, #tpu.memory_space<vmem>>, vector<8x1280xf32>,
    %c88_77 = arith.constant 88 : index
    %c0_78 = arith.constant 0 : index
    %113 = vector.load %arg10[%c88_77, %c0_78] : memref<216x1280xf32, #tpu.memory_space<vmem>>, vector<8x1280xf32>
    tpu.vector_store %arg10[%c88_77, %c0_78], %107 {strides = array<i32>} : memref<216x1280xf32, #tpu.memory_space<vmem>>, vector<8x1280xf32>,
    %c160_79 = arith.constant 160 : index
    %c0_80 = arith.constant 0 : index
    %114 = vector.load %arg10[%c160_79, %c0_80] : memref<216x1280xf32, #tpu.memory_space<vmem>>, vector<8x1280xf32>
    tpu.vector_store %arg10[%c160_79, %c0_80], %109 {strides = array<i32>} : memref<216x1280xf32, #tpu.memory_space<vmem>>, vector<8x1280xf32>,
    %c0_81 = arith.constant 0 : index
    %c255_82 = arith.constant 255 : index
    %115 = vector.load %arg9[%c0_81, %c255_82] : memref<8x1792xf32, #tpu.memory_space<vmem>>, vector<8x1280xf32>
    %116 = vector.extract_strided_slice %115 {offsets = [0, 128], sizes = [8, 1152], strides = [1, 1]} : vector<8x1280xf32> to vector<8x1152xf32>
    %117 = tpu.concatenate %116, %2 in 1 : vector<8x1152xf32>, vector<8x128xf32> -> vector<8x1280xf32>
    %118 = vector.extract_strided_slice %115 {offsets = [0, 0], sizes = [8, 1152], strides = [1, 1]} : vector<8x1280xf32> to vector<8x1152xf32>
    %119 = tpu.concatenate %2, %118 in 1 : vector<8x128xf32>, vector<8x1152xf32> -> vector<8x1280xf32>
    %c24_83 = arith.constant 24 : index
    %c0_84 = arith.constant 0 : index
    %120 = vector.load %arg10[%c24_83, %c0_84] : memref<216x1280xf32, #tpu.memory_space<vmem>>, vector<8x1280xf32>
    tpu.vector_store %arg10[%c24_83, %c0_84], %119 {strides = array<i32>} : memref<216x1280xf32, #tpu.memory_space<vmem>>, vector<8x1280xf32>,
    %c96_85 = arith.constant 96 : index
    %c0_86 = arith.constant 0 : index
    %121 = vector.load %arg10[%c96_85, %c0_86] : memref<216x1280xf32, #tpu.memory_space<vmem>>, vector<8x1280xf32>
    tpu.vector_store %arg10[%c96_85, %c0_86], %115 {strides = array<i32>} : memref<216x1280xf32, #tpu.memory_space<vmem>>, vector<8x1280xf32>,
    %c168_87 = arith.constant 168 : index
    %c0_88 = arith.constant 0 : index
    %122 = vector.load %arg10[%c168_87, %c0_88] : memref<216x1280xf32, #tpu.memory_space<vmem>>, vector<8x1280xf32>
    tpu.vector_store %arg10[%c168_87, %c0_88], %117 {strides = array<i32>} : memref<216x1280xf32, #tpu.memory_space<vmem>>, vector<8x1280xf32>,
    %c0_89 = arith.constant 0 : index
    %c256_90 = arith.constant 256 : index
    %123 = vector.load %arg9[%c0_89, %c256_90] : memref<8x1792xf32, #tpu.memory_space<vmem>>, vector<8x1280xf32>
    %124 = vector.extract_strided_slice %123 {offsets = [0, 128], sizes = [8, 1152], strides = [1, 1]} : vector<8x1280xf32> to vector<8x1152xf32>
    %125 = tpu.concatenate %124, %2 in 1 : vector<8x1152xf32>, vector<8x128xf32> -> vector<8x1280xf32>
    %126 = vector.extract_strided_slice %123 {offsets = [0, 0], sizes = [8, 1152], strides = [1, 1]} : vector<8x1280xf32> to vector<8x1152xf32>
    %127 = tpu.concatenate %2, %126 in 1 : vector<8x128xf32>, vector<8x1152xf32> -> vector<8x1280xf32>
    %c32_91 = arith.constant 32 : index
    %c0_92 = arith.constant 0 : index
    %128 = vector.load %arg10[%c32_91, %c0_92] : memref<216x1280xf32, #tpu.memory_space<vmem>>, vector<8x1280xf32>
    tpu.vector_store %arg10[%c32_91, %c0_92], %127 {strides = array<i32>} : memref<216x1280xf32, #tpu.memory_space<vmem>>, vector<8x1280xf32>,
    %c104_93 = arith.constant 104 : index
    %c0_94 = arith.constant 0 : index
    %129 = vector.load %arg10[%c104_93, %c0_94] : memref<216x1280xf32, #tpu.memory_space<vmem>>, vector<8x1280xf32>
    tpu.vector_store %arg10[%c104_93, %c0_94], %123 {strides = array<i32>} : memref<216x1280xf32, #tpu.memory_space<vmem>>, vector<8x1280xf32>,
    %c176_95 = arith.constant 176 : index
    %c0_96 = arith.constant 0 : index
    %130 = vector.load %arg10[%c176_95, %c0_96] : memref<216x1280xf32, #tpu.memory_space<vmem>>, vector<8x1280xf32>
    tpu.vector_store %arg10[%c176_95, %c0_96], %125 {strides = array<i32>} : memref<216x1280xf32, #tpu.memory_space<vmem>>, vector<8x1280xf32>,
    %c0_97 = arith.constant 0 : index
    %c257_98 = arith.constant 257 : index
    %131 = vector.load %arg9[%c0_97, %c257_98] : memref<8x1792xf32, #tpu.memory_space<vmem>>, vector<8x1280xf32>
    %132 = vector.extract_strided_slice %131 {offsets = [0, 128], sizes = [8, 1152], strides = [1, 1]} : vector<8x1280xf32> to vector<8x1152xf32>
    %133 = tpu.concatenate %132, %2 in 1 : vector<8x1152xf32>, vector<8x128xf32> -> vector<8x1280xf32>
    %134 = vector.extract_strided_slice %131 {offsets = [0, 0], sizes = [8, 1152], strides = [1, 1]} : vector<8x1280xf32> to vector<8x1152xf32>
    %135 = tpu.concatenate %2, %134 in 1 : vector<8x128xf32>, vector<8x1152xf32> -> vector<8x1280xf32>
    %c40_99 = arith.constant 40 : index
    %c0_100 = arith.constant 0 : index
    %136 = vector.load %arg10[%c40_99, %c0_100] : memref<216x1280xf32, #tpu.memory_space<vmem>>, vector<8x1280xf32>
    tpu.vector_store %arg10[%c40_99, %c0_100], %135 {strides = array<i32>} : memref<216x1280xf32, #tpu.memory_space<vmem>>, vector<8x1280xf32>,
    %c112_101 = arith.constant 112 : index
    %c0_102 = arith.constant 0 : index
    %137 = vector.load %arg10[%c112_101, %c0_102] : memref<216x1280xf32, #tpu.memory_space<vmem>>, vector<8x1280xf32>
    tpu.vector_store %arg10[%c112_101, %c0_102], %131 {strides = array<i32>} : memref<216x1280xf32, #tpu.memory_space<vmem>>, vector<8x1280xf32>,
    %c184_103 = arith.constant 184 : index
    %c0_104 = arith.constant 0 : index
    %138 = vector.load %arg10[%c184_103, %c0_104] : memref<216x1280xf32, #tpu.memory_space<vmem>>, vector<8x1280xf32>
    tpu.vector_store %arg10[%c184_103, %c0_104], %133 {strides = array<i32>} : memref<216x1280xf32, #tpu.memory_space<vmem>>, vector<8x1280xf32>,
    %c0_105 = arith.constant 0 : index
    %c265_106 = arith.constant 265 : index
    %139 = vector.load %arg9[%c0_105, %c265_106] : memref<8x1792xf32, #tpu.memory_space<vmem>>, vector<8x1280xf32>
    %140 = vector.extract_strided_slice %139 {offsets = [0, 128], sizes = [8, 1152], strides = [1, 1]} : vector<8x1280xf32> to vector<8x1152xf32>
    %141 = tpu.concatenate %140, %2 in 1 : vector<8x1152xf32>, vector<8x128xf32> -> vector<8x1280xf32>
    %142 = vector.extract_strided_slice %139 {offsets = [0, 0], sizes = [8, 1152], strides = [1, 1]} : vector<8x1280xf32> to vector<8x1152xf32>
    %143 = tpu.concatenate %2, %142 in 1 : vector<8x128xf32>, vector<8x1152xf32> -> vector<8x1280xf32>
    %c48_107 = arith.constant 48 : index
    %c0_108 = arith.constant 0 : index
    %144 = vector.load %arg10[%c48_107, %c0_108] : memref<216x1280xf32, #tpu.memory_space<vmem>>, vector<8x1280xf32>
    tpu.vector_store %arg10[%c48_107, %c0_108], %143 {strides = array<i32>} : memref<216x1280xf32, #tpu.memory_space<vmem>>, vector<8x1280xf32>,
    %c120_109 = arith.constant 120 : index
    %c0_110 = arith.constant 0 : index
    %145 = vector.load %arg10[%c120_109, %c0_110] : memref<216x1280xf32, #tpu.memory_space<vmem>>, vector<8x1280xf32>
    tpu.vector_store %arg10[%c120_109, %c0_110], %139 {strides = array<i32>} : memref<216x1280xf32, #tpu.memory_space<vmem>>, vector<8x1280xf32>,
    %c192_111 = arith.constant 192 : index
    %c0_112 = arith.constant 0 : index
    %146 = vector.load %arg10[%c192_111, %c0_112] : memref<216x1280xf32, #tpu.memory_space<vmem>>, vector<8x1280xf32>
    tpu.vector_store %arg10[%c192_111, %c0_112], %141 {strides = array<i32>} : memref<216x1280xf32, #tpu.memory_space<vmem>>, vector<8x1280xf32>,
    %c0_113 = arith.constant 0 : index
    %c266_114 = arith.constant 266 : index
    %147 = vector.load %arg9[%c0_113, %c266_114] : memref<8x1792xf32, #tpu.memory_space<vmem>>, vector<8x1280xf32>
    %148 = vector.extract_strided_slice %147 {offsets = [0, 128], sizes = [8, 1152], strides = [1, 1]} : vector<8x1280xf32> to vector<8x1152xf32>
    %149 = tpu.concatenate %148, %2 in 1 : vector<8x1152xf32>, vector<8x128xf32> -> vector<8x1280xf32>
    %150 = vector.extract_strided_slice %147 {offsets = [0, 0], sizes = [8, 1152], strides = [1, 1]} : vector<8x1280xf32> to vector<8x1152xf32>
    %151 = tpu.concatenate %2, %150 in 1 : vector<8x128xf32>, vector<8x1152xf32> -> vector<8x1280xf32>
    %c56_115 = arith.constant 56 : index
    %c0_116 = arith.constant 0 : index
    %152 = vector.load %arg10[%c56_115, %c0_116] : memref<216x1280xf32, #tpu.memory_space<vmem>>, vector<8x1280xf32>
    tpu.vector_store %arg10[%c56_115, %c0_116], %151 {strides = array<i32>} : memref<216x1280xf32, #tpu.memory_space<vmem>>, vector<8x1280xf32>,
    %c128_117 = arith.constant 128 : index
    %c0_118 = arith.constant 0 : index
    %153 = vector.load %arg10[%c128_117, %c0_118] : memref<216x1280xf32, #tpu.memory_space<vmem>>, vector<8x1280xf32>
    tpu.vector_store %arg10[%c128_117, %c0_118], %147 {strides = array<i32>} : memref<216x1280xf32, #tpu.memory_space<vmem>>, vector<8x1280xf32>,
    %c200_119 = arith.constant 200 : index
    %c0_120 = arith.constant 0 : index
    %154 = vector.load %arg10[%c200_119, %c0_120] : memref<216x1280xf32, #tpu.memory_space<vmem>>, vector<8x1280xf32>
    tpu.vector_store %arg10[%c200_119, %c0_120], %149 {strides = array<i32>} : memref<216x1280xf32, #tpu.memory_space<vmem>>, vector<8x1280xf32>,
    %c0_121 = arith.constant 0 : index
    %c267_122 = arith.constant 267 : index
    %155 = vector.load %arg9[%c0_121, %c267_122] : memref<8x1792xf32, #tpu.memory_space<vmem>>, vector<8x1280xf32>
    %156 = vector.extract_strided_slice %155 {offsets = [0, 128], sizes = [8, 1152], strides = [1, 1]} : vector<8x1280xf32> to vector<8x1152xf32>
    %157 = tpu.concatenate %156, %2 in 1 : vector<8x1152xf32>, vector<8x128xf32> -> vector<8x1280xf32>
    %158 = vector.extract_strided_slice %155 {offsets = [0, 0], sizes = [8, 1152], strides = [1, 1]} : vector<8x1280xf32> to vector<8x1152xf32>
    %159 = tpu.concatenate %2, %158 in 1 : vector<8x128xf32>, vector<8x1152xf32> -> vector<8x1280xf32>
    %c64_123 = arith.constant 64 : index
    %c0_124 = arith.constant 0 : index
    %160 = vector.load %arg10[%c64_123, %c0_124] : memref<216x1280xf32, #tpu.memory_space<vmem>>, vector<8x1280xf32>
    tpu.vector_store %arg10[%c64_123, %c0_124], %159 {strides = array<i32>} : memref<216x1280xf32, #tpu.memory_space<vmem>>, vector<8x1280xf32>,
    %c136_125 = arith.constant 136 : index
    %c0_126 = arith.constant 0 : index
    %161 = vector.load %arg10[%c136_125, %c0_126] : memref<216x1280xf32, #tpu.memory_space<vmem>>, vector<8x1280xf32>
    tpu.vector_store %arg10[%c136_125, %c0_126], %155 {strides = array<i32>} : memref<216x1280xf32, #tpu.memory_space<vmem>>, vector<8x1280xf32>,
    %c208_127 = arith.constant 208 : index
    %c0_128 = arith.constant 0 : index
    %162 = vector.load %arg10[%c208_127, %c0_128] : memref<216x1280xf32, #tpu.memory_space<vmem>>, vector<8x1280xf32>
    tpu.vector_store %arg10[%c208_127, %c0_128], %157 {strides = array<i32>} : memref<216x1280xf32, #tpu.memory_space<vmem>>, vector<8x1280xf32>,
    %c0_129 = arith.constant 0 : index
    %c0_130 = arith.constant 0 : index
    %163 = vector.load %arg4[%c0_129, %c0_130] : memref<8x216xf32, #tpu.memory_space<vmem>>, vector<8x216xf32>
    %c0_131 = arith.constant 0 : index
    %c0_132 = arith.constant 0 : index
    %164 = vector.load %arg10[%c0_131, %c0_132] : memref<216x1280xf32, #tpu.memory_space<vmem>>, vector<216x1280xf32>
    %cst_133 = arith.constant dense<0.000000e+00> : vector<8x1280xf32>
    %165 = tpu.matmul %163, %164, %cst_133 {dimension_numbers = #tpu.dot_dimension_numbers<[1], [0], [0], [1], [0, 0, 1, 1], [], []>} : vector<8x216xf32>, vector<216x1280xf32>, vector<8x1280xf32> -> vector<8x1280xf32>
    %c0_134 = arith.constant 0 : index
    %c0_135 = arith.constant 0 : index
    %166 = vector.load %arg5[%c0_134, %c0_135] : memref<8x1xf32, #tpu.memory_space<vmem>>, vector<8x1xf32>
    %167 = vector.broadcast %166 : vector<8x1xf32> to vector<8x1280xf32>
    %168 = arith.addf %165, %167 : vector<8x1280xf32>
    %cst_136 = arith.constant 0.000000e+00 : f32
    %169 = vector.broadcast %cst_136 : f32 to vector<8x1280xf32>
    %170 = arith.maximumf %168, %169 : vector<8x1280xf32>
    %171 = vector.broadcast %0 : vector<1x1280xf32> to vector<8x1280xf32>
    %172 = arith.mulf %170, %171 : vector<8x1280xf32>
    %c0_137 = arith.constant 0 : index
    %c256_138 = arith.constant 256 : index
    %173 = vector.load %arg9[%c0_137, %c256_138] : memref<8x1792xf32, #tpu.memory_space<vmem>>, vector<8x1280xf32>
    tpu.vector_store %arg9[%c0_137, %c256_138], %172 {strides = array<i32>} : memref<8x1792xf32, #tpu.memory_space<vmem>>, vector<8x1280xf32>,
    %c0_139 = arith.constant 0 : index
    %c257_140 = arith.constant 257 : index
    %174 = vector.load %arg9[%c0_139, %c257_140] : memref<8x1792xf32, #tpu.memory_space<vmem>>, vector<8x1280xf32>
    %175 = arith.maximumf %172, %174 : vector<8x1280xf32>
    %c0_141 = arith.constant 0 : index
    %c256_142 = arith.constant 256 : index
    %176 = vector.load %arg9[%c0_141, %c256_142] : memref<8x1792xf32, #tpu.memory_space<vmem>>, vector<8x1280xf32>
    tpu.vector_store %arg9[%c0_141, %c256_142], %175 {strides = array<i32>} : memref<8x1792xf32, #tpu.memory_space<vmem>>, vector<8x1280xf32>,
    %c0_143 = arith.constant 0 : index
    %c266_144 = arith.constant 266 : index
    %177 = vector.load %arg9[%c0_143, %c266_144] : memref<8x1792xf32, #tpu.memory_space<vmem>>, vector<8x1280xf32>
    %178 = arith.maximumf %175, %177 : vector<8x1280xf32>
    %179 = vector.extract_strided_slice %178 {offsets = [0, 128], sizes = [8, 1152], strides = [1, 1]} : vector<8x1280xf32> to vector<8x1152xf32>
    %180 = tpu.concatenate %179, %2 in 1 : vector<8x1152xf32>, vector<8x128xf32> -> vector<8x1280xf32>
    %181 = arith.maximumf %178, %180 : vector<8x1280xf32>
    %182 = vector.extract_strided_slice %181 {offsets = [0, 128], sizes = [8, 128], strides = [1, 1]} : vector<8x1280xf32> to vector<8x128xf32>
    %183 = vector.extract_strided_slice %181 {offsets = [0, 384], sizes = [8, 128], strides = [1, 1]} : vector<8x1280xf32> to vector<8x128xf32>
    %184 = vector.extract_strided_slice %181 {offsets = [0, 640], sizes = [8, 128], strides = [1, 1]} : vector<8x1280xf32> to vector<8x128xf32>
    %185 = vector.extract_strided_slice %181 {offsets = [0, 896], sizes = [8, 128], strides = [1, 1]} : vector<8x1280xf32> to vector<8x128xf32>
    %186 = tpu.concatenate %182, %183, %184, %185 in 1 : vector<8x128xf32>, vector<8x128xf32>, vector<8x128xf32>, vector<8x128xf32> -> vector<8x512xf32>
    %187 = tpu.iota {dimensions = array<i32: 0>} : vector<512x128xi32>
    %c0_145 = arith.constant 0 : index
    %c0_146 = arith.constant 0 : index
    %188 = vector.load %arg7[%c0_145, %c0_146] : memref<1x128xi32, #tpu.memory_space<vmem>>, vector<1x128xi32>
    %189 = vector.broadcast %188 : vector<1x128xi32> to vector<512x128xi32>
    %190 = arith.cmpi eq, %187, %189 : vector<512x128xi32>
    %191 = arith.extui %190 : vector<512x128xi1> to vector<512x128xi32>
    %192 = arith.sitofp %191 : vector<512x128xi32> to vector<512x128xf32>
    %cst_147 = arith.constant dense<0.000000e+00> : vector<8x128xf32>
    %193 = tpu.matmul %186, %192, %cst_147 {dimension_numbers = #tpu.dot_dimension_numbers<[1], [0], [0], [1], [0, 0, 1, 1], [], []>} : vector<8x512xf32>, vector<512x128xf32>, vector<8x128xf32> -> vector<8x128xf32>
    %194 = vector.shape_cast %193 : vector<8x128xf32> to vector<1x8x128xf32>
    %c0_148 = arith.constant 0 : index
    %c0_149 = arith.constant 0 : index
    %c0_150 = arith.constant 0 : index
    %195 = vector.load %arg8[%c0_148, %c0_149, %c0_150] : memref<1x8x128xf32, #tpu.memory_space<vmem>>, vector<1x8x128xf32>
    tpu.vector_store %arg8[%c0_148, %c0_149, %c0_150], %194 {strides = array<i32>} : memref<1x8x128xf32, #tpu.memory_space<vmem>>, vector<1x8x128xf32>,
    return
  }
  func.func @transform_0(%arg0: i32) -> (i32, i32, i32) {
    %c0_i32 = arith.constant 0 : i32
    %c0_i32_0 = arith.constant 0 : i32
    %c0_i32_1 = arith.constant 0 : i32
    return %arg0, %c0_i32, %c0_i32_0 : i32, i32, i32
  }
  func.func @transform_1(%arg0: i32) -> (i32, i32) {
    %c0_i32 = arith.constant 0 : i32
    %c0_i32_0 = arith.constant 0 : i32
    %c0_i32_1 = arith.constant 0 : i32
    return %c0_i32, %c0_i32_0 : i32, i32
  }
  func.func @transform_2(%arg0: i32) -> (i32, i32) {
    %c0_i32 = arith.constant 0 : i32
    %c0_i32_0 = arith.constant 0 : i32
    %c0_i32_1 = arith.constant 0 : i32
    return %c0_i32, %c0_i32_0 : i32, i32
  }
  func.func @transform_3(%arg0: i32) -> (i32, i32) {
    %c0_i32 = arith.constant 0 : i32
    %c0_i32_0 = arith.constant 0 : i32
    %c0_i32_1 = arith.constant 0 : i32
    return %c0_i32, %c0_i32_0 : i32, i32
  }
  func.func @transform_4(%arg0: i32) -> (i32, i32) {
    %c0_i32 = arith.constant 0 : i32
    %c0_i32_0 = arith.constant 0 : i32
    %c0_i32_1 = arith.constant 0 : i32
    return %c0_i32, %c0_i32_0 : i32, i32
  }
  func.func @transform_5(%arg0: i32) -> (i32, i32) {
    %c0_i32 = arith.constant 0 : i32
    %c0_i32_0 = arith.constant 0 : i32
    %c0_i32_1 = arith.constant 0 : i32
    return %c0_i32, %c0_i32_0 : i32, i32
  }
  func.func @transform_6(%arg0: i32) -> (i32, i32) {
    %c0_i32 = arith.constant 0 : i32
    %c0_i32_0 = arith.constant 0 : i32
    %c0_i32_1 = arith.constant 0 : i32
    return %c0_i32, %c0_i32_0 : i32, i32
  }
  func.func @transform_7(%arg0: i32) -> (i32, i32, i32) {
    %c0_i32 = arith.constant 0 : i32
    %c0_i32_0 = arith.constant 0 : i32
    %c0_i32_1 = arith.constant 0 : i32
    return %arg0, %c0_i32, %c0_i32_0 : i32, i32, i32
  }
}

</mosaic_0001>

<bundles_post_ra>
// kernel: luna_block.1
= control target key start
LH: loop header
LB: loop body
LE: loop exit
PB: predicated region body
PF: predicated region fallthrough
CT: control target
= control target key end

     0   :  { %s4227_s24 = smov 0   ;;  %s6222_s0 = inlined_call_operand.vmem [shape: f32[2,8,1280], index: 0, kind: input, shape index: {}]   ;;  %s6223_s1 = inlined_call_operand.vmem [shape: f32[8,216], index: 1, kind: input, shape index: {}]   ;;  %s6224_s2 = inlined_call_operand.vmem [shape: f32[8,1], index: 2, kind: input, shape index: {}]   ;;  %s6225_s3 = inlined_call_operand.vmem [shape: f32[8,216], index: 3, kind: input, shape index: {}]   ;;  %s6226_s4 = inlined_call_operand.vmem [shape: f32[8,1], index: 4, kind: input, shape index: {}]   ;;  %s6227_s5 = inlined_call_operand.vmem [shape: f32[1,1280], index: 5, kind: input, shape index: {}]   ;;  %s6228_s6 = inlined_call_operand.vmem [shape: s32[1,128], index: 6, kind: input, shape index: {}]   ;;  %s6229_s7 = inlined_call_operand.vmem [shape: f32[2,8,128], index: 7, kind: output, shape index: {}]  }
   0x1 LB: > { %s3884_s25 = sadd.s32 4294967295, %s4174_s24   ;;  %p3888_p0 = scmp.ge.s32.totalorder %s4174_s24, 1  ;;  %s4174_s24 = sphi %s4227_s24, %s17_s24  }
   0x2   : > { %p237_p1 = scmp.lt.s32.totalorder %s4174_s24, 3 }
   0x4   : > { %p238_p2 = pnand %p3888_p0, %p237_p1 }
   0x6   : > { %241 = sbr.rel (%p238_p2) target bundleno = 1410 (0x582), region = 48 }
   0xb   : > { %p268_p3 = scmp.lt.s32.totalorder %s3884_s25, 1  ;;  %s4176_s30 = smov 119   ;;  %v6230_v5 = vmov 0.0   ;;  %v4356_v7 = vld [vmem:[%s6223_s1 + $0x8] sm:$0xff]  ;;  %vm1381_vm0 = vcmask 719872   ;;  %vm859_vm1 = vcmask 973824  }
   0xc   : > { %s4177_s8 = smov 127   ;;  %s4178_s9 = smov 1   ;;  %3891 = vmatprep.mubr.msk.f32.mxu0 %vm1381_vm0, %v4356_v7  ;;  %3892 = vmatprep.mubr.msk.f32.mxu1 %vm1381_vm0, %v4356_v7  ;;  %vm764_vm2 = vcmask 1039360   ;;  %vm629_vm3 = vcmask 7168   ;;  %vm534_vm4 = vcmask 72704   ;;  %vm439_vm5 = vcmask 80896  }
   0xd   : > { %s6238_s25 = smov (!%p268_p3, %s3884_s25), 1  ;;  %s4180_s10 = smov 9   ;;  %vm344_vm6 = vcmask 89088   ;;  %v4185_v57 = vmov 0   ;;  %vm1049_vm7 = vcmask 957440   ;;  %vm954_vm8 = vcmask 965632  }
   0xe   : > { %s4102_s26 = smul.u32 80, %s6238_s25  ;;  %s4181_s11 = smov 10   ;;  %4122 = vset.pattern.permute.xlu0 %v4185_v57 }
   0xf   : > { %s4182_s12 = smov 11   ;;  %s4183_s13 = smov 117  }
  0x10   : > { %s4241_s29 = scalar_lea.vmem %s6222_s0, %s4102_s26  ;;  %s4184_s14 = smov 118  }
  0x11   : > { %v4244_v0 = vld [vmem:[%s4241_s29 + $0x8] sm:$0xff]  ;;  %v4247_v1 = vld [vmem:[%s4241_s29] sm:$0xff]  ;;  %v4254_v2 = vld [vmem:[%s4241_s29 + $0x10] sm:$0xff] }
  0x12   : > { %839 = vrot.lane.b32.xlu0 %v4244_v0, %s4176_s30  ;;  %879 = vrot.lane.b32.xlu1 %v4247_v1, %s4176_s30  ;;  %v4261_v3 = vld [vmem:[%s4241_s29 + $0x18] sm:$0xff]  ;;  %v4268_v4 = vld [vmem:[%s4241_s29 + $0x20] sm:$0xff] }
  0x13   : > { %v4335_v6 = vld [vmem:[%s4241_s29 + $0x28] sm:$0xff]  ;;  %v4367_v8 = vld [vmem:[%s4241_s29 + $0x30] sm:$0xff]  ;;  %v4374_v9 = vld [vmem:[%s4241_s29 + $0x38] sm:$0xff] }
  0x14   : > { %v4377_v10 = vld [vmem:[%s4241_s29 + $0x40] sm:$0xff]  ;;  %v4466_v34 = vld [vmem:[%s4241_s29 + $0x48] sm:$0xff] }
  0x16   : > { %841 = vrot.lane.b32.xlu0 %v4254_v2, %s4176_s30  ;;  %744 = vrot.lane.b32.xlu1 %v4244_v0, %s4177_s8 }
  0x1a   : > { %746 = vrot.lane.b32.xlu0 %v4254_v2, %s4177_s8  ;;  %843 = vrot.lane.b32.xlu1 %v4261_v3, %s4176_s30 }
  0x1e   : > { %845 = vrot.lane.b32.xlu0 %v4268_v4, %s4176_s30  ;;  %784 = vrot.lane.b32.xlu1 %v4247_v1, %s4177_s8 }
  0x22   : > { %748 = vrot.lane.b32.xlu0 %v4261_v3, %s4177_s8  ;;  %750 = vrot.lane.b32.xlu1 %v4268_v4, %s4177_s8 }
  0x26   : > { %609 = vrot.lane.b32.xlu0 %v4247_v1, %s4178_s9  ;;  %611 = vrot.lane.b32.xlu1 %v4244_v0, %s4178_s9 }
  0x2a   : > { %649 = vrot.lane.b32.xlu0 %v6230_v5, %s4178_s9  ;;  %514 = vrot.lane.b32.xlu1 %v4247_v1, %s4180_s10 }
  0x2e   : > { %516 = vrot.lane.b32.xlu0 %v4244_v0, %s4180_s10  ;;  %613 = vrot.lane.b32.xlu1 %v4254_v2, %s4178_s9 }
  0x32   : > { %615 = vrot.lane.b32.xlu0 %v4261_v3, %s4178_s9  ;;  %554 = vrot.lane.b32.xlu1 %v6230_v5, %s4180_s10 }
  0x36   : > { %419 = vrot.lane.b32.xlu0 %v4247_v1, %s4181_s11  ;;  %421 = vrot.lane.b32.xlu1 %v4244_v0, %s4181_s11 }
  0x3a   : > { %518 = vrot.lane.b32.xlu0 %v4254_v2, %s4180_s10  ;;  %520 = vrot.lane.b32.xlu1 %v4261_v3, %s4180_s10 }
  0x3e   : > { %459 = vrot.lane.b32.xlu0 %v6230_v5, %s4181_s11  ;;  %324 = vrot.lane.b32.xlu1 %v4247_v1, %s4182_s12 }
  0x42   : > { %326 = vrot.lane.b32.xlu0 %v4244_v0, %s4182_s12  ;;  %423 = vrot.lane.b32.xlu1 %v4254_v2, %s4181_s11 }
  0x46   : > { %425 = vrot.lane.b32.xlu0 %v4261_v3, %s4181_s11  ;;  %364 = vrot.lane.b32.xlu1 %v6230_v5, %s4182_s12 }
  0x4a   : > { %328 = vrot.lane.b32.xlu0 %v4254_v2, %s4182_s12  ;;  %330 = vrot.lane.b32.xlu1 %v4261_v3, %s4182_s12 }
  0x4e   : > { %1029 = vrot.lane.b32.xlu0 %v4244_v0, %s4183_s13  ;;  %1069 = vrot.lane.b32.xlu1 %v4247_v1, %s4183_s13 }
  0x52   : > { %934 = vrot.lane.b32.xlu0 %v4244_v0, %s4184_s14  ;;  %974 = vrot.lane.b32.xlu1 %v4247_v1, %s4184_s14 }
  0x56   : > { %1031 = vrot.lane.b32.xlu0 %v4254_v2, %s4183_s13  ;;  %1033 = vrot.lane.b32.xlu1 %v4261_v3, %s4183_s13 }
  0x5a   : > { %936 = vrot.lane.b32.xlu0 %v4254_v2, %s4184_s14  ;;  %938 = vrot.lane.b32.xlu1 %v4261_v3, %s4184_s14 }
  0x5e   : > { %1035 = vrot.lane.b32.xlu0 %v4268_v4, %s4183_s13  ;;  %1037 = vrot.lane.b32.xlu1 %v4335_v6, %s4183_s13 }
  0x62   : > { %940 = vrot.lane.b32.xlu0 %v4268_v4, %s4184_s14  ;;  %942 = vrot.lane.b32.xlu1 %v4335_v6, %s4184_s14 }
  0x66   : > { %847 = vrot.lane.b32.xlu0 %v4335_v6, %s4176_s30  ;;  %752 = vrot.lane.b32.xlu1 %v4335_v6, %s4177_s8 }
  0x6a   : > { %617 = vrot.lane.b32.xlu0 %v4268_v4, %s4178_s9  ;;  %522 = vrot.lane.b32.xlu1 %v4268_v4, %s4180_s10 }
  0x6e   : > { %427 = vrot.lane.b32.xlu0 %v4268_v4, %s4181_s11  ;;  %332 = vrot.lane.b32.xlu1 %v4268_v4, %s4182_s12 }
  0x72   : > { %849 = vrot.lane.b32.xlu0 %v4367_v8, %s4176_s30  ;;  %754 = vrot.lane.b32.xlu1 %v4367_v8, %s4177_s8 }
  0x76   : > { %851 = vrot.lane.b32.xlu0 %v4374_v9, %s4176_s30  ;;  %853 = vrot.lane.b32.xlu1 %v4377_v10, %s4176_s30 }
  0x7a   : > { %756 = vrot.lane.b32.xlu0 %v4374_v9, %s4177_s8  ;;  %758 = vrot.lane.b32.xlu1 %v4377_v10, %s4177_s8 }
  0x7e   : > { %619 = vrot.lane.b32.xlu0 %v4335_v6, %s4178_s9  ;;  %524 = vrot.lane.b32.xlu1 %v4335_v6, %s4180_s10 }
  0x82   : > { %621 = vrot.lane.b32.xlu0 %v4367_v8, %s4178_s9  ;;  %623 = vrot.lane.b32.xlu1 %v4374_v9, %s4178_s9 }
  0x84   : > { %v840_v11 = vpop.permute.xlu0 %839  ;;  %v880_v12 = vpop.permute.xlu1 %879 }
  0x85   : > { %v4406_v16 = vsel %vm859_vm1, %v880_v12, %v840_v11 }
  0x86   : > { %429 = vrot.lane.b32.xlu0 %v4335_v6, %s4181_s11  ;;  %526 = vrot.lane.b32.xlu1 %v4367_v8, %s4180_s10 }
  0x88   : > { %v842_v13 = vpop.permute.xlu0 %841  ;;  %v745_v14 = vpop.permute.xlu1 %744 }
  0x89   : > { %v4400_v15 = vsel %vm859_vm1, %v840_v11, %v842_v13 }
  0x8a   : > { %1385 = vmatprep.subr.mxu0 %v4400_v15  ;;  %528 = vrot.lane.b32.xlu0 %v4374_v9, %s4180_s10 }
  0x8b   : > { %334 = vrot.lane.b32.xlu1 %v4335_v6, %s4182_s12  ;;  %1386 = vmatpush1.msra.mxu0 %v4406_v16 }
  0x8c   : > { %v747_v17 = vpop.permute.xlu0 %746  ;;  %v844_v18 = vpop.permute.xlu1 %843 }
  0x8d   : > { %v4412_v19 = vsel %vm764_vm2, %v745_v14, %v747_v17  ;;  %v4435_v24 = vsel %vm859_vm1, %v842_v13, %v844_v18 }
  0x8e   : > { %431 = vrot.lane.b32.xlu0 %v4367_v8, %s4181_s11  ;;  %1387 = vmatprep.subr.mxu0 %v4412_v19 }
  0x8f   : > { %433 = vrot.lane.b32.xlu1 %v4374_v9, %s4181_s11 }
  0x90   : > { %v4419_v20 = vpop.permute.xlu0 %845  ;;  %v785_v21 = vpop.permute.xlu1 %784 }
  0x91   : > { %v4422_v22 = vsel %vm764_vm2, %v785_v21, %v745_v14  ;;  %v4426_v23 = vsel %vm859_vm1, %v844_v18, %v4419_v20  ;;  %v1375_v14 = vld [vmem:[%s6224_s2] sm:$0xff] }
  0x92   : > { %336 = vrot.lane.b32.xlu0 %v4367_v8, %s4182_s12  ;;  %1388 = vmatpush1.msra.mxu0 %v4422_v22 }
  0x93   : > { %338 = vrot.lane.b32.xlu1 %v4374_v9, %s4182_s12  ;;  %1456 = vmatprep.subr.mxu1 %v4426_v23 }
  0x94   : > { %1457 = vmatpush1.msra.mxu1 %v4435_v24  ;;  %v749_v25 = vpop.permute.xlu0 %748  ;;  %v4438_v26 = vpop.permute.xlu1 %750  ;;  %1389 = vmatprep.subr.mxu0 %v4244_v0 }
  0x95   : > { %v4443_v27 = vsel %vm764_vm2, %v749_v25, %v4438_v26  ;;  %v4446_v28 = vsel %vm764_vm2, %v747_v17, %v749_v25  ;;  %1390 = vmatpush1.msra.mxu0 %v4247_v1 }
  0x96   : > { %1039 = vrot.lane.b32.xlu0 %v4367_v8, %s4183_s13  ;;  %1458 = vmatprep.subr.mxu1 %v4443_v27 }
  0x97   : > { %1041 = vrot.lane.b32.xlu1 %v4374_v9, %s4183_s13  ;;  %1459 = vmatpush1.msra.mxu1 %v4446_v28 }
  0x98   : > { %v610_v29 = vpop.permute.xlu0 %609  ;;  %v612_v30 = vpop.permute.xlu1 %611  ;;  %1460 = vmatprep.subr.mxu1 %v4261_v3 }
  0x99   : > { %v4457_v31 = vsel %vm629_vm3, %v610_v29, %v612_v30  ;;  %1461 = vmatpush1.msra.mxu1 %v4254_v2 }
  0x9a   : > { %944 = vrot.lane.b32.xlu0 %v4367_v8, %s4184_s14  ;;  %1391 = vmatprep.subr.mxu0 %v4457_v31 }
  0x9b   : > { %946 = vrot.lane.b32.xlu1 %v4374_v9, %s4184_s14 }
  0x9c   : > { %v650_v32 = vpop.permute.xlu0 %649  ;;  %v515_v33 = vpop.permute.xlu1 %514 }
  0x9d   : > { %v4469_v35 = vsel %vm629_vm3, %v650_v32, %v610_v29 }
  0x9e   : > { %1043 = vrot.lane.b32.xlu0 %v4377_v10, %s4183_s13  ;;  %1392 = vmatpush1.msra.mxu0 %v4469_v35 }
  0x9f   : > { %1045 = vrot.lane.b32.xlu1 %v4466_v34, %s4183_s13 }
  0xa0   : > { %v517_v36 = vpop.permute.xlu0 %516  ;;  %v614_v37 = vpop.permute.xlu1 %613 }
  0xa1   : > { %v4477_v38 = vsel %vm534_vm4, %v515_v33, %v517_v36  ;;  %v4500_v43 = vsel %vm629_vm3, %v612_v30, %v614_v37 }
  0xa2   : > { %948 = vrot.lane.b32.xlu0 %v4377_v10, %s4184_s14  ;;  %1393 = vmatprep.subr.mxu0 %v4477_v38 }
  0xa3   : > { %950 = vrot.lane.b32.xlu1 %v4466_v34, %s4184_s14 }
  0xa4   : > { %v4484_v39 = vpop.permute.xlu0 %615  ;;  %v555_v40 = vpop.permute.xlu1 %554 }
  0xa5   : > { %v4487_v41 = vsel %vm534_vm4, %v555_v40, %v515_v33  ;;  %v4491_v42 = vsel %vm629_vm3, %v614_v37, %v4484_v39 }
  0xa6   : > { %855 = vrot.lane.b32.xlu0 %v4466_v34, %s4176_s30  ;;  %1394 = vmatpush1.msra.mxu0 %v4487_v41 }
  0xa7   : > { %760 = vrot.lane.b32.xlu1 %v4466_v34, %s4177_s8  ;;  %1462 = vmatprep.subr.mxu1 %v4491_v42 }
  0xa8   : > { %1463 = vmatpush1.msra.mxu1 %v4500_v43  ;;  %v420_v44 = vpop.permute.xlu0 %419  ;;  %v422_v45 = vpop.permute.xlu1 %421 }
  0xa9   : > { %v4504_v46 = vsel %vm439_vm5, %v420_v44, %v422_v45 }
  0xaa   : > { %625 = vrot.lane.b32.xlu0 %v4377_v10, %s4178_s9  ;;  %1395 = vmatprep.subr.mxu0 %v4504_v46 }
  0xab   : > { %530 = vrot.lane.b32.xlu1 %v4377_v10, %s4180_s10 }
  0xac   : > { %v519_v47 = vpop.permute.xlu0 %518  ;;  %v4511_v48 = vpop.permute.xlu1 %520 }
  0xad   : > { %v4515_v49 = vsel %vm534_vm4, %v519_v47, %v4511_v48  ;;  %v4518_v50 = vsel %vm534_vm4, %v517_v36, %v519_v47 }
  0xae   : > { %435 = vrot.lane.b32.xlu0 %v4377_v10, %s4181_s11  ;;  %1464 = vmatprep.subr.mxu1 %v4515_v49 }
  0xaf   : > { %340 = vrot.lane.b32.xlu1 %v4377_v10, %s4182_s12  ;;  %1465 = vmatpush1.msra.mxu1 %v4518_v50 }
  0xb0   : > { %v460_v51 = vpop.permute.xlu0 %459  ;;  %v325_v52 = vpop.permute.xlu1 %324 }
  0xb1   : > { %v4527_v53 = vsel %vm439_vm5, %v460_v51, %v420_v44 }
  0xb2   : > { %857 = vrot.lane.b32.xlu0 %v6230_v5, %s4176_s30  ;;  %1396 = vmatpush1.msra.mxu0 %v4527_v53 }
  0xb3   : > { %762 = vrot.lane.b32.xlu1 %v6230_v5, %s4177_s8 }
  0xb4   : > { %v327_v54 = vpop.permute.xlu0 %326  ;;  %v424_v55 = vpop.permute.xlu1 %423 }
  0xb5   : > { %v4535_v56 = vsel %vm344_vm6, %v325_v52, %v327_v54  ;;  %v4558_v62 = vsel %vm439_vm5, %v422_v45, %v424_v55 }
  0xb6   : > { %627 = vrot.lane.b32.xlu0 %v4466_v34, %s4178_s9  ;;  %1397 = vmatprep.subr.mxu0 %v4535_v56 }
  0xb7   : > { %532 = vrot.lane.b32.xlu1 %v4466_v34, %s4180_s10 }
  0xb8   : > { %v4542_v58 = vpop.permute.xlu0 %425  ;;  %v365_v59 = vpop.permute.xlu1 %364 }
  0xb9   : > { %v4545_v60 = vsel %vm344_vm6, %v365_v59, %v325_v52  ;;  %v4549_v61 = vsel %vm439_vm5, %v424_v55, %v4542_v58 }
  0xba   : > { %437 = vrot.lane.b32.xlu0 %v4466_v34, %s4181_s11  ;;  %1398 = vmatpush1.msra.mxu0 %v4545_v60 }
  0xbb   : > { %342 = vrot.lane.b32.xlu1 %v4466_v34, %s4182_s12  ;;  %1466 = vmatprep.subr.mxu1 %v4549_v61 }
  0xbc   : > { %1467 = vmatpush1.msra.mxu1 %v4558_v62  ;;  %v329_v63 = vpop.permute.xlu0 %328  ;;  %v4561_v11 = vpop.permute.xlu1 %330 }
  0xbd   : > { %v4565_v12 = vsel %vm344_vm6, %v329_v63, %v4561_v11  ;;  %v4568_v13 = vsel %vm344_vm6, %v327_v54, %v329_v63 }
  0xbe   : > { %1047 = vrot.lane.b32.xlu0 %v6230_v5, %s4183_s13  ;;  %1468 = vmatprep.subr.mxu1 %v4565_v12 }
  0xbf   : > { %952 = vrot.lane.b32.xlu1 %v6230_v5, %s4184_s14  ;;  %1469 = vmatpush1.msra.mxu1 %v4568_v13 }
  0xc0   : > { %v1030_v17 = vpop.permute.xlu0 %1029  ;;  %v1070_v18 = vpop.permute.xlu1 %1069 }
  0xc1   : > { %v4580_v21 = vsel %vm1049_vm7, %v1070_v18, %v1030_v17 }
  0xc2   : > { %1399 = vmatprep.subr.mxu0 %v4580_v21  ;;  %1378 = vperm.xlu0 %4122, %v1375_v14  }
  0xc3   : > { %1400 = vmatpush1.msra.mxu0 %v6230_v5  ;;  %2070 = vrot.lane.b32.xlu1 %v6230_v5, %s4180_s10 }
  0xc4   : > { %v935_v25 = vpop.permute.xlu0 %934  ;;  %v975_v29 = vpop.permute.xlu1 %974 }
  0xc5   : > { %v4587_v30 = vsel %vm954_vm8, %v975_v29, %v935_v25 }
  0xc6   : > { %1401 = vmatprep.subr.mxu0 %v4587_v30  ;;  %2164 = vrot.lane.b32.xlu0 %v6230_v5, %s4178_s9 }
  0xc7   : > { %1402 = vmatpush1.msra.mxu0 %v6230_v5  ;;  %1882 = vrot.lane.b32.xlu1 %v6230_v5, %s4182_s12 }
  0xc8   : > { %v1032_v32 = vpop.permute.xlu0 %1031  ;;  %1403 = vmatprep.subr.mxu0 %v4406_v16  ;;  %v1034_v33 = vpop.permute.xlu1 %1033 }
  0xc9   : > { %1404 = vmatpush1.msra.mxu0 %v6230_v5  ;;  %v4598_v36 = vsel %vm1049_vm7, %v1032_v32, %v1034_v33  ;;  %v4601_v37 = vsel %vm1049_vm7, %v1030_v17, %v1032_v32 }
  0xca   : > { %1405 = vmatprep.subr.mxu0 %v4422_v22  ;;  %1470 = vmatprep.subr.mxu1 %v4598_v36 }
  0xcb   : > { %1406 = vmatpush1.msra.mxu0 %v6230_v5  ;;  %1471 = vmatpush1.msra.mxu1 %v4601_v37 }
  0xcc   : > { %v937_v40 = vpop.permute.xlu0 %936  ;;  %1407 = vmatprep.subr.mxu0 %v4247_v1  ;;  %v939_v16 = vpop.permute.xlu1 %938  ;;  %1976 = vrot.lane.b32.xlu0 %v6230_v5, %s4181_s11 }
  0xcd   : > { %1408 = vmatpush1.msra.mxu0 %v6230_v5  ;;  %v4612_v44 = vsel %vm954_vm8, %v937_v40, %v939_v16  ;;  %v4615_v22 = vsel %vm954_vm8, %v935_v25, %v937_v40 }
  0xce   : > { %1409 = vmatprep.subr.mxu0 %v4469_v35  ;;  %1472 = vmatprep.subr.mxu1 %v4612_v44 }
  0xcf   : > { %1410 = vmatpush1.msra.mxu0 %v6230_v5  ;;  %1473 = vmatpush1.msra.mxu1 %v4615_v22 }
  0xd0   : > { %v1036_v1 = vpop.permute.xlu0 %1035  ;;  %1411 = vmatprep.subr.mxu0 %v4487_v41  ;;  %1474 = vmatprep.subr.mxu1 %v4435_v24  ;;  %v4623_v45 = vpop.permute.xlu1 %1037 }
  0xd1   : > { %1412 = vmatpush1.msra.mxu0 %v6230_v5  ;;  %1475 = vmatpush1.msra.mxu1 %v4400_v15 }
  0xd2   : > { %1413 = vmatprep.subr.mxu0 %v4527_v53  ;;  %1476 = vmatprep.subr.mxu1 %v4446_v28 }
  0xd3   : > { %1414 = vmatpush1.msra.mxu0 %v6230_v5  ;;  %1477 = vmatpush1.msra.mxu1 %v4412_v19 }
  0xd4   : > { %v941_v35 = vpop.permute.xlu0 %940  ;;  %1415 = vmatprep.subr.mxu0 %v4545_v60  ;;  %1478 = vmatprep.subr.mxu1 %v4254_v2  ;;  %v4633_v41 = vpop.permute.xlu1 %942 }
  0xd5   : > { %1416 = vmatpush1.msra.mxu0 %v6230_v5  ;;  %1479 = vmatpush1.msra.mxu1 %v4244_v0  ;;  %v4681_v54 = vsel %vm954_vm8, %v939_v16, %v941_v35 }
  0xd6   : > { %1427 = vmatprep.subr.mxu0 %v4598_v36  ;;  %1480 = vmatprep.subr.mxu1 %v4500_v43 }
  0xd7   : > { %1428 = vmatpush2.msra.mxu0 %v4601_v37  ;;  %1481 = vmatpush1.msra.mxu1 %v4457_v31 }
  0xd8   : > { %v848_v47 = vpop.permute.xlu0 %847  ;;  %1429 = vmatprep.subr.mxu0 %v4612_v44  ;;  %1482 = vmatprep.subr.mxu1 %v4518_v50  ;;  %v4643_v51 = vpop.permute.xlu1 %752 }
  0xd9   : > { %1430 = vmatpush2.msra.mxu0 %v4615_v22  ;;  %1483 = vmatpush1.msra.mxu1 %v4477_v38 }
  0xda   : > { %1431 = vmatprep.subr.mxu0 %v4435_v24  ;;  %1484 = vmatprep.subr.mxu1 %v4558_v62  ;;  %v4661_v24 = vsel %vm1049_vm7, %v1036_v1, %v4623_v45 }
  0xdb   : > { %1432 = vmatpush2.msra.mxu0 %v4400_v15  ;;  %1485 = vmatpush1.msra.mxu1 %v4504_v46  ;;  %v4666_v15 = vsel %vm1049_vm7, %v1034_v33, %v1036_v1 }
  0xdc   : > { %v4651_v52 = vpop.permute.xlu0 %617  ;;  %1433 = vmatprep.subr.mxu0 %v4446_v28  ;;  %1486 = vmatprep.subr.mxu1 %v4568_v13  ;;  %v4655_v53 = vpop.permute.xlu1 %522 }
  0xdd   : > { %1434 = vmatpush2.msra.mxu0 %v4412_v19  ;;  %1487 = vmatpush1.msra.mxu1 %v4535_v56  ;;  %v4672_v19 = vsel %vm954_vm8, %v941_v35, %v4633_v41 }
  0xde   : > { %1435 = vmatprep.subr.mxu0 %v4254_v2  ;;  %1498 = vmatprep.subr.mxu1 %v4661_v24 }
  0xdf   : > { %1436 = vmatpush2.msra.mxu0 %v4244_v0  ;;  %1499 = vmatpush2.msra.mxu1 %v4666_v15  ;;  %v4687_v0 = vsel %vm859_vm1, %v4419_v20, %v848_v47 }
  0xe0   : > { %v4674_v28 = vpop.permute.xlu0 %427  ;;  %1437 = vmatprep.subr.mxu0 %v4500_v43  ;;  %1500 = vmatprep.subr.mxu1 %v4672_v19  ;;  %v4678_v2 = vpop.permute.xlu1 %332  ;;  %v4696_v43 = vsel %vm764_vm2, %v4438_v26, %v4643_v51  ;;  %v4709_v26 = vsel %vm629_vm3, %v4484_v39, %v4651_v52  ;;  %v4727_v39 = vld [vmem:[%s6223_s1] sm:$0xff] }
  0xe1   : > { %1438 = vmatpush2.msra.mxu0 %v4457_v31  ;;  %1501 = vmatpush2.msra.mxu1 %v4681_v54  ;;  %v4734_v55 = vsel %vm439_vm5, %v4542_v58, %v4674_v28  ;;  %v4748_v59 = vsel %vm344_vm6, %v4561_v11, %v4678_v2 }
  0xe2   : > { %1439 = vmatprep.subr.mxu0 %v4518_v50  ;;  %1502 = vmatprep.subr.mxu1 %v4687_v0  ;;  %v4720_v50 = vsel %vm534_vm4, %v4511_v48, %v4655_v53 }
  0xe3   : > { %1440 = vmatpush2.msra.mxu0 %v4477_v38  ;;  %1503 = vmatpush2.msra.mxu1 %v4426_v23 }
  0xe4   : > { %v850_v31 = vpop.permute.xlu0 %849  ;;  %1441 = vmatprep.subr.mxu0 %v4558_v62  ;;  %1504 = vmatprep.subr.mxu1 %v4696_v43  ;;  %v755_v20 = vpop.permute.xlu1 %754 }
  0xe5   : > { %1442 = vmatpush2.msra.mxu0 %v4504_v46  ;;  %1505 = vmatpush2.msra.mxu1 %v4443_v27  ;;  %v4737_v48 = vsel %vm859_vm1, %v848_v47, %v850_v31  ;;  %v4754_v58 = vsel %vm764_vm2, %v4643_v51, %v755_v20 }
  0xe6   : > { %1443 = vmatprep.subr.mxu0 %v4568_v13  ;;  %1506 = vmatprep.subr.mxu1 %v4268_v4 }
  0xe7   : > { %1444 = vmatpush2.msra.mxu0 %v4535_v56  ;;  %1507 = vmatpush2.msra.mxu1 %v4261_v3 }
  0xe8   : > { %v852_v38 = vpop.permute.xlu0 %851  ;;  %1445 = vmatprep.subr.mxu0 %v4601_v37  ;;  %1508 = vmatprep.subr.mxu1 %v4709_v26  ;;  %v4713_v46 = vpop.permute.xlu1 %853 }
  0xe9   : > { %1446 = vmatpush2.msra.mxu0 %v4580_v21  ;;  %1509 = vmatpush2.msra.mxu1 %v4491_v42  ;;  %v4778_v14 = vsel %vm859_vm1, %v852_v38, %v4713_v46  ;;  %v4789_v21 = vsel %vm859_vm1, %v850_v31, %v852_v38 }
  0xea   : > { %1447 = vmatprep.subr.mxu0 %v4615_v22  ;;  %1510 = vmatprep.subr.mxu1 %v4720_v50 }
  0xeb   : > { %1448 = vmatpush2.msra.mxu0 %v4587_v30  ;;  %1511 = vmatpush2.msra.mxu1 %v4515_v49 }
  0xec   : > { %v757_v56 = vpop.permute.xlu0 %756  ;;  %1512 = vmatprep.subr.mxu1 %v4734_v55  ;;  %1527 = vmatprep.subr.mxu0 %v4737_v48  ;;  %v4741_v57 = vpop.permute.xlu1 %758 }
  0xed   : > { %1450 = vmatmul.mubr.f32.vlgmr.msra.gmra.mxu0 %v4727_v39  ;;  %1513 = vmatpush2.msra.mxu1 %v4549_v61  ;;  %v4784_v18 = vsel %vm764_vm2, %v757_v56, %v4741_v57  ;;  %v4795_v25 = vsel %vm764_vm2, %v755_v20, %v757_v56 }
  0xee   : > { %1528 = vmatpush1.msra.mxu0 %v4687_v0  ;;  %1514 = vmatprep.subr.mxu1 %v4748_v59 }
  0xef   : > { %1529 = vmatprep.subr.mxu0 %v4754_v58  ;;  %1515 = vmatpush2.msra.mxu1 %v4565_v12 }
  0xf0   : > { %1530 = vmatpush1.msra.mxu0 %v4696_v43  ;;  %v620_v60 = vpop.permute.xlu0 %619  ;;  %1516 = vmatprep.subr.mxu1 %v4666_v15  ;;  %v525_v62 = vpop.permute.xlu1 %524 }
  0xf1   : > { %1531 = vmatprep.subr.mxu0 %v4335_v6  ;;  %1517 = vmatpush2.msra.mxu1 %v4598_v36  ;;  %v4764_v63 = vsel %vm629_vm3, %v4651_v52, %v620_v60  ;;  %v4774_v13 = vsel %vm534_vm4, %v4655_v53, %v525_v62 }
  0xf2   : > { %1532 = vmatpush1.msra.mxu0 %v4268_v4  ;;  %1518 = vmatprep.subr.mxu1 %v4681_v54 }
  0xf3   : > { %1533 = vmatprep.subr.mxu0 %v4764_v63  ;;  %1519 = vmatpush2.msra.mxu1 %v4612_v44 }
  0xf4   : > { %1534 = vmatpush1.msra.mxu0 %v4709_v26  ;;  %v622_v11 = vpop.permute.xlu0 %621  ;;  %1521 = vmatmul.mubr.f32.vlgmr.msra.gmra.mxu1 %v4727_v39  ;;  %v4780_v17 = vpop.permute.xlu1 %623 }
  0xf5   : > { %1535 = vmatprep.subr.mxu0 %v4774_v13  ;;  %1598 = vmatprep.subr.mxu1 %v4778_v14  ;;  %v4802_v32 = vsel %vm629_vm3, %v622_v11, %v4780_v17  ;;  %v4812_v36 = vsel %vm629_vm3, %v620_v60, %v622_v11 }
  0xf6   : > { %1536 = vmatpush1.msra.mxu0 %v4720_v50  ;;  %1599 = vmatpush1.msra.mxu1 %v4789_v21 }
  0xf7   : > { %1600 = vmatprep.subr.mxu1 %v4784_v18  ;;  %3893 = vmatprep.mubr.msk.f32.mxu0 %vm1381_vm0, %v4356_v7 }
  0xf8   : > { %1601 = vmatpush1.msra.mxu1 %v4795_v25  ;;  %v430_v29 = vpop.permute.xlu0 %429  ;;  %v527_v30 = vpop.permute.xlu1 %526  ;;  %3894 = vmatprep.mubr.msk.f32.mxu1 %vm1381_vm0, %v4356_v7 }
  0xf9   : > { %1602 = vmatprep.subr.mxu1 %v4374_v9  ;;  %v4809_v33 = vsel %vm439_vm5, %v4674_v28, %v430_v29  ;;  %v4831_v22 = vsel %vm534_vm4, %v525_v62, %v527_v30 }
  0xfa   : > { %1603 = vmatpush1.msra.mxu1 %v4367_v8  ;;  %1537 = vmatprep.subr.mxu0 %v4809_v33 }
  0xfb   : > { %1604 = vmatprep.subr.mxu1 %v4802_v32  ;;  %1538 = vmatpush1.msra.mxu0 %v4734_v55 }
  0xfc   : > { %1605 = vmatpush1.msra.mxu1 %v4812_v36  ;;  %v4819_v37 = vpop.permute.xlu0 %528 }
  0xfd   : > { %v335_v40 = vpop.permute.xlu1 %334  ;;  %v4823_v16 = vsel %vm534_vm4, %v527_v30, %v4819_v37 }
  0xfe   : > { %v4827_v44 = vsel %vm344_vm6, %v4678_v2, %v335_v40  ;;  %1606 = vmatprep.subr.mxu1 %v4823_v16 }
  0xff   : > { %1539 = vmatprep.subr.mxu0 %v4827_v44  ;;  %1607 = vmatpush1.msra.mxu1 %v4831_v22 }
 0x100   : > { %1540 = vmatpush1.msra.mxu0 %v4748_v59  ;;  %v432_v1 = vpop.permute.xlu0 %431 }
 0x101   : > { %1541 = vmatprep.subr.mxu0 %v4661_v24  ;;  %v4837_v35 = vpop.permute.xlu1 %433  ;;  %v4840_v47 = vsel %vm439_vm5, %v430_v29, %v432_v1 }
 0x102   : > { %1542 = vmatpush1.msra.mxu0 %v4666_v15  ;;  %v4845_v51 = vsel %vm439_vm5, %v432_v1, %v4837_v35 }
 0x103   : > { %1543 = vmatprep.subr.mxu0 %v4672_v19  ;;  %1608 = vmatprep.subr.mxu1 %v4845_v51 }
 0x104   : > { %1544 = vmatpush1.msra.mxu0 %v4681_v54  ;;  %1609 = vmatpush1.msra.mxu1 %v4840_v47  ;;  %v337_v52 = vpop.permute.xlu0 %336 }
 0x105   : > { %1545 = vmatprep.subr.mxu0 %v4687_v0  ;;  %v4852_v53 = vpop.permute.xlu1 %338  ;;  %v4855_v28 = vsel %vm344_vm6, %v335_v40, %v337_v52 }
 0x106   : > { %1546 = vmatpush1.msra.mxu0 %v4426_v23  ;;  %v4860_v15 = vsel %vm344_vm6, %v337_v52, %v4852_v53 }
 0x107   : > { %1547 = vmatprep.subr.mxu0 %v4696_v43  ;;  %1610 = vmatprep.subr.mxu1 %v4860_v15 }
 0x108   : > { %1548 = vmatpush1.msra.mxu0 %v4443_v27  ;;  %1611 = vmatpush1.msra.mxu1 %v4855_v28  ;;  %v1040_v2 = vpop.permute.xlu0 %1039 }
 0x109   : > { %1549 = vmatprep.subr.mxu0 %v4268_v4  ;;  %v1042_v54 = vpop.permute.xlu1 %1041  ;;  %v4869_v0 = vsel %vm1049_vm7, %v4623_v45, %v1040_v2 }
 0x10a   : > { %1550 = vmatpush1.msra.mxu0 %v4261_v3  ;;  %v4873_v23 = vsel %vm1049_vm7, %v1040_v2, %v1042_v54 }
 0x10b   : > { %1551 = vmatprep.subr.mxu0 %v4709_v26  ;;  %1612 = vmatprep.subr.mxu1 %v4873_v23 }
 0x10c   : > { %1552 = vmatpush1.msra.mxu0 %v4491_v42  ;;  %1613 = vmatpush1.msra.mxu1 %v4869_v0  ;;  %v945_v27 = vpop.permute.xlu0 %944 }
 0x10d   : > { %1553 = vmatprep.subr.mxu0 %v4720_v50  ;;  %v947_v4 = vpop.permute.xlu1 %946  ;;  %v4882_v45 = vsel %vm954_vm8, %v4633_v41, %v945_v27 }
 0x10e   : > { %1554 = vmatpush1.msra.mxu0 %v4515_v49  ;;  %v4886_v3 = vsel %vm954_vm8, %v945_v27, %v947_v4 }
 0x10f   : > { %1555 = vmatprep.subr.mxu0 %v4734_v55  ;;  %1614 = vmatprep.subr.mxu1 %v4886_v3 }
 0x110   : > { %1556 = vmatpush1.msra.mxu0 %v4549_v61  ;;  %1615 = vmatpush1.msra.mxu1 %v4882_v45  ;;  %v1044_v42 = vpop.permute.xlu0 %1043 }
 0x111   : > { %1557 = vmatprep.subr.mxu0 %v4748_v59  ;;  %1616 = vmatprep.subr.mxu1 %v4789_v21  ;;  %v4894_v41 = vpop.permute.xlu1 %1045 }
 0x112   : > { %1558 = vmatpush1.msra.mxu0 %v4565_v12  ;;  %1617 = vmatpush1.msra.mxu1 %v4737_v48  ;;  %v4922_v20 = vsel %vm1049_vm7, %v1044_v42, %v4894_v41 }
 0x113   : > { %1569 = vmatprep.subr.mxu0 %v4873_v23  ;;  %1618 = vmatprep.subr.mxu1 %v4795_v25 }
 0x114   : > { %1570 = vmatpush2.msra.mxu0 %v4869_v0  ;;  %1619 = vmatpush1.msra.mxu1 %v4754_v58  ;;  %v949_v49 = vpop.permute.xlu0 %948 }
 0x115   : > { %1571 = vmatprep.subr.mxu0 %v4886_v3  ;;  %1620 = vmatprep.subr.mxu1 %v4367_v8  ;;  %v4904_v61 = vpop.permute.xlu1 %950  ;;  %v4942_v55 = vsel %vm954_vm8, %v947_v4, %v949_v49 }
 0x116   : > { %1572 = vmatpush2.msra.mxu0 %v4882_v45  ;;  %1621 = vmatpush1.msra.mxu1 %v4335_v6 }
 0x117   : > { %1573 = vmatprep.subr.mxu0 %v4789_v21  ;;  %1622 = vmatprep.subr.mxu1 %v4812_v36 }
 0x118   : > { %1574 = vmatpush2.msra.mxu0 %v4737_v48  ;;  %1623 = vmatpush1.msra.mxu1 %v4764_v63  ;;  %v856_v12 = vpop.permute.xlu0 %855 }
 0x119   : > { %1575 = vmatprep.subr.mxu0 %v4795_v25  ;;  %1624 = vmatprep.subr.mxu1 %v4831_v22  ;;  %v761_v43 = vpop.permute.xlu1 %760  ;;  %v867_v48 = vsel %vm859_vm1, %v4713_v46, %v856_v12 }
 0x11a   : > { %1576 = vmatpush2.msra.mxu0 %v4754_v58  ;;  %1625 = vmatpush1.msra.mxu1 %v4774_v13  ;;  %v772_v59 = vsel %vm764_vm2, %v4741_v57, %v761_v43 }
 0x11b   : > { %1577 = vmatprep.subr.mxu0 %v4367_v8  ;;  %1626 = vmatprep.subr.mxu1 %v4840_v47  ;;  %v4930_v8 = vsel %vm954_vm8, %v949_v49, %v4904_v61 }
 0x11c   : > { %1578 = vmatpush2.msra.mxu0 %v4335_v6  ;;  %1627 = vmatpush1.msra.mxu1 %v4809_v33  ;;  %v626_v31 = vpop.permute.xlu0 %625  ;;  %v4935_v6 = vsel %vm1049_vm7, %v1042_v54, %v1044_v42 }
 0x11d   : > { %1579 = vmatprep.subr.mxu0 %v4812_v36  ;;  %1628 = vmatprep.subr.mxu1 %v4855_v28  ;;  %v531_v26 = vpop.permute.xlu1 %530  ;;  %v637_v57 = vsel %vm629_vm3, %v4780_v17, %v626_v31  ;;  %v5033_v36 = vld [vmem:[%s6227_s5] sm:$0xff] }
 0x11e   : > { %1580 = vmatpush2.msra.mxu0 %v4764_v63  ;;  %1629 = vmatpush1.msra.mxu1 %v4827_v44  ;;  %v542_v62 = vsel %vm534_vm4, %v4819_v37, %v531_v26 }
 0x11f   : > { %1581 = vmatprep.subr.mxu0 %v4831_v22  ;;  %1640 = vmatprep.subr.mxu1 %v4922_v20 }
 0x120   : > { %1582 = vmatpush2.msra.mxu0 %v4774_v13  ;;  %1641 = vmatpush2.msra.mxu1 %v4935_v6  ;;  %v436_v38 = vpop.permute.xlu0 %435 }
 0x121   : > { %1583 = vmatprep.subr.mxu0 %v4840_v47  ;;  %1642 = vmatprep.subr.mxu1 %v4930_v8  ;;  %v341_v50 = vpop.permute.xlu1 %340  ;;  %v447_v63 = vsel %vm439_vm5, %v4837_v35, %v436_v38 }
 0x122   : > { %1584 = vmatpush2.msra.mxu0 %v4809_v33  ;;  %1643 = vmatpush2.msra.mxu1 %v4942_v55  ;;  %v352_v13 = vsel %vm344_vm6, %v4852_v53, %v341_v50 }
 0x123   : > { %1585 = vmatprep.subr.mxu0 %v4855_v28  ;;  %1644 = vmatprep.subr.mxu1 %v867_v48 }
 0x124   : > { %1586 = vmatpush2.msra.mxu0 %v4827_v44  ;;  %1645 = vmatpush2.msra.mxu1 %v4778_v14  ;;  %v858_v56 = vpop.permute.xlu0 %857 }
 0x125   : > { %1587 = vmatprep.subr.mxu0 %v4869_v0  ;;  %1646 = vmatprep.subr.mxu1 %v772_v59  ;;  %v763_v58 = vpop.permute.xlu1 %762  ;;  %v4959_v46 = vsel %vm859_vm1, %v856_v12, %v858_v56 }
 0x126   : > { %1588 = vmatpush2.msra.mxu0 %v4661_v24  ;;  %1647 = vmatpush2.msra.mxu1 %v4784_v18  ;;  %v4967_v24 = vsel %vm764_vm2, %v761_v43, %v763_v58 }
 0x127   : > { %1589 = vmatprep.subr.mxu0 %v4882_v45  ;;  %1648 = vmatprep.subr.mxu1 %v4377_v10 }
 0x128   : > { %1590 = vmatpush2.msra.mxu0 %v4672_v19  ;;  %1649 = vmatpush2.msra.mxu1 %v4374_v9  ;;  %v628_v60 = vpop.permute.xlu0 %627 }
 0x129   : > { %1592 = vmatmul.mubr.f32.vlgmr.msra.gmra.mxu0 %v4727_v39  ;;  %1650 = vmatprep.subr.mxu1 %v637_v57  ;;  %v533_v19 = vpop.permute.xlu1 %532  ;;  %v638_v11 = vsel %vm629_vm3, %v626_v31, %v628_v60 }
 0x12a   : > { %1669 = vmatprep.subr.mxu0 %v4959_v46  ;;  %1651 = vmatpush2.msra.mxu1 %v4802_v32  ;;  %v543_v17 = vsel %vm534_vm4, %v531_v26, %v533_v19 }
 0x12b   : > { %1670 = vmatpush1.msra.mxu0 %v867_v48  ;;  %1652 = vmatprep.subr.mxu1 %v542_v62 }
 0x12c   : > { %1671 = vmatprep.subr.mxu0 %v4967_v24  ;;  %1653 = vmatpush2.msra.mxu1 %v4823_v16  ;;  %v438_v21 = vpop.permute.xlu0 %437 }
 0x12d   : > { %1672 = vmatpush1.msra.mxu0 %v772_v59  ;;  %1654 = vmatprep.subr.mxu1 %v447_v63  ;;  %v448_v25 = vsel %vm439_vm5, %v436_v38, %v438_v21  ;;  %v343_v29 = vpop.permute.xlu1 %342 }
 0x12e   : > { %1673 = vmatprep.subr.mxu0 %v4466_v34  ;;  %1655 = vmatpush2.msra.mxu1 %v4845_v51  ;;  %v353_v30 = vsel %vm344_vm6, %v341_v50, %v343_v29 }
 0x12f   : > { %1674 = vmatpush1.msra.mxu0 %v4377_v10  ;;  %1656 = vmatprep.subr.mxu1 %v352_v13 }
 0x130   : > { %1675 = vmatprep.subr.mxu0 %v638_v11  ;;  %1657 = vmatpush2.msra.mxu1 %v4860_v15 }
 0x131   : > { %1676 = vmatpush1.msra.mxu0 %v637_v57  ;;  %1658 = vmatprep.subr.mxu1 %v4935_v6  ;;  %v953_v33 = vpop.permute.xlu1 %952 }
 0x132   : > { %1677 = vmatprep.subr.mxu0 %v543_v17  ;;  %1659 = vmatpush2.msra.mxu1 %v4873_v23 }
 0x133   : > { %1678 = vmatpush1.msra.mxu0 %v542_v62  ;;  %1660 = vmatprep.subr.mxu1 %v4942_v55 }
 0x134   : > { %1679 = vmatprep.subr.mxu0 %v448_v25  ;;  %1661 = vmatpush2.msra.mxu1 %v4886_v3 }
 0x135   : > { %1680 = vmatpush1.msra.mxu0 %v447_v63  ;;  %1663 = vmatmul.mubr.f32.vlgmr.msra.gmra.mxu1 %v4727_v39 }
 0x136   : > { %1681 = vmatprep.subr.mxu0 %v353_v30  ;;  %3895 = vmatprep.mubr.msk.f32.mxu0 %vm1381_vm0, %v4356_v7  ;;  %v1048_v7 = vpop.permute.xlu0 %1047 }
 0x137   : > { %1682 = vmatpush1.msra.mxu0 %v352_v13 }
 0x138   : > { %1683 = vmatprep.subr.mxu0 %v4922_v20 }
 0x139   : > { %1684 = vmatpush1.msra.mxu0 %v4935_v6 }
 0x13a   : > { %1685 = vmatprep.subr.mxu0 %v4930_v8 }
 0x13b   : > { %1686 = vmatpush1.msra.mxu0 %v4942_v55 }
 0x13c   : > { %1687 = vmatprep.subr.mxu0 %v867_v48 }
 0x13d   : > { %1688 = vmatpush1.msra.mxu0 %v4778_v14  ;;  %v1058_v14 = vsel %vm1049_vm7, %v4894_v41, %v1048_v7 }
 0x13e   : > { %1689 = vmatprep.subr.mxu0 %v772_v59  ;;  %v5166_v59 = vld [vmem:[%s6225_s3 + $0x8] sm:$0xff] }
 0x13f   : > { %1690 = vmatpush1.msra.mxu0 %v4784_v18  ;;  %3896 = vmatprep.mubr.msk.f32.mxu1 %vm1381_vm0, %v5166_v59 }
 0x140   : > { %1691 = vmatprep.subr.mxu0 %v4377_v10  ;;  %v1752_v10 = vlaneseq }
 0x141   : > { %1692 = vmatpush1.msra.mxu0 %v4374_v9  ;;  %v963_v9 = vsel %vm954_vm8, %v4904_v61, %v953_v33 }
 0x142   : > { %1693 = vmatprep.subr.mxu0 %v637_v57 }
 0x143   : > { %1694 = vmatpush1.msra.mxu0 %v4802_v32  ;;  %v5028_v32 = vpop.permute.xlu0 %1378 }
 0x144   : > { %1695 = vmatprep.subr.mxu0 %v542_v62  ;;  %v5208_v62 = vpop.permute.xlu1 %2070 }
 0x145   : > { %1696 = vmatpush1.msra.mxu0 %v4823_v16 }
 0x146   : > { %1697 = vmatprep.subr.mxu0 %v447_v63 }
 0x147   : > { %1698 = vmatpush1.msra.mxu0 %v4845_v51 }
 0x148   : > { %1699 = vmatprep.subr.mxu0 %v352_v13 }
 0x149   : > { %1700 = vmatpush1.msra.mxu0 %v4860_v15 }
 0x14a   : > { %1711 = vmatprep.subr.mxu0 %v6230_v5 }
 0x14b   : > { %1712 = vmatpush2.msra.mxu0 %v1058_v14 }
 0x14c   : > { %1713 = vmatprep.subr.mxu0 %v6230_v5 }
 0x14d   : > { %1714 = vmatpush2.msra.mxu0 %v963_v9 }
 0x14e   : > { %1715 = vmatprep.subr.mxu0 %v6230_v5 }
 0x14f   : > { %1716 = vmatpush2.msra.mxu0 %v4959_v46 }
 0x150   : > { %1717 = vmatprep.subr.mxu0 %v6230_v5 }
 0x151   : > { %1718 = vmatpush2.msra.mxu0 %v4967_v24  ;;  %v5198_v24 = vpop.permute.xlu0 %2164 }
 0x152   : > { %1719 = vmatprep.subr.mxu0 %v6230_v5 }
 0x153   : > { %1720 = vmatpush2.msra.mxu0 %v4466_v34  ;;  %v5025_v34 = vshrl.u32 %v1752_v10, 7 }
 0x154   : > { %1721 = vmatprep.subr.mxu0 %v6230_v5 }
 0x155   : > { %1722 = vmatpush2.msra.mxu0 %v638_v11  ;;  %6234 = vst [vmem:[#allocation4_spill] sm:$0xff] %v5025_v34  ;;  %v1754_v18 = vsub.s32 0, %v5025_v34  ;;  %v1762_v44 = vsub.s32 2, %v5025_v34  ;;  %v1758_v15 = vsub.s32 1, %v5025_v34  ;;  %v1766_v4 = vsub.s32 3, %v5025_v34  ;;  %v5206_v60 = vpop.permute.xlu0 %1976 }
 0x156   : > { %1723 = vmatprep.subr.mxu0 %v6230_v5  ;;  %v1770_v49 = vsub.s32 4, %v5025_v34  ;;  %v1774_v56 = vsub.s32 5, %v5025_v34  ;;  %v1782_v11 = vsub.s32 7, %v5025_v34 }
 0x157   : > { %1724 = vmatpush2.msra.mxu0 %v543_v17  ;;  %v1755_v16 = vrot.slane %v5033_v36, %v1754_v18  ;;  %v5046_v47 = vrot.slane %v5033_v36, %v1762_v44  ;;  %v5080_v54 = vrot.slane %v5033_v36, %v1758_v15  ;;  %v5104_v3 = vrot.slane %v5033_v36, %v1766_v4  ;;  %v5218_v17 = vpop.permute.xlu1 %1882 }
 0x158   : > { %1725 = vmatprep.subr.mxu0 %v6230_v5  ;;  %v5124_v43 = vrot.slane %v5033_v36, %v1770_v49  ;;  %v5173_v46 = vrot.slane %v5033_v36, %v1774_v56 }
 0x159   : > { %1726 = vmatpush2.msra.mxu0 %v448_v25  ;;  %v5223_v25 = vrot.slane %v5033_v36, %v1782_v11 }
 0x15a   : > { %1727 = vmatprep.subr.mxu0 %v6230_v5 }
 0x15b   : > { %1728 = vmatpush2.msra.mxu0 %v353_v30 }
 0x15c   : > { %1729 = vmatprep.subr.mxu0 %v1058_v14 }
 0x15d   : > { %1730 = vmatpush2.msra.mxu0 %v4922_v20  ;;  %v1778_v20 = vsub.s32 6, %v5025_v34 }
 0x15e   : > { %1731 = vmatprep.subr.mxu0 %v963_v9 }
 0x15f   : > { %1732 = vmatpush2.msra.mxu0 %v4930_v8  ;;  %v5140_v6 = vrot.slane %v5033_v36, %v1778_v20  ;;  %v278_v36 = vld [vmem:[%s6227_s5 + $0x8] sm:$0x3] }
 0x160   : > { %1734 = vmatmul.mubr.f32.vlgmr.msra.gmra.mxu0 %v4727_v39  ;;  %v5284_v4 = vrot.slane %v278_v36, %v1758_v15 }
 0x161   : > { %3897 = vmatprep.mubr.msk.f32.mxu0 %vm1381_vm0, %v5166_v59 }
 0x1ad   : > { %v1451_v37 = vpop.f32.mrf.mxu0 }
 0x1ae   : > { %v1452_v40 = vadd.f32 %v1451_v37, %v5028_v32 }
 0x1af   : > { %v1453_v53 = vpop.f32.mrf.mxu0 }
 0x1b0   : > { %v1740_v39 = vmax.f32 %v1452_v40, 0.0  ;;  %v1454_v28 = vadd.f32 %v1453_v53, %v5028_v32 }
 0x1b2   : > { %v5040_v22 = vmul.f32 %v1755_v16, %v1740_v39  ;;  %v1741_v2 = vmax.f32 %v1454_v28, 0.0  ;;  %v5252_v39 = vrot.slane %v278_v36, %v1754_v18  ;;  %v2886_v36 = vld [vmem:[%s6226_s4] sm:$0xff] }
 0x1b4   : > { %v1522_v1 = vpop.f32.mrf.mxu1  ;;  %2392 = vrot.lane.b32.xlu0 %v5040_v22, %s4176_s30  ;;  %v5087_v0 = vmul.f32 %v5080_v54, %v1741_v2 }
 0x1b5   : > { %v1523_v35 = vadd.f32 %v1522_v1, %v5028_v32 }
 0x1b6   : > { %v1524_v23 = vpop.f32.mrf.mxu1 }
 0x1b7   : > { %v1742_v51 = vmax.f32 %v1523_v35, 0.0  ;;  %v1525_v27 = vadd.f32 %v1524_v23, %v5028_v32 }
 0x1b9   : > { %v5049_v52 = vmul.f32 %v5046_v47, %v1742_v51  ;;  %v1743_v45 = vmax.f32 %v1525_v27, 0.0 }
 0x1bb   : > { %2261 = vrot.lane.b32.xlu0 %v5049_v52, %s4177_s8  ;;  %2355 = vrot.lane.b32.xlu1 %v5049_v52, %s4176_s30  ;;  %v5111_v42 = vmul.f32 %v5104_v3, %v1743_v45 }
 0x1bf   : > { %2125 = vrot.lane.b32.xlu0 %v5040_v22, %s4178_s9  ;;  %2298 = vrot.lane.b32.xlu1 %v5040_v22, %s4177_s8 }
 0x1c3   : > { %1937 = vrot.lane.b32.xlu0 %v5040_v22, %s4181_s11  ;;  %2031 = vrot.lane.b32.xlu1 %v5040_v22, %s4180_s10 }
 0x1c7   : > { %2543 = vrot.lane.b32.xlu0 %v5049_v52, %s4183_s13  ;;  %1843 = vrot.lane.b32.xlu1 %v5040_v22, %s4182_s12 }
 0x1cb   : > { %2449 = vrot.lane.b32.xlu0 %v5049_v52, %s4184_s14  ;;  %2580 = vrot.lane.b32.xlu1 %v5040_v22, %s4183_s13 }
 0x1cf   : > { %2129 = vrot.lane.b32.xlu0 %v5049_v52, %s4178_s9  ;;  %2486 = vrot.lane.b32.xlu1 %v5040_v22, %s4184_s14 }
 0x1d3   : > { %1941 = vrot.lane.b32.xlu0 %v5049_v52, %s4181_s11  ;;  %2035 = vrot.lane.b32.xlu1 %v5049_v52, %s4180_s10 }
 0x1d7   : > { %2033 = vrot.lane.b32.xlu0 %v5087_v0, %s4180_s10  ;;  %1847 = vrot.lane.b32.xlu1 %v5049_v52, %s4182_s12 }
 0x1db   : > { %1845 = vrot.lane.b32.xlu0 %v5087_v0, %s4182_s12  ;;  %2353 = vrot.lane.b32.xlu1 %v5087_v0, %s4176_s30 }
 0x1df   : > { %2541 = vrot.lane.b32.xlu0 %v5087_v0, %s4183_s13  ;;  %2259 = vrot.lane.b32.xlu1 %v5087_v0, %s4177_s8 }
 0x1e3   : > { %2447 = vrot.lane.b32.xlu0 %v5087_v0, %s4184_s14  ;;  %2127 = vrot.lane.b32.xlu1 %v5087_v0, %s4178_s9 }
 0x1e7   : > { %2357 = vrot.lane.b32.xlu0 %v5111_v42, %s4176_s30  ;;  %1939 = vrot.lane.b32.xlu1 %v5087_v0, %s4181_s11 }
 0x1e9   : > { %v1593_v41 = vpop.f32.mrf.mxu0 }
 0x1ea   : > { %v1594_v61 = vadd.f32 %v1593_v41, %v5028_v32 }
 0x1eb   : > { %2131 = vrot.lane.b32.xlu0 %v5111_v42, %s4178_s9  ;;  %2545 = vrot.lane.b32.xlu1 %v5111_v42, %s4183_s13  ;;  %v1595_v55 = vpop.f32.mrf.mxu0 }
 0x1ec   : > { %v1744_v12 = vmax.f32 %v1594_v61, 0.0  ;;  %v1596_v48 = vadd.f32 %v1595_v55, %v5028_v32 }
 0x1ee   : > { %v5131_v31 = vmul.f32 %v5124_v43, %v1744_v12  ;;  %v1745_v58 = vmax.f32 %v1596_v48, 0.0 }
 0x1ef   : > { %1943 = vrot.lane.b32.xlu0 %v5111_v42, %s4181_s11  ;;  %2451 = vrot.lane.b32.xlu1 %v5111_v42, %s4184_s14 }
 0x1f0   : > { %v5182_v57 = vmul.f32 %v5173_v46, %v1745_v58 }
 0x1f3   : > { %2263 = vrot.lane.b32.xlu1 %v5111_v42, %s4177_s8  ;;  %2359 = vrot.lane.b32.xlu0 %v5131_v31, %s4176_s30 }
 0x1f5   : > { %v1664_v26 = vpop.f32.mrf.mxu1 }
 0x1f6   : > { %v1665_v8 = vadd.f32 %v1664_v26, %v5028_v32 }
 0x1f7   : > { %2037 = vrot.lane.b32.xlu1 %v5111_v42, %s4180_s10  ;;  %v1666_v19 = vpop.f32.mrf.mxu1 }
 0x1f8   : > { %v1746_v38 = vmax.f32 %v1665_v8, 0.0  ;;  %v1667_v63 = vadd.f32 %v1666_v19, %v5028_v32 }
 0x1fa   : > { %v5145_v50 = vmul.f32 %v5140_v6, %v1746_v38  ;;  %v1747_v21 = vmax.f32 %v1667_v63, 0.0 }
 0x1fb   : > { %1849 = vrot.lane.b32.xlu1 %v5111_v42, %s4182_s12 }
 0x1fc   : > { %2363 = vrot.lane.b32.xlu0 %v5145_v50, %s4176_s30  ;;  %v5230_v29 = vmul.f32 %v5223_v25, %v1747_v21 }
 0x1ff   : > { %2265 = vrot.lane.b32.xlu1 %v5131_v31, %s4177_s8 }
 0x200   : > { %2039 = vrot.lane.b32.xlu0 %v5131_v31, %s4180_s10 }
 0x203   : > { %2269 = vrot.lane.b32.xlu1 %v5145_v50, %s4177_s8 }
 0x204   : > { %1851 = vrot.lane.b32.xlu0 %v5131_v31, %s4182_s12 }
 0x207   : > { %2133 = vrot.lane.b32.xlu1 %v5131_v31, %s4178_s9 }
 0x208   : > { %2547 = vrot.lane.b32.xlu0 %v5131_v31, %s4183_s13 }
 0x20b   : > { %1945 = vrot.lane.b32.xlu1 %v5131_v31, %s4181_s11 }
 0x20c   : > { %2453 = vrot.lane.b32.xlu0 %v5131_v31, %s4184_s14 }
 0x20f   : > { %2361 = vrot.lane.b32.xlu1 %v5182_v57, %s4176_s30 }
 0x210   : > { %2551 = vrot.lane.b32.xlu0 %v5145_v50, %s4183_s13 }
 0x213   : > { %2041 = vrot.lane.b32.xlu1 %v5182_v57, %s4180_s10 }
 0x214   : > { %2267 = vrot.lane.b32.xlu0 %v5182_v57, %s4177_s8 }
 0x217   : > { %2043 = vrot.lane.b32.xlu1 %v5145_v50, %s4180_s10 }
 0x218   : > { %2135 = vrot.lane.b32.xlu0 %v5182_v57, %s4178_s9 }
 0x21b   : > { %1855 = vrot.lane.b32.xlu1 %v5145_v50, %s4182_s12 }
 0x21c   : > { %1947 = vrot.lane.b32.xlu0 %v5182_v57, %s4181_s11 }
 0x21f   : > { %1853 = vrot.lane.b32.xlu1 %v5182_v57, %s4182_s12 }
 0x220   : > { %2457 = vrot.lane.b32.xlu0 %v5145_v50, %s4184_s14  ;;  %v1735_v33 = vpop.f32.mrf.mxu0 }
 0x221   : > { %v1736_v10 = vadd.f32 %v1735_v33, %v5028_v32 }
 0x222   : > { %v1737_v51 = vpop.f32.mrf.mxu0 }
 0x223   : > { %2549 = vrot.lane.b32.xlu1 %v5182_v57, %s4183_s13  ;;  %v1748_v16 = vmax.f32 %v1736_v10, 0.0  ;;  %v1738_v28 = vadd.f32 %v1737_v51, %v5028_v32 }
 0x224   : > { %2137 = vrot.lane.b32.xlu0 %v5145_v50, %s4178_s9 }
 0x225   : > { %v5263_v35 = vmul.f32 %v5252_v39, %v1748_v16  ;;  %v1749_v27 = vmax.f32 %v1738_v28, 0.0 }
 0x226   : > { %v2393_v13 = vpop.permute.xlu0 %2392 }
 0x227   : > { %2455 = vrot.lane.b32.xlu1 %v5182_v57, %s4184_s14  ;;  %v5295_v41 = vmul.f32 %v5284_v4, %v1749_v27 }
 0x228   : > { %1949 = vrot.lane.b32.xlu0 %v5145_v50, %s4181_s11 }
 0x22b   : > { %2277 = vrot.lane.b32.xlu1 %v6230_v5, %s4177_s8 }
 0x22c   : > { %2371 = vrot.lane.b32.xlu0 %v6230_v5, %s4176_s30 }
 0x22d   : > { %v5232_v30 = vpop.permute.xlu0 %2261  ;;  %v5234_v7 = vpop.permute.xlu1 %2355 }
 0x22f   : > { %2553 = vrot.lane.b32.xlu1 %v5230_v29, %s4183_s13 }
 0x230   : > { %2365 = vrot.lane.b32.xlu0 %v5230_v29, %s4176_s30 }
 0x231   : > { %v2126_v14 = vpop.permute.xlu0 %2125  ;;  %v2299_v9 = vpop.permute.xlu1 %2298 }
 0x232   : > { %v2166_v63 = vsel %vm629_vm3, %v5198_v24, %v2126_v14 }
 0x233   : > { %2459 = vrot.lane.b32.xlu1 %v5230_v29, %s4184_s14 }
 0x234   : > { %2139 = vrot.lane.b32.xlu0 %v5230_v29, %s4178_s9 }
 0x235   : > { %v5248_v37 = vpop.permute.xlu0 %1937  ;;  %v2032_v40 = vpop.permute.xlu1 %2031 }
 0x237   : > { %2271 = vrot.lane.b32.xlu1 %v5230_v29, %s4177_s8 }
 0x238   : > { %1951 = vrot.lane.b32.xlu0 %v5230_v29, %s4181_s11 }
 0x239   : > { %v5258_v44 = vpop.permute.xlu0 %2543  ;;  %v5260_v1 = vpop.permute.xlu1 %1843 }
 0x23b   : > { %2045 = vrot.lane.b32.xlu1 %v5230_v29, %s4180_s10 }
 0x23c   : > { %2367 = vrot.lane.b32.xlu0 %v5263_v35, %s4176_s30 }
 0x23d   : > { %v5269_v18 = vpop.permute.xlu0 %2449  ;;  %v5271_v53 = vpop.permute.xlu1 %2580 }
 0x23f   : > { %1857 = vrot.lane.b32.xlu1 %v5230_v29, %s4182_s12 }
 0x240   : > { %2047 = vrot.lane.b32.xlu0 %v5263_v35, %s4180_s10 }
 0x241   : > { %v5278_v2 = vpop.permute.xlu0 %2129  ;;  %v5280_v23 = vpop.permute.xlu1 %2486 }
 0x243   : > { %2273 = vrot.lane.b32.xlu1 %v5263_v35, %s4177_s8 }
 0x244   : > { %1859 = vrot.lane.b32.xlu0 %v5263_v35, %s4182_s12 }
 0x245   : > { %v5290_v32 = vpop.permute.xlu0 %1941  ;;  %v5292_v45 = vpop.permute.xlu1 %2035 }
 0x247   : > { %2141 = vrot.lane.b32.xlu1 %v5263_v35, %s4178_s9 }
 0x248   : > { %2275 = vrot.lane.b32.xlu0 %v5295_v41, %s4177_s8 }
 0x249   : > { %v5301_v15 = vpop.permute.xlu0 %2033  ;;  %v5303_v49 = vpop.permute.xlu1 %1847 }
 0x24a   : > { %v5352_v11 = vsel %vm534_vm4, %v2032_v40, %v5301_v15 }
 0x24b   : > { %1953 = vrot.lane.b32.xlu1 %v5263_v35, %s4181_s11 }
 0x24c   : > { %2143 = vrot.lane.b32.xlu0 %v5295_v41, %s4178_s9 }
 0x24d   : > { %v5309_v61 = vpop.permute.xlu0 %1845  ;;  %v2354_v12 = vpop.permute.xlu1 %2353 }
 0x24e   : > { %v2394_v20 = vsel %vm859_vm1, %v2393_v13, %v2354_v12  ;;  %v5314_v26 = vsel %vm859_vm1, %v2354_v12, %v5234_v7  ;;  %v2072_v13 = vsel %vm534_vm4, %v5208_v62, %v2032_v40  ;;  %v5375_v62 = vsel %vm344_vm6, %v5260_v1, %v5309_v61 }
 0x24f   : > { %2369 = vrot.lane.b32.xlu1 %v5295_v41, %s4176_s30  ;;  %2895 = vmatprep.subr.mxu1 %v5314_v26 }
 0x250   : > { %1955 = vrot.lane.b32.xlu0 %v5295_v41, %s4181_s11  ;;  %2896 = vmatpush1.msra.mxu1 %v2394_v20 }
 0x251   : > { %v5321_v8 = vpop.permute.xlu0 %2541  ;;  %v2260_v38 = vpop.permute.xlu1 %2259 }
 0x252   : > { %v2300_v55 = vsel %vm764_vm2, %v2299_v9, %v2260_v38  ;;  %v5326_v48 = vsel %vm764_vm2, %v2260_v38, %v5232_v30  ;;  %v1884_v9 = vsel %vm344_vm6, %v5218_v17, %v5260_v1  ;;  %v2561_v12 = vsel %vm1049_vm7, %v5321_v8, %v5258_v44 }
 0x253   : > { %2049 = vrot.lane.b32.xlu1 %v5295_v41, %s4180_s10  ;;  %2897 = vmatprep.subr.mxu1 %v5326_v48 }
 0x254   : > { %2555 = vrot.lane.b32.xlu0 %v5263_v35, %s4183_s13  ;;  %2898 = vmatpush1.msra.mxu1 %v2300_v55 }
 0x255   : > { %v5333_v56 = vpop.permute.xlu0 %2447  ;;  %2899 = vmatprep.subr.mxu1 %v5087_v0  ;;  %v5336_v58 = vpop.permute.xlu1 %2127 }
 0x256   : > { %2900 = vmatpush1.msra.mxu1 %v5040_v22  ;;  %v5341_v19 = vsel %vm629_vm3, %v2126_v14, %v5336_v58  ;;  %v1978_v14 = vsel %vm439_vm5, %v5206_v60, %v5248_v37  ;;  %v5400_v17 = vsel %vm954_vm8, %v5280_v23, %v5333_v56 }
 0x257   : > { %1861 = vrot.lane.b32.xlu1 %v5295_v41, %s4182_s12  ;;  %2901 = vmatprep.subr.mxu1 %v5341_v19 }
 0x258   : > { %2461 = vrot.lane.b32.xlu0 %v5263_v35, %s4184_s14  ;;  %2902 = vmatpush1.msra.mxu1 %v2166_v63 }
 0x259   : > { %v2358_v21 = vpop.permute.xlu0 %2357  ;;  %2903 = vmatprep.subr.mxu1 %v5352_v11  ;;  %v5357_v24 = vpop.permute.xlu1 %1939 }
 0x25a   : > { %2904 = vmatpush1.msra.mxu1 %v2072_v13  ;;  %v5362_v33 = vsel %vm439_vm5, %v5248_v37, %v5357_v24  ;;  %v5391_v37 = vsel %vm1049_vm7, %v5271_v53, %v5321_v8  ;;  %v5420_v28 = vsel %vm859_vm1, %v5234_v7, %v2358_v21 }
 0x25b   : > { %2557 = vrot.lane.b32.xlu1 %v5295_v41, %s4183_s13  ;;  %2905 = vmatprep.subr.mxu1 %v5362_v33 }
 0x25c   : > { %2559 = vrot.lane.b32.xlu0 %v6230_v5, %s4183_s13  ;;  %2906 = vmatpush1.msra.mxu1 %v1978_v14 }
 0x25d   : > { %v5380_v10 = vpop.permute.xlu0 %2131  ;;  %2907 = vmatprep.subr.mxu1 %v5375_v62  ;;  %v5383_v60 = vpop.permute.xlu1 %2545 }
 0x25e   : > { %2908 = vmatpush1.msra.mxu1 %v1884_v9 }
 0x25f   : > { %2463 = vrot.lane.b32.xlu1 %v5295_v41, %s4184_s14  ;;  %2909 = vmatprep.subr.mxu1 %v5391_v37 }
 0x260   : > { %2889 = vperm.xlu0 %4122, %v2886_v36   ;;  %2910 = vmatpush1.msra.mxu1 %v6230_v5  ;;  %v1958_v36 = vsel %vm439_vm5, %v5357_v24, %v5290_v32 }
 0x261   : > { %v5402_v40 = vpop.permute.xlu0 %1943  ;;  %2911 = vmatprep.subr.mxu1 %v5400_v17  ;;  %v5405_v16 = vpop.permute.xlu1 %2451 }
 0x262   : > { %2912 = vmatpush1.msra.mxu1 %v6230_v5 }
 0x263   : > { %2465 = vrot.lane.b32.xlu1 %v6230_v5, %s4184_s14  ;;  %2913 = vmatprep.subr.mxu1 %v2394_v20 }
 0x264   : > { %2914 = vmatpush1.msra.mxu1 %v6230_v5 }
 0x265   : > { %v5411_v1 = vpop.permute.xlu0 %2359  ;;  %2915 = vmatprep.subr.mxu1 %v2300_v55  ;;  %v2264_v51 = vpop.permute.xlu1 %2263  ;;  %v5452_v55 = vsel %vm954_vm8, %v5269_v18, %v5405_v16 }
 0x266   : > { %2916 = vmatpush1.msra.mxu1 %v6230_v5  ;;  %v5416_v53 = vsel %vm859_vm1, %v2358_v21, %v5411_v1  ;;  %v2280_v8 = vsel %vm764_vm2, %v5232_v30, %v2264_v51  ;;  %v5476_v30 = vsel %vm629_vm3, %v5278_v2, %v5380_v10 }
 0x267   : > { %2917 = vmatprep.subr.mxu1 %v5040_v22  ;;  %2966 = vmatprep.subr.mxu0 %v5416_v53  ;;  %v5439_v22 = vsel %vm1049_vm7, %v5258_v44, %v5383_v60  ;;  %v2467_v44 = vsel %vm954_vm8, %v5333_v56, %v5269_v18  ;;  %v2146_v18 = vsel %vm629_vm3, %v5336_v58, %v5278_v2 }
 0x268   : > { %2918 = vmatpush1.msra.mxu1 %v6230_v5  ;;  %2967 = vmatpush1.msra.mxu0 %v5420_v28 }
 0x269   : > { %2919 = vmatprep.subr.mxu1 %v2166_v63  ;;  %v5426_v23 = vpop.permute.xlu1 %2037 }
 0x26a   : > { %2920 = vmatpush1.msra.mxu1 %v6230_v5  ;;  %v5486_v56 = vsel %vm534_vm4, %v5292_v45, %v5426_v23 }
 0x26b   : > { %2921 = vmatprep.subr.mxu1 %v2072_v13 }
 0x26c   : > { %2922 = vmatpush1.msra.mxu1 %v6230_v5 }
 0x26d   : > { %2923 = vmatprep.subr.mxu1 %v1978_v14  ;;  %v5430_v27 = vpop.permute.xlu1 %1849  ;;  %v2052_v14 = vsel %vm534_vm4, %v5301_v15, %v5292_v45  ;;  %v1864_v15 = vsel %vm344_vm6, %v5309_v61, %v5303_v49  ;;  %v5530_v61 = vld [vmem:[%s6225_s3] sm:$0xff] }
 0x26e   : > { %v5432_v7 = vpop.permute.xlu0 %2363  ;;  %2924 = vmatpush1.msra.mxu1 %v6230_v5  ;;  %v5509_v45 = vsel %vm344_vm6, %v5303_v49, %v5430_v27 }
 0x26f   : > { %2925 = vmatprep.subr.mxu1 %v1884_v9  ;;  %v5499_v9 = vsel %vm439_vm5, %v5290_v32, %v5402_v40 }
 0x270   : > { %2926 = vmatpush1.msra.mxu1 %v6230_v5 }
 0x271   : > { %2937 = vmatprep.subr.mxu1 %v5439_v22  ;;  %v5445_v20 = vpop.permute.xlu1 %2265 }
 0x272   : > { %v5447_v38 = vpop.permute.xlu0 %2039  ;;  %2938 = vmatpush2.msra.mxu1 %v2561_v12  ;;  %v5456_v63 = vsel %vm764_vm2, %v2264_v51, %v5445_v20 }
 0x273   : > { %2939 = vmatprep.subr.mxu1 %v5452_v55  ;;  %2968 = vmatprep.subr.mxu0 %v5456_v63 }
 0x274   : > { %2940 = vmatpush2.msra.mxu1 %v2467_v44  ;;  %2969 = vmatpush1.msra.mxu0 %v2280_v8 }
 0x275   : > { %2941 = vmatprep.subr.mxu1 %v5420_v28  ;;  %2970 = vmatprep.subr.mxu0 %v5111_v42  ;;  %v5467_v13 = vpop.permute.xlu1 %2269 }
 0x276   : > { %v5469_v21 = vpop.permute.xlu0 %1851  ;;  %2942 = vmatpush2.msra.mxu1 %v5314_v26  ;;  %2971 = vmatpush1.msra.mxu0 %v5049_v52 }
 0x277   : > { %2943 = vmatprep.subr.mxu1 %v2280_v8  ;;  %2972 = vmatprep.subr.mxu0 %v5476_v30 }
 0x278   : > { %2944 = vmatpush2.msra.mxu1 %v5326_v48  ;;  %2973 = vmatpush1.msra.mxu0 %v2146_v18 }
 0x279   : > { %2945 = vmatprep.subr.mxu1 %v5049_v52  ;;  %2974 = vmatprep.subr.mxu0 %v5486_v56  ;;  %v2134_v2 = vpop.permute.xlu1 %2133 }
 0x27a   : > { %v5493_v58 = vpop.permute.xlu0 %2547  ;;  %2946 = vmatpush2.msra.mxu1 %v5087_v0  ;;  %2975 = vmatpush1.msra.mxu0 %v2052_v14 }
 0x27b   : > { %2947 = vmatprep.subr.mxu1 %v2146_v18  ;;  %2976 = vmatprep.subr.mxu0 %v5499_v9 }
 0x27c   : > { %2948 = vmatpush2.msra.mxu1 %v5341_v19  ;;  %2977 = vmatpush1.msra.mxu0 %v1958_v36 }
 0x27d   : > { %2949 = vmatprep.subr.mxu1 %v2052_v14  ;;  %2978 = vmatprep.subr.mxu0 %v5509_v45  ;;  %v1946_v51 = vpop.permute.xlu1 %1945 }
 0x27e   : > { %v5515_v32 = vpop.permute.xlu0 %2453  ;;  %2950 = vmatpush2.msra.mxu1 %v5352_v11  ;;  %2979 = vmatpush1.msra.mxu0 %v1864_v15 }
 0x27f   : > { %2951 = vmatprep.subr.mxu1 %v1958_v36  ;;  %2980 = vmatprep.subr.mxu0 %v5439_v22 }
 0x280   : > { %2952 = vmatpush2.msra.mxu1 %v5362_v33  ;;  %2981 = vmatpush1.msra.mxu0 %v2561_v12 }
 0x281   : > { %2953 = vmatprep.subr.mxu1 %v1864_v15  ;;  %2982 = vmatprep.subr.mxu0 %v5452_v55  ;;  %v2362_v24 = vpop.permute.xlu1 %2361 }
 0x282   : > { %v5521_v49 = vpop.permute.xlu0 %2551  ;;  %2954 = vmatpush2.msra.mxu1 %v5375_v62  ;;  %2983 = vmatpush1.msra.mxu0 %v2467_v44 }
 0x283   : > { %2955 = vmatprep.subr.mxu1 %v2561_v12  ;;  %2984 = vmatprep.subr.mxu0 %v5420_v28 }
 0x284   : > { %2956 = vmatpush2.msra.mxu1 %v5391_v37  ;;  %2985 = vmatpush1.msra.mxu0 %v5314_v26  ;;  %v5540_v26 = vsel %vm859_vm1, %v2362_v24, %v5432_v7  ;;  %v2376_v37 = vsel %vm859_vm1, %v5411_v1, %v2362_v24  ;;  %v2148_v1 = vsel %vm629_vm3, %v5380_v10, %v2134_v2 }
 0x285   : > { %2957 = vmatprep.subr.mxu1 %v2467_v44  ;;  %2986 = vmatprep.subr.mxu0 %v2280_v8  ;;  %v5532_v5 = vpop.permute.xlu1 %2041 }
 0x286   : > { %v2268_v34 = vpop.permute.xlu0 %2267  ;;  %2958 = vmatpush2.msra.mxu1 %v5400_v17  ;;  %2987 = vmatpush1.msra.mxu0 %v5326_v48 }
 0x287   : > { %2960 = vmatmul.mubr.f32.vlgmr.msra.gmra.mxu1 %v5530_v61  ;;  %2988 = vmatprep.subr.mxu0 %v5049_v52  ;;  %v5548_v48 = vsel %vm764_vm2, %v2268_v34, %v5467_v13  ;;  %v2282_v52 = vsel %vm764_vm2, %v5445_v20, %v2268_v34  ;;  %v1960_v20 = vsel %vm439_vm5, %v5402_v40, %v1946_v51 }
 0x288   : > { %3037 = vmatprep.subr.mxu1 %v5540_v26  ;;  %2989 = vmatpush1.msra.mxu0 %v5087_v0 }
 0x289   : > { %3038 = vmatpush1.msra.mxu1 %v2376_v37  ;;  %2990 = vmatprep.subr.mxu0 %v2146_v18  ;;  %v5550_v17 = vpop.permute.xlu1 %2043  ;;  %v2563_v18 = vsel %vm1049_vm7, %v5383_v60, %v5493_v58 }
 0x28a   : > { %v5554_v28 = vpop.permute.xlu0 %2135  ;;  %3039 = vmatprep.subr.mxu1 %v5548_v48  ;;  %2991 = vmatpush1.msra.mxu0 %v5341_v19  ;;  %v5576_v19 = vsel %vm534_vm4, %v5447_v38, %v5532_v5 }
 0x28b   : > { %3040 = vmatpush1.msra.mxu1 %v2282_v52  ;;  %2992 = vmatprep.subr.mxu0 %v2052_v14  ;;  %v5563_v0 = vsel %vm629_vm3, %v2134_v2, %v5554_v28  ;;  %v2469_v2 = vsel %vm954_vm8, %v5405_v16, %v5515_v32 }
 0x28c   : > { %3041 = vmatprep.subr.mxu1 %v5182_v57  ;;  %2993 = vmatpush1.msra.mxu0 %v5352_v11  ;;  %v2054_v11 = vsel %vm534_vm4, %v5426_v23, %v5447_v38  ;;  %v1866_v23 = vsel %vm344_vm6, %v5430_v27, %v5469_v21 }
 0x28d   : > { %3042 = vmatpush1.msra.mxu1 %v5131_v31  ;;  %2994 = vmatprep.subr.mxu0 %v1958_v36  ;;  %v5565_v34 = vpop.permute.xlu1 %1855 }
 0x28e   : > { %v5569_v12 = vpop.permute.xlu0 %1947  ;;  %3043 = vmatprep.subr.mxu1 %v5563_v0  ;;  %2995 = vmatpush1.msra.mxu0 %v5362_v33 }
 0x28f   : > { %3044 = vmatpush1.msra.mxu1 %v2148_v1  ;;  %2996 = vmatprep.subr.mxu0 %v1864_v15  ;;  %v5585_v10 = vsel %vm439_vm5, %v1946_v51, %v5569_v12 }
 0x290   : > { %3045 = vmatprep.subr.mxu1 %v5576_v19  ;;  %2997 = vmatpush1.msra.mxu0 %v5375_v62 }
 0x291   : > { %3046 = vmatpush1.msra.mxu1 %v2054_v11  ;;  %v5587_v33 = vpop.permute.xlu1 %1853  ;;  %3898 = vmatprep.mubr.msk.f32.mxu1 %vm1381_vm0, %v5166_v59 }
 0x292   : > { %v5593_v44 = vpop.permute.xlu0 %2457  ;;  %3047 = vmatprep.subr.mxu1 %v5585_v10  ;;  %v5599_v62 = vsel %vm344_vm6, %v5469_v21, %v5587_v33 }
 0x293   : > { %3048 = vmatpush1.msra.mxu1 %v1960_v20 }
 0x294   : > { %3049 = vmatprep.subr.mxu1 %v5599_v62 }
 0x295   : > { %3050 = vmatpush1.msra.mxu1 %v1866_v23  ;;  %v2550_v38 = vpop.permute.xlu1 %2549 }
 0x296   : > { %v5605_v8 = vpop.permute.xlu0 %2137  ;;  %v5609_v40 = vsel %vm1049_vm7, %v5493_v58, %v2550_v38 }
 0x297   : > { %3008 = vmatprep.subr.mxu0 %v5609_v40  ;;  %3051 = vmatprep.subr.mxu1 %v5609_v40 }
 0x298   : > { %3009 = vmatpush2.msra.mxu0 %v2563_v18  ;;  %3052 = vmatpush1.msra.mxu1 %v2563_v18 }
 0x299   : > { %v2456_v27 = vpop.permute.xlu1 %2455 }
 0x29a   : > { %v5616_v21 = vpop.permute.xlu0 %1949  ;;  %v5620_v14 = vsel %vm954_vm8, %v5515_v32, %v2456_v27 }
 0x29b   : > { %3010 = vmatprep.subr.mxu0 %v5620_v14  ;;  %3053 = vmatprep.subr.mxu1 %v5620_v14 }
 0x29c   : > { %3011 = vmatpush2.msra.mxu0 %v2469_v2  ;;  %3054 = vmatpush1.msra.mxu1 %v2469_v2 }
 0x29d   : > { %3012 = vmatprep.subr.mxu0 %v2376_v37  ;;  %3055 = vmatprep.subr.mxu1 %v2376_v37  ;;  %v5627_v60 = vpop.permute.xlu1 %2277 }
 0x29e   : > { %v5629_v58 = vpop.permute.xlu0 %2371  ;;  %3013 = vmatpush2.msra.mxu0 %v5416_v53  ;;  %3056 = vmatpush1.msra.mxu1 %v5416_v53 }
 0x29f   : > { %3014 = vmatprep.subr.mxu0 %v2282_v52  ;;  %3057 = vmatprep.subr.mxu1 %v2282_v52  ;;  %v5719_v52 = vsel %vm534_vm4, %v5532_v5, %v5550_v17 }
 0x2a0   : > { %3015 = vmatpush2.msra.mxu0 %v5456_v63  ;;  %3058 = vmatpush1.msra.mxu1 %v5456_v63 }
 0x2a1   : > { %3016 = vmatprep.subr.mxu0 %v5131_v31  ;;  %3059 = vmatprep.subr.mxu1 %v5131_v31  ;;  %v5637_v16 = vpop.permute.xlu1 %2553 }
 0x2a2   : > { %v2366_v36 = vpop.permute.xlu0 %2365  ;;  %3017 = vmatpush2.msra.mxu0 %v5111_v42  ;;  %3060 = vmatpush1.msra.mxu1 %v5111_v42 }
 0x2a3   : > { %3018 = vmatprep.subr.mxu0 %v2148_v1  ;;  %3061 = vmatprep.subr.mxu1 %v2148_v1 }
 0x2a4   : > { %3019 = vmatpush2.msra.mxu0 %v5476_v30  ;;  %3062 = vmatpush1.msra.mxu1 %v5476_v30  ;;  %v5658_v30 = vsel %vm1049_vm7, %v5521_v49, %v5637_v16 }
 0x2a5   : > { %3020 = vmatprep.subr.mxu0 %v2054_v11  ;;  %3063 = vmatprep.subr.mxu1 %v2054_v11  ;;  %v5643_v53 = vpop.permute.xlu1 %2459 }
 0x2a6   : > { %v5645_v63 = vpop.permute.xlu0 %2139  ;;  %3021 = vmatpush2.msra.mxu0 %v5486_v56  ;;  %3064 = vmatpush1.msra.mxu1 %v5486_v56  ;;  %v5662_v56 = vsel %vm1049_vm7, %v2550_v38, %v5521_v49 }
 0x2a7   : > { %3022 = vmatprep.subr.mxu0 %v1960_v20  ;;  %3065 = vmatprep.subr.mxu1 %v1960_v20  ;;  %v5740_v20 = vsel %vm344_vm6, %v5587_v33, %v5565_v34 }
 0x2a8   : > { %3023 = vmatpush2.msra.mxu0 %v5499_v9  ;;  %3066 = vmatpush1.msra.mxu1 %v5499_v9  ;;  %v5670_v9 = vsel %vm954_vm8, %v5593_v44, %v5643_v53 }
 0x2a9   : > { %3024 = vmatprep.subr.mxu0 %v1866_v23  ;;  %3067 = vmatprep.subr.mxu1 %v1866_v23  ;;  %v2272_v42 = vpop.permute.xlu1 %2271 }
 0x2aa   : > { %v5651_v31 = vpop.permute.xlu0 %1951  ;;  %3025 = vmatpush2.msra.mxu0 %v5509_v45  ;;  %3068 = vmatpush1.msra.mxu1 %v5509_v45  ;;  %v5674_v45 = vsel %vm954_vm8, %v2456_v27, %v5593_v44 }
 0x2ab   : > { %3026 = vmatprep.subr.mxu0 %v2563_v18  ;;  %3079 = vmatprep.subr.mxu1 %v5658_v30  ;;  %v5763_v38 = vsel %vm439_vm5, %v5616_v21, %v5651_v31 }
 0x2ac   : > { %3027 = vmatpush2.msra.mxu0 %v5439_v22  ;;  %3080 = vmatpush2.msra.mxu1 %v5662_v56  ;;  %v5683_v22 = vsel %vm859_vm1, %v5432_v7, %v2366_v36 }
 0x2ad   : > { %3028 = vmatprep.subr.mxu0 %v2469_v2  ;;  %3081 = vmatprep.subr.mxu1 %v5670_v9  ;;  %v5677_v15 = vpop.permute.xlu1 %2045 }
 0x2ae   : > { %v2368_v51 = vpop.permute.xlu0 %2367  ;;  %3029 = vmatpush2.msra.mxu0 %v5452_v55  ;;  %3082 = vmatpush2.msra.mxu1 %v5674_v45  ;;  %v5694_v55 = vsel %vm764_vm2, %v5467_v13, %v2272_v42  ;;  %v5710_v13 = vsel %vm629_vm3, %v5554_v28, %v5605_v8  ;;  %v5731_v28 = vsel %vm439_vm5, %v5569_v12, %v5616_v21 }
 0x2af   : > { %3031 = vmatmul.mubr.f32.vlgmr.msra.gmra.mxu0 %v5530_v61  ;;  %3083 = vmatprep.subr.mxu1 %v5683_v22  ;;  %v5688_v32 = vsel %vm859_vm1, %v2366_v36, %v2368_v51  ;;  %v5745_v12 = vsel %vm629_vm3, %v5605_v8, %v5645_v63  ;;  %v5754_v44 = vsel %vm534_vm4, %v5550_v17, %v5677_v15 }
 0x2b0   : > { %3108 = vmatprep.subr.mxu0 %v5688_v32  ;;  %3084 = vmatpush2.msra.mxu1 %v5540_v26 }
 0x2b1   : > { %3109 = vmatpush1.msra.mxu0 %v5683_v22  ;;  %3085 = vmatprep.subr.mxu1 %v5694_v55  ;;  %v5698_v7 = vpop.permute.xlu1 %1857 }
 0x2b2   : > { %v5700_v24 = vpop.permute.xlu0 %2047  ;;  %3086 = vmatpush2.msra.mxu1 %v5548_v48  ;;  %3899 = vmatprep.mubr.msk.f32.mxu0 %vm1381_vm0, %v5166_v59  ;;  %v5772_v17 = vsel %vm344_vm6, %v5565_v34, %v5698_v7 }
 0x2b3   : > { %3087 = vmatprep.subr.mxu1 %v5145_v50  ;;  %v2058_v36 = vsel %vm534_vm4, %v5677_v15, %v5700_v24 }
 0x2b4   : > { %3088 = vmatpush2.msra.mxu1 %v5182_v57 }
 0x2b5   : > { %3089 = vmatprep.subr.mxu1 %v5710_v13  ;;  %v2274_v49 = vpop.permute.xlu1 %2273 }
 0x2b6   : > { %v5713_v37 = vpop.permute.xlu0 %1859  ;;  %3090 = vmatpush2.msra.mxu1 %v5563_v0  ;;  %v5722_v1 = vsel %vm764_vm2, %v2272_v42, %v2274_v49 }
 0x2b7   : > { %3091 = vmatprep.subr.mxu1 %v5719_v52  ;;  %3110 = vmatprep.subr.mxu0 %v5722_v1 }
 0x2b8   : > { %3092 = vmatpush2.msra.mxu1 %v5576_v19  ;;  %3111 = vmatpush1.msra.mxu0 %v5694_v55 }
 0x2b9   : > { %3093 = vmatprep.subr.mxu1 %v5731_v28  ;;  %3112 = vmatprep.subr.mxu0 %v5230_v29  ;;  %v2142_v5 = vpop.permute.xlu1 %2141 }
 0x2ba   : > { %v2276_v11 = vpop.permute.xlu0 %2275  ;;  %3094 = vmatpush2.msra.mxu1 %v5585_v10  ;;  %3113 = vmatpush1.msra.mxu0 %v5145_v50  ;;  %v2152_v2 = vsel %vm629_vm3, %v5645_v63, %v2142_v5 }
 0x2bb   : > { %3095 = vmatprep.subr.mxu1 %v5740_v20  ;;  %3114 = vmatprep.subr.mxu0 %v5745_v12  ;;  %v5792_v27 = vsel %vm764_vm2, %v2276_v11, %v5627_v60  ;;  %v2286_v21 = vsel %vm764_vm2, %v2274_v49, %v2276_v11 }
 0x2bc   : > { %3096 = vmatpush2.msra.mxu1 %v5599_v62  ;;  %3115 = vmatpush1.msra.mxu0 %v5710_v13 }
 0x2bd   : > { %3097 = vmatprep.subr.mxu1 %v5662_v56  ;;  %3116 = vmatprep.subr.mxu0 %v5754_v44  ;;  %v1954_v33 = vpop.permute.xlu1 %1953 }
 0x2be   : > { %v2144_v23 = vpop.permute.xlu0 %2143  ;;  %3098 = vmatpush2.msra.mxu1 %v5609_v40  ;;  %3117 = vmatpush1.msra.mxu0 %v5719_v52 }
 0x2bf   : > { %3099 = vmatprep.subr.mxu1 %v5674_v45  ;;  %3118 = vmatprep.subr.mxu0 %v5763_v38 }
 0x2c0   : > { %3100 = vmatpush2.msra.mxu1 %v5620_v14  ;;  %3119 = vmatpush1.msra.mxu0 %v5731_v28  ;;  %v5803_v14 = vsel %vm629_vm3, %v2142_v5, %v2144_v23 }
 0x2c1   : > { %3102 = vmatmul.mubr.f32.vlgmr.msra.gmra.mxu1 %v5530_v61  ;;  %3120 = vmatprep.subr.mxu0 %v5772_v17  ;;  %v2370_v8 = vpop.permute.xlu1 %2369 }
 0x2c2   : > { %v5777_v40 = vsel %vm859_vm1, %v2368_v51, %v2370_v8  ;;  %3121 = vmatpush1.msra.mxu0 %v5740_v20  ;;  %v5782_v18 = vsel %vm859_vm1, %v2370_v8, %v5629_v58  ;;  %3900 = vmatprep.mubr.msk.f32.mxu1 %vm1381_vm0, %v5166_v59  ;;  %v1956_v34 = vpop.permute.xlu0 %1955 }
 0x2c3   : > { %3122 = vmatprep.subr.mxu0 %v5658_v30  ;;  %3179 = vmatprep.subr.mxu1 %v5782_v18  ;;  %v5821_v63 = vsel %vm439_vm5, %v1954_v33, %v1956_v34 }
 0x2c4   : > { %3123 = vmatpush1.msra.mxu0 %v5662_v56  ;;  %3180 = vmatpush1.msra.mxu1 %v5777_v40 }
 0x2c5   : > { %3124 = vmatprep.subr.mxu0 %v5670_v9  ;;  %3181 = vmatprep.subr.mxu1 %v5792_v27  ;;  %v2050_v59 = vpop.permute.xlu1 %2049 }
 0x2c6   : > { %3125 = vmatpush1.msra.mxu0 %v5674_v45  ;;  %3182 = vmatpush1.msra.mxu1 %v2286_v21  ;;  %v2556_v58 = vpop.permute.xlu0 %2555 }
 0x2c7   : > { %3126 = vmatprep.subr.mxu0 %v5683_v22  ;;  %3183 = vmatprep.subr.mxu1 %v5295_v41 }
 0x2c8   : > { %3127 = vmatpush1.msra.mxu0 %v5540_v26  ;;  %3184 = vmatpush1.msra.mxu1 %v5263_v35  ;;  %v5812_v26 = vsel %vm534_vm4, %v5700_v24, %v2050_v59 }
 0x2c9   : > { %3128 = vmatprep.subr.mxu0 %v5694_v55  ;;  %3185 = vmatprep.subr.mxu1 %v5803_v14  ;;  %v1862_v60 = vpop.permute.xlu1 %1861 }
 0x2ca   : > { %3129 = vmatpush1.msra.mxu0 %v5548_v48  ;;  %3186 = vmatpush1.msra.mxu1 %v2152_v2  ;;  %v1964_v48 = vsel %vm439_vm5, %v5651_v31, %v1954_v33  ;;  %v2462_v31 = vpop.permute.xlu0 %2461 }
 0x2cb   : > { %3130 = vmatprep.subr.mxu0 %v5145_v50  ;;  %3187 = vmatprep.subr.mxu1 %v5812_v26  ;;  %v5830_v50 = vsel %vm344_vm6, %v5713_v37, %v1862_v60 }
 0x2cc   : > { %3131 = vmatpush1.msra.mxu0 %v5182_v57  ;;  %3188 = vmatpush1.msra.mxu1 %v2058_v36  ;;  %v1870_v57 = vsel %vm344_vm6, %v5698_v7, %v5713_v37 }
 0x2cd   : > { %3132 = vmatprep.subr.mxu0 %v5710_v13  ;;  %3189 = vmatprep.subr.mxu1 %v5821_v63  ;;  %v2558_v42 = vpop.permute.xlu1 %2557 }
 0x2ce   : > { %3133 = vmatpush1.msra.mxu0 %v5563_v0  ;;  %3190 = vmatpush1.msra.mxu1 %v1964_v48  ;;  %v5839_v56 = vsel %vm1049_vm7, %v2556_v58, %v2558_v42  ;;  %v2567_v0 = vsel %vm1049_vm7, %v5637_v16, %v2556_v58 }
 0x2cf   : > { %3134 = vmatprep.subr.mxu0 %v5719_v52  ;;  %3191 = vmatprep.subr.mxu1 %v5830_v50 }
 0x2d0   : > { %3135 = vmatpush1.msra.mxu0 %v5576_v19  ;;  %3192 = vmatpush1.msra.mxu1 %v1870_v57  ;;  %v2473_v19 = vsel %vm954_vm8, %v5643_v53, %v2462_v31 }
 0x2d1   : > { %3136 = vmatprep.subr.mxu0 %v5731_v28  ;;  %3193 = vmatprep.subr.mxu1 %v5839_v56  ;;  %v2464_v45 = vpop.permute.xlu1 %2463 }
 0x2d2   : > { %3137 = vmatpush1.msra.mxu0 %v5585_v10  ;;  %3194 = vmatpush1.msra.mxu1 %v2567_v0  ;;  %v5847_v15 = vsel %vm954_vm8, %v2462_v31, %v2464_v45  ;;  %v2560_v10 = vpop.permute.xlu0 %2559  ;;  %v4186_v31 = vmov 1.0  }
 0x2d3   : > { %3138 = vmatprep.subr.mxu0 %v5740_v20  ;;  %3195 = vmatprep.subr.mxu1 %v5847_v15 }
 0x2d4   : > { %3139 = vmatpush1.msra.mxu0 %v5599_v62  ;;  %3196 = vmatpush1.msra.mxu1 %v2473_v19 }
 0x2d5   : > { %3150 = vmatprep.subr.mxu0 %v5839_v56  ;;  %3197 = vmatprep.subr.mxu1 %v5777_v40  ;;  %v2466_v62 = vpop.permute.xlu1 %2465 }
 0x2d6   : > { %3151 = vmatpush2.msra.mxu0 %v2567_v0  ;;  %3198 = vmatpush1.msra.mxu1 %v5688_v32  ;;  %v2475_v16 = vsel %vm954_vm8, %v2464_v45, %v2466_v62 }
 0x2d7   : > { %3152 = vmatprep.subr.mxu0 %v5847_v15  ;;  %3199 = vmatprep.subr.mxu1 %v2286_v21 }
 0x2d8   : > { %3153 = vmatpush2.msra.mxu0 %v2473_v19  ;;  %3200 = vmatpush1.msra.mxu1 %v5722_v1 }
 0x2d9   : > { %3154 = vmatprep.subr.mxu0 %v5777_v40  ;;  %3201 = vmatprep.subr.mxu1 %v5263_v35 }
 0x2da   : > { %3155 = vmatpush2.msra.mxu0 %v5688_v32  ;;  %3202 = vmatpush1.msra.mxu1 %v5230_v29 }
 0x2db   : > { %3156 = vmatprep.subr.mxu0 %v2286_v21  ;;  %3203 = vmatprep.subr.mxu1 %v2152_v2 }
 0x2dc   : > { %3157 = vmatpush2.msra.mxu0 %v5722_v1  ;;  %3204 = vmatpush1.msra.mxu1 %v5745_v12 }
 0x2dd   : > { %3158 = vmatprep.subr.mxu0 %v5263_v35  ;;  %3205 = vmatprep.subr.mxu1 %v2058_v36  ;;  %v2569_v35 = vsel %vm1049_vm7, %v2558_v42, %v2560_v10 }
 0x2de   : > { %3159 = vmatpush2.msra.mxu0 %v5230_v29  ;;  %3206 = vmatpush1.msra.mxu1 %v5754_v44  ;;  %v6235_v29 = vmov 0.0  }
 0x2df   : > { %3160 = vmatprep.subr.mxu0 %v2152_v2  ;;  %3207 = vmatprep.subr.mxu1 %v1964_v48 }
 0x2e0   : > { %3161 = vmatpush2.msra.mxu0 %v5745_v12  ;;  %3208 = vmatpush1.msra.mxu1 %v5763_v38 }
 0x2e1   : > { %3162 = vmatprep.subr.mxu0 %v2058_v36  ;;  %3209 = vmatprep.subr.mxu1 %v1870_v57 }
 0x2e2   : > { %3163 = vmatpush2.msra.mxu0 %v5754_v44  ;;  %3210 = vmatpush1.msra.mxu1 %v5772_v17 }
 0x2e3   : > { %3164 = vmatprep.subr.mxu0 %v1964_v48  ;;  %3221 = vmatprep.subr.mxu1 %v6235_v29 }
 0x2e4   : > { %3165 = vmatpush2.msra.mxu0 %v5763_v38  ;;  %3222 = vmatpush2.msra.mxu1 %v2569_v35 }
 0x2e5   : > { %3166 = vmatprep.subr.mxu0 %v1870_v57  ;;  %3223 = vmatprep.subr.mxu1 %v6235_v29 }
 0x2e6   : > { %3167 = vmatpush2.msra.mxu0 %v5772_v17  ;;  %3224 = vmatpush2.msra.mxu1 %v2475_v16 }
 0x2e7   : > { %3168 = vmatprep.subr.mxu0 %v2567_v0  ;;  %3225 = vmatprep.subr.mxu1 %v6235_v29 }
 0x2e8   : > { %3169 = vmatpush2.msra.mxu0 %v5658_v30  ;;  %3226 = vmatpush2.msra.mxu1 %v5782_v18 }
 0x2e9   : > { %3170 = vmatprep.subr.mxu0 %v2473_v19  ;;  %3227 = vmatprep.subr.mxu1 %v6235_v29 }
 0x2ea   : > { %3171 = vmatpush2.msra.mxu0 %v5670_v9  ;;  %3228 = vmatpush2.msra.mxu1 %v5792_v27  ;;  %v2890_v9 = vpop.permute.xlu0 %2889 }
 0x2eb   : > { %3173 = vmatmul.mubr.f32.vlgmr.msra.gmra.mxu0 %v5530_v61  ;;  %3229 = vmatprep.subr.mxu1 %v6235_v29 }
 0x2ec   : > { %3230 = vmatpush2.msra.mxu1 %v5295_v41 }
 0x2ed   : > { %3231 = vmatprep.subr.mxu1 %v6235_v29 }
 0x2ee   : > { %3232 = vmatpush2.msra.mxu1 %v5803_v14 }
 0x2ef   : > { %3233 = vmatprep.subr.mxu1 %v6235_v29 }
 0x2f0   : > { %3234 = vmatpush2.msra.mxu1 %v5812_v26 }
 0x2f1   : > { %3235 = vmatprep.subr.mxu1 %v6235_v29 }
 0x2f2   : > { %3236 = vmatpush2.msra.mxu1 %v5821_v63 }
 0x2f3   : > { %3237 = vmatprep.subr.mxu1 %v6235_v29 }
 0x2f4   : > { %3238 = vmatpush2.msra.mxu1 %v5830_v50 }
 0x2f5   : > { %3239 = vmatprep.subr.mxu1 %v2569_v35 }
 0x2f6   : > { %3240 = vmatpush2.msra.mxu1 %v5839_v56 }
 0x2f7   : > { %3241 = vmatprep.subr.mxu1 %v2475_v16 }
 0x2f8   : > { %3242 = vmatpush2.msra.mxu1 %v5847_v15 }
 0x2f9   : > { %3244 = vmatmul.mubr.f32.vlgmr.msra.gmra.mxu1 %v5530_v61 }
 0x347   : > { %v2961_v41 = vpop.f32.mrf.mxu1 }
 0x349   : > { %v2963_v22 = vpop.f32.mrf.mxu1 }
 0x34a   : > { %v2964_v23 = vadd.f32 %v2963_v22, %v2890_v9 }
 0x34c   : > { %v3251_v18 = vmax.f32 %v2964_v23, 0.0 }
 0x34e   : > { %v5926_v2 = vmul.f32 %v3251_v18, %v5080_v54  ;;  %v5942_v54 = vld [vmem:[%s6228_s6] ss:$0 sm:$0xff] }
 0x36f   : > { %v3032_v53 = vpop.f32.mrf.mxu0 }
 0x370   : > { %v3033_v44 = vadd.f32 %v3032_v53, %v2890_v9 }
 0x371   : > { %v3034_v30 = vpop.f32.mrf.mxu0 }
 0x372   : > { %v3035_v51 = vadd.f32 %v3034_v30, %v2890_v9  ;;  %v3252_v38 = vmax.f32 %v3033_v44, 0.0 }
 0x374   : > { %v3253_v55 = vmax.f32 %v3035_v51, 0.0 }
 0x376   : > { %v5899_v13 = vmul.f32 %v3253_v55, %v5104_v3 }
 0x381   : > { %v3103_v32 = vpop.f32.mrf.mxu1 }
 0x382   : > { %v3104_v7 = vadd.f32 %v3103_v32, %v2890_v9 }
 0x383   : > { %v3105_v61 = vpop.f32.mrf.mxu1 }
 0x384   : > { %v3254_v24 = vmax.f32 %v3104_v7, 0.0  ;;  %v3106_v52 = vadd.f32 %v3105_v61, %v2890_v9 }
 0x386   : > { %v5902_v49 = vmul.f32 %v3254_v24, %v5124_v43  ;;  %v3255_v28 = vmax.f32 %v3106_v52, 0.0 }
 0x388   : > { %v4123_v37 = vpack.i.bf16 %v5902_v49, %v5899_v13  ;;  %v5908_v20 = vmul.f32 %v3255_v28, %v5173_v46 }
 0x38a   : > { %4124 = vrot.lane.b32.xlu1 %v4123_v37, %s4177_s8 }
 0x3ab   : > { %v3174_v1 = vpop.f32.mrf.mxu0 }
 0x3ac   : > { %v3175_v5 = vadd.f32 %v3174_v1, %v2890_v9 }
 0x3ad   : > { %v3176_v12 = vpop.f32.mrf.mxu0 }
 0x3ae   : > { %v3256_v11 = vmax.f32 %v3175_v5, 0.0  ;;  %v3177_v33 = vadd.f32 %v3176_v12, %v2890_v9 }
 0x3b0   : > { %v5911_v3 = vmul.f32 %v3256_v11, %v5140_v6  ;;  %v3257_v8 = vmax.f32 %v3177_v33, 0.0  ;;  %v5917_v6 = vmul.f32 %v3252_v38, %v5046_v47 }
 0x3b2   : > { %v4128_v43 = vpack.i.bf16 %v5911_v3, %v5908_v20  ;;  %v5920_v21 = vmul.f32 %v3257_v8, %v5223_v25  ;;  %v4143_v47 = vpack.i.bf16 %v5917_v6, %v5926_v2 }
 0x3b4   : > { %4129 = vrot.lane.b32.xlu0 %v4128_v43, %s4177_s8 }
 0x3b9   : > { %v3245_v17 = vpop.f32.mrf.mxu1 }
 0x3ba   : > { %v3246_v40 = vadd.f32 %v3245_v17, %v2890_v9 }
 0x3bb   : > { %v3247_v34 = vpop.f32.mrf.mxu1 }
 0x3bc   : > { %v3258_v46 = vmax.f32 %v3246_v40, 0.0  ;;  %v3248_v27 = vadd.f32 %v3247_v34, %v2890_v9 }
 0x3be   : > { %v5923_v59 = vmul.f32 %v3258_v46, %v5252_v39  ;;  %v3259_v14 = vmax.f32 %v3248_v27, 0.0  ;;  %v6236_v39 = vld [vmem:[#allocation4_spill] sm:$0xff] }
 0x3bf   : > { %v3460_v26 = vadd.s32 248, %v6236_v39  ;;  %v3492_v36 = vadd.s32 504, %v6236_v39  ;;  %v3476_v63 = vadd.s32 376, %v6236_v39  ;;  %v3459_v48 = vadd.s32 240, %v6236_v39 }
 0x3c0   : > { %v4133_v60 = vpack.i.bf16 %v5923_v59, %v5920_v21  ;;  %v5931_v58 = vmul.f32 %v3259_v14, %v5284_v4  ;;  %v3444_v4 = vadd.s32 120, %v6236_v39  ;;  %v3491_v42 = vadd.s32 496, %v6236_v39 }
 0x3c1   : > { %vm3529_vm9 = vcmp.eq.s32.totalorder %v3460_v26, %v5942_v54  ;;  %vm3561_vm10 = vcmp.eq.s32.totalorder %v3492_v36, %v5942_v54  ;;  %v3443_v50 = vadd.s32 112, %v6236_v39  ;;  %v3475_v57 = vadd.s32 368, %v6236_v39 }
 0x3c2   : > { %v4138_v25 = vpack.i.bf16 %v6235_v29, %v5931_v58  ;;  %4134 = vrot.lane.b32.xlu1 %v4133_v60, %s4177_s8  ;;  %4032 = vmatprep.subr.msk.mxu0 %vm3529_vm9, %v4186_v31  ;;  %vm3513_vm11 = vcmp.eq.s32.totalorder %v3444_v4, %v5942_v54  ;;  %vm3545_vm12 = vcmp.eq.s32.totalorder %v3476_v63, %v5942_v54  ;;  %v3458_v56 = vadd.s32 232, %v6236_v39 }
 0x3c3   : > { %4067 = vmatprep.subr.msk.mxu1 %vm3561_vm10, %v4186_v31  ;;  %vm3528_vm13 = vcmp.eq.s32.totalorder %v3459_v48, %v5942_v54  ;;  %4033 = vmatpush3.msk.msra.mxu0 %vm3513_vm11, %v4186_v31  ;;  %vm3560_vm14 = vcmp.eq.s32.totalorder %v3491_v42, %v5942_v54  ;;  %vm3512_vm15 = vcmp.eq.s32.totalorder %v3443_v50, %v5942_v54  ;;  %v3490_v0 = vadd.s32 488, %v6236_v39 }
 0x3c4   : > { %4139 = vrot.lane.b32.xlu0 %v4138_v25, %s4177_s8  ;;  %vm3544_vm0 = vcmp.eq.s32.totalorder %v3475_v57, %v5942_v54  ;;  %4068 = vmatpush3.msk.msra.mxu1 %vm3545_vm12, %v4186_v31  ;;  %vm3527_vm1 = vcmp.eq.s32.totalorder %v3458_v56, %v5942_v54  ;;  %v3442_v45 = vadd.s32 104, %v6236_v39  ;;  %v3474_v15 = vadd.s32 360, %v6236_v39 }
 0x3c5   : > { %4034 = vmatprep.subr.msk.mxu0 %vm3528_vm13, %v4186_v31  ;;  %v3457_v19 = vadd.s32 224, %v6236_v39  ;;  %4069 = vmatprep.subr.msk.mxu1 %vm3560_vm14, %v4186_v31  ;;  %vm3559_vm3 = vcmp.eq.s32.totalorder %v3490_v0, %v5942_v54  ;;  %v3489_v10 = vadd.s32 480, %v6236_v39  ;;  %v3441_v16 = vadd.s32 96, %v6236_v39 }
 0x3c6   : > { %4144 = vrot.lane.b32.xlu1 %v4143_v47, %s4177_s8  ;;  %4035 = vmatpush3.msk.msra.mxu0 %vm3512_vm15, %v4186_v31  ;;  %vm3511_vm4 = vcmp.eq.s32.totalorder %v3442_v45, %v5942_v54  ;;  %vm3543_vm5 = vcmp.eq.s32.totalorder %v3474_v15, %v5942_v54  ;;  %v3473_v41 = vadd.s32 352, %v6236_v39  ;;  %v3456_v30 = vadd.s32 216, %v6236_v39  ;;  %s3890_s8 = sshll.u32 %s6238_s25, 3 }
 0x3c7   : > { %4070 = vmatpush3.msk.msra.mxu1 %vm3544_vm0, %v4186_v31  ;;  %4036 = vmatprep.subr.msk.mxu0 %vm3527_vm1, %v4186_v31  ;;  %vm3526_vm6 = vcmp.eq.s32.totalorder %v3457_v19, %v5942_v54  ;;  %vm3558_vm7 = vcmp.eq.s32.totalorder %v3489_v10, %v5942_v54  ;;  %v3488_v9 = vadd.s32 472, %v6236_v39  ;;  %vm3510_vm9 = vcmp.eq.s32.totalorder %v3441_v16, %v5942_v54  ;;  %s276_s15 = scalar_lea.vmem %s6229_s7, %s3890_s8 }
 0x3c8   : > { %4071 = vmatprep.subr.msk.mxu1 %vm3559_vm3, %v4186_v31  ;;  %4037 = vmatpush3.msk.msra.mxu0 %vm3511_vm4, %v4186_v31  ;;  %vm3542_vm10 = vcmp.eq.s32.totalorder %v3473_v41, %v5942_v54  ;;  %v3440_v51 = vadd.s32 88, %v6236_v39  ;;  %v3472_v22 = vadd.s32 344, %v6236_v39  ;;  %vm3525_vm11 = vcmp.eq.s32.totalorder %v3456_v30, %v5942_v54 }
 0x3c9   : > { %4072 = vmatpush3.msk.msra.mxu1 %vm3543_vm5, %v4186_v31  ;;  %4038 = vmatprep.subr.msk.mxu0 %vm3526_vm6, %v4186_v31  ;;  %vm3557_vm12 = vcmp.eq.s32.totalorder %v3488_v9, %v5942_v54  ;;  %v3455_v32 = vadd.s32 208, %v6236_v39  ;;  %v3487_v55 = vadd.s32 464, %v6236_v39  ;;  %v3439_v7 = vadd.s32 80, %v6236_v39 }
 0x3ca   : > { %4073 = vmatprep.subr.msk.mxu1 %vm3558_vm7, %v4186_v31  ;;  %4039 = vmatpush3.msk.msra.mxu0 %vm3510_vm9, %v4186_v31  ;;  %vm3509_vm13 = vcmp.eq.s32.totalorder %v3440_v51, %v5942_v54  ;;  %vm3541_vm14 = vcmp.eq.s32.totalorder %v3472_v22, %v5942_v54  ;;  %v3471_v24 = vadd.s32 336, %v6236_v39  ;;  %v3454_v37 = vadd.s32 200, %v6236_v39 }
 0x3cb   : > { %4074 = vmatpush3.msk.msra.mxu1 %vm3542_vm10, %v4186_v31  ;;  %4040 = vmatprep.subr.msk.mxu0 %vm3525_vm11, %v4186_v31  ;;  %vm3524_vm15 = vcmp.eq.s32.totalorder %v3455_v32, %v5942_v54  ;;  %vm3556_vm0 = vcmp.eq.s32.totalorder %v3487_v55, %v5942_v54  ;;  %v3486_v61 = vadd.s32 456, %v6236_v39  ;;  %vm3508_vm1 = vcmp.eq.s32.totalorder %v3439_v7, %v5942_v54 }
 0x3cc   : > { %4075 = vmatprep.subr.msk.mxu1 %vm3557_vm12, %v4186_v31  ;;  %4041 = vmatpush3.msk.msra.mxu0 %vm3509_vm13, %v4186_v31  ;;  %vm3540_vm3 = vcmp.eq.s32.totalorder %v3471_v24, %v5942_v54  ;;  %v3438_v1 = vadd.s32 72, %v6236_v39  ;;  %v3470_v28 = vadd.s32 328, %v6236_v39  ;;  %vm3523_vm4 = vcmp.eq.s32.totalorder %v3454_v37, %v5942_v54 }
 0x3cd   : > { %4076 = vmatpush3.msk.msra.mxu1 %vm3541_vm14, %v4186_v31  ;;  %4042 = vmatprep.subr.msk.mxu0 %vm3524_vm15, %v4186_v31  ;;  %vm3555_vm5 = vcmp.eq.s32.totalorder %v3486_v61, %v5942_v54  ;;  %v3453_v43 = vadd.s32 192, %v6236_v39  ;;  %v3485_v12 = vadd.s32 448, %v6236_v39  ;;  %v3437_v23 = vadd.s32 64, %v6236_v39 }
 0x3ce   : > { %4077 = vmatprep.subr.msk.mxu1 %vm3556_vm0, %v4186_v31  ;;  %4043 = vmatpush3.msk.msra.mxu0 %vm3508_vm1, %v4186_v31  ;;  %vm3507_vm6 = vcmp.eq.s32.totalorder %v3438_v1, %v5942_v54  ;;  %vm3539_vm7 = vcmp.eq.s32.totalorder %v3470_v28, %v5942_v54  ;;  %v3469_v38 = vadd.s32 320, %v6236_v39  ;;  %v3484_v40 = vadd.s32 440, %v6236_v39 }
 0x3cf   : > { %4078 = vmatpush3.msk.msra.mxu1 %vm3540_vm3, %v4186_v31  ;;  %4044 = vmatprep.subr.msk.mxu0 %vm3523_vm4, %v4186_v31  ;;  %vm3522_vm9 = vcmp.eq.s32.totalorder %v3453_v43, %v5942_v54  ;;  %vm3554_vm10 = vcmp.eq.s32.totalorder %v3485_v12, %v5942_v54  ;;  %vm3506_vm11 = vcmp.eq.s32.totalorder %v3437_v23, %v5942_v54  ;;  %v3436_v18 = vadd.s32 56, %v6236_v39 }
 0x3d0   : > { %4079 = vmatprep.subr.msk.mxu1 %vm3555_vm5, %v4186_v31  ;;  %4045 = vmatpush3.msk.msra.mxu0 %vm3507_vm6, %v4186_v31  ;;  %vm3538_vm12 = vcmp.eq.s32.totalorder %v3469_v38, %v5942_v54  ;;  %v3468_v34 = vadd.s32 312, %v6236_v39  ;;  %v3451_v46 = vadd.s32 176, %v6236_v39  ;;  %vm3553_vm14 = vcmp.eq.s32.totalorder %v3484_v40, %v5942_v54 }
 0x3d1   : > { %4080 = vmatpush3.msk.msra.mxu1 %vm3539_vm7, %v4186_v31  ;;  %4046 = vmatprep.subr.msk.mxu0 %vm3522_vm9, %v4186_v31  ;;  %v3483_v27 = vadd.s32 432, %v6236_v39  ;;  %v3435_v14 = vadd.s32 48, %v6236_v39  ;;  %vm3505_vm15 = vcmp.eq.s32.totalorder %v3436_v18, %v5942_v54  ;;  %v3467_v60 = vadd.s32 304, %v6236_v39 }
 0x3d2   : > { %4081 = vmatprep.subr.msk.mxu1 %vm3554_vm10, %v4186_v31  ;;  %4047 = vmatpush3.msk.msra.mxu0 %vm3506_vm11, %v4186_v31  ;;  %vm3537_vm0 = vcmp.eq.s32.totalorder %v3468_v34, %v5942_v54  ;;  %vm3520_vm1 = vcmp.eq.s32.totalorder %v3451_v46, %v5942_v54  ;;  %v3450_v47 = vadd.s32 168, %v6236_v39  ;;  %v3482_v25 = vadd.s32 424, %v6236_v39 }
 0x3d3   : > { %4082 = vmatpush3.msk.msra.mxu1 %vm3538_vm12, %v4186_v31  ;;  %vm3552_vm3 = vcmp.eq.s32.totalorder %v3483_v27, %v5942_v54  ;;  %vm3504_vm4 = vcmp.eq.s32.totalorder %v3435_v14, %v5942_v54  ;;  %vm3536_vm5 = vcmp.eq.s32.totalorder %v3467_v60, %v5942_v54  ;;  %v3434_v26 = vadd.s32 40, %v6236_v39 }
 0x3d4   : > { %4083 = vmatprep.subr.msk.mxu1 %vm3553_vm14, %v4186_v31  ;;  %v3466_v36 = vadd.s32 296, %v6236_v39  ;;  %v3449_v4 = vadd.s32 160, %v6236_v39  ;;  %vm3519_vm6 = vcmp.eq.s32.totalorder %v3450_v47, %v5942_v54  ;;  %vm3551_vm7 = vcmp.eq.s32.totalorder %v3482_v25, %v5942_v54 }
 0x3d5   : > { %4084 = vmatpush3.msk.msra.mxu1 %vm3537_vm0, %v4186_v31  ;;  %v3481_v63 = vadd.s32 416, %v6236_v39  ;;  %v3433_v48 = vadd.s32 32, %v6236_v39  ;;  %vm3503_vm9 = vcmp.eq.s32.totalorder %v3434_v26, %v5942_v54  ;;  %v3465_v42 = vadd.s32 288, %v6236_v39 }
 0x3d6   : > { %4085 = vmatprep.subr.msk.mxu1 %vm3552_vm3, %v4186_v31  ;;  %vm3535_vm10 = vcmp.eq.s32.totalorder %v3466_v36, %v5942_v54  ;;  %vm3518_vm11 = vcmp.eq.s32.totalorder %v3449_v4, %v5942_v54  ;;  %v3448_v50 = vadd.s32 152, %v6236_v39  ;;  %v3480_v57 = vadd.s32 408, %v6236_v39 }
 0x3d7   : > { %4086 = vmatpush3.msk.msra.mxu1 %vm3536_vm5, %v4186_v31  ;;  %vm3550_vm12 = vcmp.eq.s32.totalorder %v3481_v63, %v5942_v54  ;;  %vm3534_vm14 = vcmp.eq.s32.totalorder %v3465_v42, %v5942_v54  ;;  %v3432_v0 = vadd.s32 24, %v6236_v39  ;;  %v3464_v45 = vadd.s32 280, %v6236_v39 }
 0x3d8   : > { %4087 = vmatprep.subr.msk.mxu1 %vm3551_vm7, %v4186_v31  ;;  %v3447_v15 = vadd.s32 144, %v6236_v39  ;;  %vm3549_vm0 = vcmp.eq.s32.totalorder %v3480_v57, %v5942_v54  ;;  %v3479_v16 = vadd.s32 400, %v6236_v39  ;;  %v3462_v12 = vadd.s32 264, %v6236_v39 }
 0x3d9   : > { %4088 = vmatpush3.msk.msra.mxu1 %vm3535_vm10, %v4186_v31  ;;  %vm3533_vm3 = vcmp.eq.s32.totalorder %v3464_v45, %v5942_v54  ;;  %v3461_v38 = vadd.s32 256, %v6236_v39 }
 0x3da   : > { %4089 = vmatprep.subr.msk.mxu1 %vm3550_vm12, %v4186_v31  ;;  %vm3548_vm5 = vcmp.eq.s32.totalorder %v3479_v16, %v5942_v54 }
 0x3db   : > { %4090 = vmatpush3.msk.msra.mxu1 %vm3534_vm14, %v4186_v31  ;;  %vm3498_vm14 = vcmp.eq.s32.totalorder %v6236_v39, %v5942_v54 }
 0x3dc   : > { %4091 = vmatprep.subr.msk.mxu1 %vm3549_vm0, %v4186_v31 }
 0x3dd   : > { %4092 = vmatpush3.msk.msra.mxu1 %vm3533_vm3, %v4186_v31 }
 0x3de   : > { %4093 = vmatprep.subr.msk.mxu1 %vm3548_vm5, %v4186_v31 }
 0x3fc   : > { %v5987_v62 = vpop.permute.xlu1 %4124 }
 0x3fd   : > { %v4127_v35 = vunpack.i.h.bf16 %v5987_v62  ;;  %v4126_v29 = vunpack.i.l.bf16 %v5987_v62  ;;  %v3478_v62 = vadd.s32 392, %v6236_v39 }
 0x3ff   : > { %v3327_v53 = vsel %vm764_vm2, %v4126_v29, %v4127_v35 }
 0x400   : > { %v6041_v44 = vmax.f32 %v5899_v13, %v3327_v53  ;;  %v3452_v13 = vadd.s32 184, %v6236_v39 }
 0x402   : > { %vm3521_vm13 = vcmp.eq.s32.totalorder %v3452_v13, %v5942_v54 }
 0x403   : > { %4048 = vmatprep.subr.msk.mxu0 %vm3521_vm13, %v4186_v31  ;;  %vm3502_vm13 = vcmp.eq.s32.totalorder %v3433_v48, %v5942_v54 }
 0x404   : > { %4049 = vmatpush3.msk.msra.mxu0 %vm3505_vm15, %v4186_v31  ;;  %vm3517_vm15 = vcmp.eq.s32.totalorder %v3448_v50, %v5942_v54 }
 0x405   : > { %4050 = vmatprep.subr.msk.mxu0 %vm3520_vm1, %v4186_v31  ;;  %vm3501_vm1 = vcmp.eq.s32.totalorder %v3432_v0, %v5942_v54 }
 0x406   : > { %4051 = vmatpush3.msk.msra.mxu0 %vm3504_vm4, %v4186_v31  ;;  %vm3516_vm4 = vcmp.eq.s32.totalorder %v3447_v15, %v5942_v54 }
 0x407   : > { %4052 = vmatprep.subr.msk.mxu0 %vm3519_vm6, %v4186_v31 }
 0x408   : > { %4053 = vmatpush3.msk.msra.mxu0 %vm3503_vm9, %v4186_v31  ;;  %vm3547_vm9 = vcmp.eq.s32.totalorder %v3478_v62, %v5942_v54 }
 0x409   : > { %4054 = vmatprep.subr.msk.mxu0 %vm3518_vm11, %v4186_v31  ;;  %vm3531_vm11 = vcmp.eq.s32.totalorder %v3462_v12, %v5942_v54 }
 0x40a   : > { %4055 = vmatpush3.msk.msra.mxu0 %vm3502_vm13, %v4186_v31 }
 0x40b   : > { %4056 = vmatprep.subr.msk.mxu0 %vm3517_vm15, %v4186_v31  ;;  %vm3530_vm15 = vcmp.eq.s32.totalorder %v3461_v38, %v5942_v54 }
 0x40c   : > { %4057 = vmatpush3.msk.msra.mxu0 %vm3501_vm1, %v4186_v31 }
 0x40d   : > { %4058 = vmatprep.subr.msk.mxu0 %vm3516_vm4, %v4186_v31 }
 0x426   : > { %v6020_v52 = vpop.permute.xlu0 %4129 }
 0x427   : > { %v4132_v5 = vunpack.i.h.bf16 %v6020_v52  ;;  %v4131_v11 = vunpack.i.l.bf16 %v6020_v52 }
 0x429   : > { %v3328_v33 = vsel %vm764_vm2, %v4127_v35, %v4131_v11  ;;  %v6051_v17 = vsel %vm764_vm2, %v4131_v11, %v4132_v5 }
 0x42a   : > { %v6054_v8 = vmax.f32 %v5902_v49, %v3328_v33  ;;  %v6129_v41 = vmax.f32 %v5908_v20, %v6051_v17  ;;  %v3431_v20 = vadd.s32 16, %v6236_v39  ;;  %v3477_v33 = vadd.s32 384, %v6236_v39 }
 0x42c   : > { %v4148_v49 = vpack.i.bf16 %v6054_v8, %v6041_v44  ;;  %vm3500_vm6 = vcmp.eq.s32.totalorder %v3431_v20, %v5942_v54  ;;  %vm3546_vm13 = vcmp.eq.s32.totalorder %v3477_v33, %v5942_v54 }
 0x42d   : > { %4059 = vmatpush3.msk.msra.mxu0 %vm3500_vm6, %v4186_v31 }
 0x42e   : > { %4149 = vrot.lane.b32.xlu0 %v4148_v49, %s4184_s14 }
 0x434   : > { %v4135_v56 = vpop.permute.xlu1 %4134 }
 0x435   : > { %v4137_v19 = vunpack.i.h.bf16 %v4135_v56  ;;  %v4136_v10 = vunpack.i.l.bf16 %v4135_v56 }
 0x436   : > { %v4140_v35 = vpop.permute.xlu0 %4139 }
 0x437   : > { %v3331_v53 = vsel %vm764_vm2, %v4136_v10, %v4137_v19  ;;  %v4142_v30 = vunpack.i.h.bf16 %v4140_v35  ;;  %v4141_v9 = vunpack.i.l.bf16 %v4140_v35  ;;  %v3330_v51 = vsel %vm764_vm2, %v4132_v5, %v4136_v10 }
 0x438   : > { %v6138_v22 = vmax.f32 %v5920_v21, %v3331_v53  ;;  %v4145_v32 = vpop.permute.xlu1 %4144  ;;  %v3463_v5 = vadd.s32 272, %v6236_v39  ;;  %v3350_v23 = vmax.f32 %v5911_v3, %v3330_v51 }
 0x439   : > { %v3332_v55 = vsel %vm764_vm2, %v4137_v19, %v4141_v9  ;;  %v3333_v7 = vsel %vm764_vm2, %v4141_v9, %v4142_v30  ;;  %v4147_v24 = vunpack.i.h.bf16 %v4145_v32  ;;  %v4146_v37 = vunpack.i.l.bf16 %v4145_v32 }
 0x43a   : > { %v6148_v21 = vmax.f32 %v5923_v59, %v3332_v55  ;;  %v3353_v61 = vmax.f32 %v5931_v58, %v3333_v7  ;;  %v4153_v52 = vpack.i.bf16 %v6138_v22, %v6129_v41  ;;  %v3446_v59 = vadd.s32 136, %v6236_v39 }
 0x43b   : > { %v3325_v1 = vsel %vm764_vm2, %v4146_v37, %v4147_v24  ;;  %v3326_v28 = vsel %vm764_vm2, %v4147_v24, %v4126_v29  ;;  %vm3532_vm2 = vcmp.eq.s32.totalorder %v3463_v5, %v5942_v54  ;;  %v3430_v29 = vadd.s32 8, %v6236_v39 }
 0x43c   : > { %v6162_v11 = vmax.f32 %v5926_v2, %v3325_v1  ;;  %v6165_v58 = vmax.f32 %v5917_v6, %v3326_v28  ;;  %4154 = vrot.lane.b32.xlu1 %v4153_v52, %s4184_s14  ;;  %v4158_v43 = vpack.i.bf16 %v3353_v61, %v6148_v21  ;;  %vm3515_vm7 = vcmp.eq.s32.totalorder %v3446_v59, %v5942_v54 }
 0x43d   : > { %4094 = vmatpush3.msk.msra.mxu1 %vm3532_vm2, %v4186_v31  ;;  %v3445_v2 = vadd.s32 128, %v6236_v39  ;;  %4060 = vmatprep.subr.msk.mxu0 %vm3515_vm7, %v4186_v31  ;;  %vm3499_vm10 = vcmp.eq.s32.totalorder %v3430_v29, %v5942_v54 }
 0x43e   : > { %4159 = vrot.lane.b32.xlu0 %v4158_v43, %s4184_s14  ;;  %v4163_v6 = vpack.i.bf16 %v6165_v58, %v6162_v11  ;;  %4095 = vmatprep.subr.msk.mxu1 %vm3547_vm9, %v4186_v31 }
 0x43f   : > { %4061 = vmatpush3.msk.msra.mxu0 %vm3499_vm10, %v4186_v31  ;;  %vm3514_vm12 = vcmp.eq.s32.totalorder %v3445_v2, %v5942_v54  ;;  %4096 = vmatpush3.msk.msra.mxu1 %vm3531_vm11, %v4186_v31 }
 0x440   : > { %4164 = vrot.lane.b32.xlu1 %v4163_v6, %s4184_s14  ;;  %4062 = vmatprep.subr.msk.mxu0 %vm3514_vm12, %v4186_v31 }
 0x441   : > { %4097 = vmatprep.subr.msk.mxu1 %vm3546_vm13, %v4186_v31  ;;  %4063 = vmatpush3.msk.msra.mxu0 %vm3498_vm14, %v4186_v31 }
 0x442   : > { %3392 = vrot.lane.b32.xlu0 %v3350_v23, %s4184_s14  ;;  %4098 = vmatpush3.msk.msra.mxu1 %vm3530_vm15, %v4186_v31 }
 0x4a0   : > { %v4150_v3 = vpop.permute.xlu0 %4149 }
 0x4a1   : > { %v4152_v17 = vunpack.i.h.bf16 %v4150_v3  ;;  %v4151_v13 = vunpack.i.l.bf16 %v4150_v3 }
 0x4a3   : > { %v3402_v39 = vsel %vm954_vm8, %v4151_v13, %v4152_v17 }
 0x4a4   : > { %v3418_v60 = vmax.f32 %v6041_v44, %v3402_v39 }
 0x4ae   : > { %v4155_v40 = vpop.permute.xlu1 %4154 }
 0x4af   : > { %v4156_v49 = vunpack.i.l.bf16 %v4155_v40  ;;  %v4157_v34 = vunpack.i.h.bf16 %v4155_v40 }
 0x4b0   : > { %v4160_v18 = vpop.permute.xlu0 %4159 }
 0x4b1   : > { %v3403_v46 = vsel %vm954_vm8, %v4152_v17, %v4156_v49  ;;  %v4162_v54 = vunpack.i.h.bf16 %v4160_v18  ;;  %v4161_v27 = vunpack.i.l.bf16 %v4160_v18 }
 0x4b2   : > { %v4165_v14 = vpop.permute.xlu1 %4164  ;;  %v3419_v47 = vmax.f32 %v6054_v8, %v3403_v46 }
 0x4b3   : > { %v3406_v31 = vsel %vm954_vm8, %v4157_v34, %v4161_v27  ;;  %v3407_v25 = vsel %vm954_vm8, %v4161_v27, %v4162_v54  ;;  %v4167_v26 = vunpack.i.h.bf16 %v4165_v14  ;;  %v4166_v36 = vunpack.i.l.bf16 %v4165_v14 }
 0x4b4   : > { %v3393_v4 = vpop.permute.xlu0 %3392  ;;  %v3425_v63 = vmax.f32 %v3418_v60, %v3419_v47  ;;  %v3422_v48 = vmax.f32 %v6138_v22, %v3406_v31  ;;  %v3423_v42 = vmax.f32 %v6148_v21, %v3407_v25 }
 0x4b5   : > { %v3401_v50 = vsel %vm954_vm8, %v4167_v26, %v4151_v13  ;;  %v3400_v57 = vsel %vm954_vm8, %v4166_v36, %v4167_v26  ;;  %v3404_v44 = vsel %vm954_vm8, %v4156_v49, %v3393_v4  ;;  %v3405_v8 = vsel %vm954_vm8, %v3393_v4, %v4157_v34 }
 0x4b6   : > { %v3417_v56 = vmax.f32 %v6165_v58, %v3401_v50  ;;  %v3416_v0 = vmax.f32 %v6162_v11, %v3400_v57  ;;  %v3420_v45 = vmax.f32 %v6129_v41, %v3404_v44  ;;  %v3421_v15 = vmax.f32 %v3350_v23, %v3405_v8  ;;  %3754 = vmatprep.mubr.f32.mxu0 %v3425_v63 }
 0x4b7   : > { %v3427_v19 = vmax.f32 %v3422_v48, %v3423_v42 }
 0x4b8   : > { %v3426_v10 = vmax.f32 %v3420_v45, %v3421_v15  ;;  %v3424_v35 = vmax.f32 %v3416_v0, %v3417_v56 }
 0x4b9   : > { %3824 = vmatprep.mubr.f32.mxu1 %v3427_v19 }
 0x4ba   : > { %3755 = vmatmul.mubr.f32.vlgmr.msra.gmra.mxu0 %v3424_v35  ;;  %3825 = vmatmul.mubr.f32.vlgmr.msra.gmra.mxu1 %v3426_v10 }
 0x57a   : > { %v4064_v16 = vpop.f32.mrf.mxu0  ;;  %v4099_v53 = vpop.f32.mrf.mxu1 }
 0x57c   : > { %v4065_v30 = vpop.f32.mrf.mxu0  ;;  %v4100_v9 = vpop.f32.mrf.mxu1 }
 0x57d   : > { %v4066_v51 = vadd.f32 %v4065_v30, %v4064_v16  ;;  %v4101_v22 = vadd.f32 %v4100_v9, %v4099_v53 }
 0x57f   : > { %v3827_v41 = vadd.f32 %v4101_v22, %v4066_v51 }
 0x581   : > { %3830 = vst [vmem:[%s276_s15] sm:$0xff] %v3827_v41 }
 0x582 PF: > { %s17_s24 = sadd.s32 1, %s4174_s24  }
 0x583   : > { %p14_p4 = scmp.ge.s32.totalorder %s17_s24, 4  }
 0x585   :  { %16 = sbr.rel (!%p14_p4) target bundleno = 1 (0x1), region = 78 }

</bundles_post_ra>
